<compile_context>
chip_gen: v6e
topology: v6e:2x2x1
jax: 0.10.0
libtpu: 0.0.40
codegen_flags: <defaults>
</compile_context>

<pallas_src>
import functools
import math

import jax
import jax.numpy as jnp
from jax.experimental import pallas as pl
from jax.experimental.pallas import tpu as pltpu

_EPS = 1e-5          # torch BatchNorm1d default eps
_COORD_PAD = 8       # pad point-coordinate / grid channel dim (3 or 2) up to 8


# ----------------------------------------------------------------------------
# Small helpers
# ----------------------------------------------------------------------------
def _round_up(v, m):
    return ((v + m - 1) // m) * m


def _pick_tile(n, preferred=(2048, 1024, 512, 256, 128, 64, 32, 16, 8)):
    """Largest preferred tile (multiple of 8) that divides n, else full n."""
    for t in preferred:
        if t <= n and n % t == 0:
            return t
    return n


def _vmem_limit(blocks):
    """Rough double-buffered working-set estimate -> vmem_limit_bytes."""
    total = 0
    for shape, dtype in blocks:
        total += math.prod(shape) * jnp.dtype(dtype).itemsize
    total = 2 * total + (4 << 20)                       # double buffer + headroom
    return int(min(max(total, 16 << 20), 64 << 20))     # stay under v7x physical


def _full_spec(shape):
    n = len(shape)
    return pl.BlockSpec(shape, lambda *_: (0,) * n)


# ----------------------------------------------------------------------------
# Encoder per-point kernel: [BN(prev)+ReLU prologue] -> matmul+bias ->
#   {raw tile out | fused running max}, + per-batch partial BN statistics.
# grid = (B, point_tiles), semantics ("parallel", "arbitrary")
# ----------------------------------------------------------------------------
def _enc_pointwise_kernel(x_ref, mu_ref, istd_ref, w_ref, b_ref, *out_refs,
                          prologue_relu, write_y, track_max):
    j = pl.program_id(1)
    idx = 0
    y_ref = None
    if write_y:
        y_ref = out_refs[idx]
        idx += 1
    s_ref = out_refs[idx]
    ss_ref = out_refs[idx + 1]
    idx += 2
    mx_ref = out_refs[idx] if track_max else None

    x = x_ref[0].astype(jnp.float32)                       # (tn, Cin)
    h = (x - mu_ref[...]) * istd_ref[...]                  # fold previous layer's BN
    if prologue_relu:
        h = jnp.maximum(h, 0.0)
    y = jnp.dot(h.astype(jnp.bfloat16), w_ref[...],
                preferred_element_type=jnp.float32) + b_ref[...]   # (tn, Cout) f32

    if write_y:
        y_ref[...] = y.astype(y_ref.dtype)[None]

    @pl.when(j == 0)
    def _init():
        s_ref[...] = jnp.zeros_like(s_ref)
        ss_ref[...] = jnp.zeros_like(ss_ref)
        if track_max:
            mx_ref[...] = jnp.full(mx_ref.shape, -jnp.inf, mx_ref.dtype)

    s_ref[...] = s_ref[...] + jnp.sum(y, axis=0, keepdims=True)[None]
    ss_ref[...] = ss_ref[...] + jnp.sum(y * y, axis=0, keepdims=True)[None]
    if track_max:
        mx_ref[...] = jnp.maximum(mx_ref[...],
                                  jnp.max(y, axis=0, keepdims=True)[None])


def _enc_layer(x, mean, istd, w, bias, *, prologue_relu, write_y, track_max,
               out_dtype=jnp.bfloat16):
    B, N, Cin = x.shape
    Cout = w.shape[1]
    tn = _pick_tile(N)
    nt = N // tn

    kernel = functools.partial(_enc_pointwise_kernel, prologue_relu=prologue_relu,
                               write_y=write_y, track_max=track_max)

    out_shape, out_specs = [], []
    if write_y:
        out_shape.append(jax.ShapeDtypeStruct((B, N, Cout), out_dtype))
        out_specs.append(pl.BlockSpec((1, tn, Cout), lambda b, j: (b, j, 0)))
    for _ in range(2):
        out_shape.append(jax.ShapeDtypeStruct((B, 1, Cout), jnp.float32))
        out_specs.append(pl.BlockSpec((1, 1, Cout), lambda b, j: (b, 0, 0)))
    if track_max:
        out_shape.append(jax.ShapeDtypeStruct((B, 1, Cout), jnp.float32))
        out_specs.append(pl.BlockSpec((1, 1, Cout), lambda b, j: (b, 0, 0)))

    in_specs = [
        pl.BlockSpec((1, tn, Cin), lambda b, j: (b, j, 0)),
        pl.BlockSpec((1, Cin), lambda b, j: (0, 0)),
        pl.BlockSpec((1, Cin), lambda b, j: (0, 0)),
        pl.BlockSpec((Cin, Cout), lambda b, j: (0, 0)),
        pl.BlockSpec((1, Cout), lambda b, j: (0, 0)),
    ]

    vmem = _vmem_limit([((tn, Cin), x.dtype), ((Cin, Cout), w.dtype),
                        ((tn, Cout), out_dtype), ((4, Cout), jnp.float32),
                        ((2, Cin), jnp.float32)])

    return pl.pallas_call(
        kernel,
        grid=(B, nt),
        out_shape=tuple(out_shape),
        in_specs=in_specs,
        out_specs=tuple(out_specs),
        compiler_params=pltpu.CompilerParams(
            dimension_semantics=("parallel", "arbitrary"),
            vmem_limit_bytes=vmem),
    )(x, mean, istd, w, bias)


# ----------------------------------------------------------------------------
# Encoder head: BN4-normalized global feature -> fc1+BN+ReLU -> fc2+BN+ReLU -> fc3.
# Tiny (B x 512) problem -> single block, one pallas_call.
# ----------------------------------------------------------------------------
def _head_kernel(g_ref, mu4_ref, is4_ref, w1_ref, b1_ref, w2_ref, b2_ref,
                 w3_ref, b3_ref, o_ref):
    g = (g_ref[...].astype(jnp.float32) - mu4_ref[...]) * is4_ref[...]   # BN4 (no ReLU)

    def fc_bn_relu(h, w_ref, b_ref):
        y = jnp.dot(h.astype(jnp.bfloat16), w_ref[...],
                    preferred_element_type=jnp.float32) + b_ref[...]
        mu = jnp.mean(y, axis=0, keepdims=True)
        var = jnp.mean(jnp.square(y - mu), axis=0, keepdims=True)
        return jnp.maximum((y - mu) * jax.lax.rsqrt(var + _EPS), 0.0)

    h = fc_bn_relu(g, w1_ref, b1_ref)
    h = fc_bn_relu(h, w2_ref, b2_ref)
    m = jnp.dot(h.astype(jnp.bfloat16), w3_ref[...],
                preferred_element_type=jnp.float32) + b3_ref[...]
    o_ref[...] = m.astype(o_ref.dtype)


def _encoder_head(gmax, mu4, istd4, fc1, fc2, fc3):
    B, _ = gmax.shape
    w1, b1 = fc1
    w2, b2 = fc2
    w3, b3 = fc3
    nlat = w3.shape[1]
    args = (gmax, mu4, istd4, w1, b1, w2, b2, w3, b3)
    vmem = _vmem_limit([(a.shape, a.dtype) for a in args] + [((B, nlat), jnp.float32)])
    return pl.pallas_call(
        _head_kernel,
        out_shape=jax.ShapeDtypeStruct((B, nlat), jnp.float32),
        in_specs=[_full_spec(a.shape) for a in args],
        out_specs=_full_spec((B, nlat)),
        compiler_params=pltpu.CompilerParams(vmem_limit_bytes=vmem),
    )(*args)


# ----------------------------------------------------------------------------
# Decoder layer 1 (all patches batched): y1 = grid @ W1g + m @ W1m + b1
# (algebraic split of cat((grid, latent)) @ W1) + partial BN1 statistics.
# grid = (P, B, point_tiles), semantics ("parallel", "parallel", "arbitrary")
# ----------------------------------------------------------------------------
def _dec_layer1_kernel(g_ref, m_ref, wg_ref, wm_ref, b_ref, y_ref, s_ref, ss_ref):
    j = pl.program_id(2)
    g = g_ref[0].astype(jnp.bfloat16)                                    # (tn, dimp)
    gw = jnp.dot(g, wg_ref[0], preferred_element_type=jnp.float32)       # (tn, nlp)
    mw = jnp.dot(m_ref[0], wm_ref[0], preferred_element_type=jnp.float32)  # (1, nlp)
    y = gw + mw + b_ref[0]                                               # (tn, nlp) f32
    y_ref[...] = y.astype(y_ref.dtype)[None, None]

    @pl.when(j == 0)
    def _init():
        s_ref[...] = jnp.zeros_like(s_ref)
        ss_ref[...] = jnp.zeros_like(ss_ref)

    s_ref[...] = s_ref[...] + jnp.sum(y, axis=0, keepdims=True)[None, None]
    ss_ref[...] = ss_ref[...] + jnp.sum(y * y, axis=0, keepdims=True)[None, None]


def _dec_layer1(grids, m, wg, wm, bias):
    P, Np, dimp = grids.shape
    B, nlat = m.shape
    nlp = wg.shape[2]
    tn = _pick_tile(Np)
    nt = Np // tn
    m3 = m.astype(jnp.bfloat16).reshape(B, 1, nlat)

    vmem = _vmem_limit([((tn, dimp), grids.dtype), ((nlat, nlp), wm.dtype),
                        ((dimp, nlp), wg.dtype), ((tn, nlp), jnp.bfloat16),
                        ((4, nlp), jnp.float32)])

    return pl.pallas_call(
        _dec_layer1_kernel,
        grid=(P, B, nt),
        out_shape=(
            jax.ShapeDtypeStruct((P, B, Np, nlp), jnp.bfloat16),
            jax.ShapeDtypeStruct((P, B, 1, nlp), jnp.float32),
            jax.ShapeDtypeStruct((P, B, 1, nlp), jnp.float32),
        ),
        in_specs=[
            pl.BlockSpec((1, tn, dimp), lambda p, bi, j: (p, j, 0)),
            pl.BlockSpec((1, 1, nlat), lambda p, bi, j: (bi, 0, 0)),
            pl.BlockSpec((1, dimp, nlp), lambda p, bi, j: (p, 0, 0)),
            pl.BlockSpec((1, nlat, nlp), lambda p, bi, j: (p, 0, 0)),
            pl.BlockSpec((1, 1, nlp), lambda p, bi, j: (p, 0, 0)),
        ],
        out_specs=(
            pl.BlockSpec((1, 1, tn, nlp), lambda p, bi, j: (p, bi, j, 0)),
            pl.BlockSpec((1, 1, 1, nlp), lambda p, bi, j: (p, bi, 0, 0)),
            pl.BlockSpec((1, 1, 1, nlp), lambda p, bi, j: (p, bi, 0, 0)),
        ),
        compiler_params=pltpu.CompilerParams(
            dimension_semantics=("parallel", "parallel", "arbitrary"),
            vmem_limit_bytes=vmem),
    )(grids, m3, wg, wm, bias)


# ----------------------------------------------------------------------------
# Decoder layers 2..4 (all patches batched): BN(prev)+ReLU prologue -> matmul+bias
# (-> tanh for the last layer), with optional BN statistics accumulation.
# ----------------------------------------------------------------------------
def _dec_pointwise_kernel(x_ref, mu_ref, istd_ref, w_ref, b_ref, *out_refs,
                          track_stats, final_tanh):
    j = pl.program_id(2)
    y_ref = out_refs[0]

    x = x_ref[0, 0].astype(jnp.float32)                       # (tn, Cin)
    h = jnp.maximum((x - mu_ref[0]) * istd_ref[0], 0.0)       # previous BN + ReLU
    y = jnp.dot(h.astype(jnp.bfloat16), w_ref[0],
                preferred_element_type=jnp.float32) + b_ref[0]
    if final_tanh:
        y = jnp.tanh(y)
    y_ref[...] = y.astype(y_ref.dtype)[None, None]

    if track_stats:
        s_ref, ss_ref = out_refs[1], out_refs[2]

        @pl.when(j == 0)
        def _init():
            s_ref[...] = jnp.zeros_like(s_ref)
            ss_ref[...] = jnp.zeros_like(ss_ref)

        s_ref[...] = s_ref[...] + jnp.sum(y, axis=0, keepdims=True)[None, None]
        ss_ref[...] = ss_ref[...] + jnp.sum(y * y, axis=0, keepdims=True)[None, None]


def _dec_layer(x, mean, istd, w, bias, *, track_stats, final_tanh, out_dtype):
    P, B, Np, Cin = x.shape
    Cout = w.shape[2]
    tn = _pick_tile(Np)
    nt = Np // tn
    kernel = functools.partial(_dec_pointwise_kernel, track_stats=track_stats,
                               final_tanh=final_tanh)

    out_shape = [jax.ShapeDtypeStruct((P, B, Np, Cout), out_dtype)]
    out_specs = [pl.BlockSpec((1, 1, tn, Cout), lambda p, bi, j: (p, bi, j, 0))]
    if track_stats:
        for _ in range(2):
            out_shape.append(jax.ShapeDtypeStruct((P, B, 1, Cout), jnp.float32))
            out_specs.append(pl.BlockSpec((1, 1, 1, Cout),
                                          lambda p, bi, j: (p, bi, 0, 0)))

    vmem = _vmem_limit([((tn, Cin), x.dtype), ((Cin, Cout), w.dtype),
                        ((tn, Cout), out_dtype), ((4, Cout), jnp.float32),
                        ((2, Cin), jnp.float32)])

    return pl.pallas_call(
        kernel,
        grid=(P, B, nt),
        out_shape=tuple(out_shape),
        in_specs=[
            pl.BlockSpec((1, 1, tn, Cin), lambda p, bi, j: (p, bi, j, 0)),
            pl.BlockSpec((1, 1, Cin), lambda p, bi, j: (p, 0, 0)),
            pl.BlockSpec((1, 1, Cin), lambda p, bi, j: (p, 0, 0)),
            pl.BlockSpec((1, Cin, Cout), lambda p, bi, j: (p, 0, 0)),
            pl.BlockSpec((1, 1, Cout), lambda p, bi, j: (p, 0, 0)),
        ],
        out_specs=tuple(out_specs),
        compiler_params=pltpu.CompilerParams(
            dimension_semantics=("parallel", "parallel", "arbitrary"),
            vmem_limit_bytes=vmem),
    )(x, mean, istd, w, bias)


# ----------------------------------------------------------------------------
# BatchNorm statistic finalization (tiny O(C) glue, plain JAX)
# ----------------------------------------------------------------------------
def _finalize_enc_bn(psum, psumsq, count):
    s = jnp.sum(psum, axis=(0, 1))
    ss = jnp.sum(psumsq, axis=(0, 1))
    mean = s / count
    var = jnp.maximum(ss / count - mean * mean, 0.0)
    istd = jax.lax.rsqrt(var + _EPS)
    return mean.reshape(1, -1), istd.reshape(1, -1)


def _finalize_dec_bn(psum, psumsq, count):
    s = jnp.sum(psum, axis=(1, 2))              # (P, C)
    ss = jnp.sum(psumsq, axis=(1, 2))
    mean = s / count
    var = jnp.maximum(ss / count - mean * mean, 0.0)
    istd = jax.lax.rsqrt(var + _EPS)
    return mean[:, None, :], istd[:, None, :]


# ----------------------------------------------------------------------------
# Deterministic parameter construction (synthetic init, no checkpoint)
# ----------------------------------------------------------------------------
def _init_wb(key, cin, cout, cin_pad=None, cout_pad=None, scale=0.1):
    cin_pad = cin if cin_pad is None else cin_pad
    cout_pad = cout if cout_pad is None else cout_pad
    kw, kb = jax.random.split(key)
    w = scale * jax.random.normal(kw, (cin, cout), jnp.float32)
    b = scale * jax.random.normal(kb, (cout,), jnp.float32)
    w = jnp.pad(w, ((0, cin_pad - cin), (0, cout_pad - cout))).astype(jnp.bfloat16)
    b = jnp.pad(b, ((0, cout_pad - cout),)).reshape(1, cout_pad).astype(jnp.float32)
    return w, b


def init_params(key, *, nlatent, dim, npoint, npatch):
    npp = npoint // npatch
    nl = dim + nlatent                   # mlpAdj(nlatent = dim + nlatent)
    nl2, nl4 = nl // 2, nl // 4
    nlp = _round_up(nl, 128)             # lane-dense padded decoder widths
    nl2p = _round_up(nl2, 128)
    nl4p = _round_up(nl4, 128)
    outp = 128                           # final 3-wide output padded to 128 lanes

    keys = jax.random.split(key, 8 + npatch * 5)
    enc = {
        "conv1": _init_wb(keys[0], 3, 128, cin_pad=_COORD_PAD),   # K: 3 -> 8
        "conv2": _init_wb(keys[1], 128, 128),
        "conv3": _init_wb(keys[2], 128, 256),
        "conv4": _init_wb(keys[3], 256, 512),
        "fc1": _init_wb(keys[4], 512, 256),
        "fc2": _init_wb(keys[5], 256, 128),
        "fc3": _init_wb(keys[6], 128, nlatent),
    }

    w1g_l, w1m_l, b1_l = [], [], []
    w2_l, b2_l, w3_l, b3_l, w4_l, b4_l, grids_l = [], [], [], [], [], [], []
    for i in range(npatch):
        kb = 8 + i * 5
        kw, kbias = jax.random.split(keys[kb + 0])
        # mlpAdj.conv1 (nl -> nl): split input rows into grid part / latent part.
        w1 = 0.1 * jax.random.normal(kw, (nl, nl), jnp.float32)
        b1 = 0.1 * jax.random.normal(kbias, (nl,), jnp.float32)
        w1g_l.append(jnp.pad(w1[:dim], ((0, _COORD_PAD - dim),
                                        (0, nlp - nl))).astype(jnp.bfloat16))
        w1m_l.append(jnp.pad(w1[dim:], ((0, 0), (0, nlp - nl))).astype(jnp.bfloat16))
        b1_l.append(jnp.pad(b1, ((0, nlp - nl),)).reshape(1, nlp).astype(jnp.float32))

        w2, b2 = _init_wb(keys[kb + 1], nl, nl2, cin_pad=nlp, cout_pad=nl2p)
        w3, b3 = _init_wb(keys[kb + 2], nl2, nl4, cin_pad=nl2p, cout_pad=nl4p)
        w4, b4 = _init_wb(keys[kb + 3], nl4, 3, cin_pad=nl4p, cout_pad=outp)
        w2_l.append(w2); b2_l.append(b2)
        w3_l.append(w3); b3_l.append(b3)
        w4_l.append(w4); b4_l.append(b4)

        # patch.data.uniform_(0, 1); patch.data[:, 2:, :] = 0  (no-op for dim=2)
        patch = jax.random.uniform(keys[kb + 4], (1, dim, npp), jnp.float32)
        patch = patch.at[:, 2:, :].set(0.0)
        grids_l.append(jnp.pad(jnp.transpose(patch[0], (1, 0)),
                               ((0, 0), (0, _COORD_PAD - dim))))   # (Np, 8)

    dec = {
        "grids": jnp.stack(grids_l),     # (P, Np, 8)  f32
        "w1g": jnp.stack(w1g_l),         # (P, 8, nlp) bf16
        "w1m": jnp.stack(w1m_l),         # (P, nlatent, nlp) bf16
        "b1": jnp.stack(b1_l),           # (P, 1, nlp) f32
        "w2": jnp.stack(w2_l), "b2": jnp.stack(b2_l),
        "w3": jnp.stack(w3_l), "b3": jnp.stack(b3_l),
        "w4": jnp.stack(w4_l), "b4": jnp.stack(b4_l),
    }
    return {"enc": enc, "dec": dec}


# ----------------------------------------------------------------------------
# Forward pass
# ----------------------------------------------------------------------------
def point_trans_mlp_adj_forward(params, x, *, dim):
    """x: (B, 3, N) point cloud -> (reconstruction (B, N, 3), patches list)."""
    B, three, N = x.shape
    assert three == 3
    enc, dec = params["enc"], params["dec"]

    # ---------------- PointNetfeat encoder ----------------
    pts = jnp.transpose(x, (0, 2, 1)).astype(jnp.float32)        # (B, N, 3)
    pts = jnp.pad(pts, ((0, 0), (0, 0), (0, _COORD_PAD - 3)))    # K: 3 -> 8
    count = float(B * N)
    ident_mu = jnp.zeros((1, _COORD_PAD), jnp.float32)
    ident_istd = jnp.ones((1, _COORD_PAD), jnp.float32)

    y1, s1, q1 = _enc_layer(pts, ident_mu, ident_istd, *enc["conv1"],
                            prologue_relu=False, write_y=True, track_max=False)
    mu1, istd1 = _finalize_enc_bn(s1, q1, count)
    y2, s2, q2 = _enc_layer(y1, mu1, istd1, *enc["conv2"],
                            prologue_relu=True, write_y=True, track_max=False)
    mu2, istd2 = _finalize_enc_bn(s2, q2, count)
    y3, s3, q3 = _enc_layer(y2, mu2, istd2, *enc["conv3"],
                            prologue_relu=True, write_y=True, track_max=False)
    mu3, istd3 = _finalize_enc_bn(s3, q3, count)
    # conv4 fused with BN4 statistics + global max-pool (activation never hits HBM;
    # max over points commutes with the monotone per-channel BN4 normalization).
    s4, q4, gmax = _enc_layer(y3, mu3, istd3, *enc["conv4"],
                              prologue_relu=True, write_y=False, track_max=True)
    mu4, istd4 = _finalize_enc_bn(s4, q4, count)
    gmax = gmax.reshape(B, -1)                                   # (B, 512) raw max
    m = _encoder_head(gmax, mu4, istd4, enc["fc1"], enc["fc2"], enc["fc3"])  # (B, nlatent)

    # ---------------- batched per-patch mlpAdj decoders ----------------
    P, Np = dec["grids"].shape[0], dec["grids"].shape[1]
    dcount = float(B * Np)

    y1d, s1d, q1d = _dec_layer1(dec["grids"], m, dec["w1g"], dec["w1m"], dec["b1"])
    mu1d, istd1d = _finalize_dec_bn(s1d, q1d, dcount)
    y2d, s2d, q2d = _dec_layer(y1d, mu1d, istd1d, dec["w2"], dec["b2"],
                               track_stats=True, final_tanh=False,
                               out_dtype=jnp.bfloat16)
    mu2d, istd2d = _finalize_dec_bn(s2d, q2d, dcount)
    y3d, s3d, q3d = _dec_layer(y2d, mu2d, istd2d, dec["w3"], dec["b3"],
                               track_stats=True, final_tanh=False,
                               out_dtype=jnp.bfloat16)
    mu3d, istd3d = _finalize_dec_bn(s3d, q3d, dcount)
    y4d = _dec_layer(y3d, mu3d, istd3d, dec["w4"], dec["b4"],
                     track_stats=False, final_tanh=True, out_dtype=jnp.float32)[0]

    out = y4d[..., :3]                                           # lane-dense kernel output, slice outside
    recon = jnp.transpose(out, (1, 0, 2, 3)).reshape(B, P * Np, 3)
    patches = [dec["grids"][i, :, :dim] for i in range(P)]
    return recon, patches


# ----------------------------------------------------------------------------
if __name__ == "__main__":
    B = 2
    NPOINT = 64
    NPATCH = 2
    NLATENT = 64
    DIM = 2

    key = jax.random.PRNGKey(0)
    kparam, kdata = jax.random.split(key)
    params = init_params(kparam, nlatent=NLATENT, dim=DIM,
                         npoint=NPOINT, npatch=NPATCH)

    x = jax.random.normal(kdata, (B, 3, NPOINT), jnp.float32)    # (B, 3, N) point cloud

    fwd = jax.jit(point_trans_mlp_adj_forward, static_argnames=("dim",))
    recon, patches = fwd(params, x, dim=DIM)
    recon = jax.block_until_ready(recon)
    patches = [jax.block_until_ready(p) for p in patches]

    assert recon.shape == (B, NPOINT, 3), recon.shape
    assert len(patches) == NPATCH and patches[0].shape == (NPOINT // NPATCH, DIM)
    assert bool(jnp.all(jnp.isfinite(recon)))
    print("KERNEL_OK")
</pallas_src>

<mosaic_0001>
module attributes {stable_mosaic.version = 11 : i64} {
  func.func @_enc_pointwise_kernel(%arg0: i32, %arg1: i32, %arg2: memref<1x64x8xf32, #tpu.memory_space<vmem>>, %arg3: memref<1x8xf32, #tpu.memory_space<vmem>>, %arg4: memref<1x8xf32, #tpu.memory_space<vmem>>, %arg5: memref<8x128xbf16, #tpu.memory_space<vmem>>, %arg6: memref<1x128xf32, #tpu.memory_space<vmem>>, %arg7: memref<1x64x128xbf16, #tpu.memory_space<vmem>>, %arg8: memref<1x1x128xf32, #tpu.memory_space<vmem>>, %arg9: memref<1x1x128xf32, #tpu.memory_space<vmem>>) attributes {dimension_semantics = [#tpu.dimension_semantics<parallel>, #tpu.dimension_semantics<arbitrary>], iteration_bounds = array<i64: 2, 1>, scalar_prefetch = 0 : i64, scratch_operands = 0 : i64, tpu.core_type = #tpu.core_type<tc>, window_params = [{transform_indices = @transform_0, window_bounds = array<i64: 1, 64, 8>}, {pipeline_mode = #tpu.pipeline_mode<synchronous>, transform_indices = @transform_1, window_bounds = array<i64: 1, 8>}, {pipeline_mode = #tpu.pipeline_mode<synchronous>, transform_indices = @transform_2, window_bounds = array<i64: 1, 8>}, {pipeline_mode = #tpu.pipeline_mode<synchronous>, transform_indices = @transform_3, window_bounds = array<i64: 8, 128>}, {pipeline_mode = #tpu.pipeline_mode<synchronous>, transform_indices = @transform_4, window_bounds = array<i64: 1, 128>}, {transform_indices = @transform_5, window_bounds = array<i64: 1, 64, 128>}, {transform_indices = @transform_6, window_bounds = array<i64: 1, 1, 128>}, {transform_indices = @transform_7, window_bounds = array<i64: 1, 1, 128>}]} {
    %c0 = arith.constant 0 : index
    %c0_0 = arith.constant 0 : index
    %c0_1 = arith.constant 0 : index
    %0 = vector.load %arg2[%c0, %c0_0, %c0_1] : memref<1x64x8xf32, #tpu.memory_space<vmem>>, vector<1x64x8xf32>
    %1 = vector.shape_cast %0 : vector<1x64x8xf32> to vector<64x8xf32>
    %c0_2 = arith.constant 0 : index
    %c0_3 = arith.constant 0 : index
    %2 = vector.load %arg3[%c0_2, %c0_3] : memref<1x8xf32, #tpu.memory_space<vmem>>, vector<1x8xf32>
    %3 = vector.broadcast %2 : vector<1x8xf32> to vector<64x8xf32>
    %4 = arith.subf %1, %3 : vector<64x8xf32>
    %c0_4 = arith.constant 0 : index
    %c0_5 = arith.constant 0 : index
    %5 = vector.load %arg4[%c0_4, %c0_5] : memref<1x8xf32, #tpu.memory_space<vmem>>, vector<1x8xf32>
    %6 = vector.broadcast %5 : vector<1x8xf32> to vector<64x8xf32>
    %7 = arith.mulf %4, %6 : vector<64x8xf32>
    %8 = arith.truncf %7 : vector<64x8xf32> to vector<64x8xbf16>
    %c0_6 = arith.constant 0 : index
    %c0_7 = arith.constant 0 : index
    %9 = vector.load %arg5[%c0_6, %c0_7] : memref<8x128xbf16, #tpu.memory_space<vmem>>, vector<8x128xbf16>
    %cst = arith.constant dense<0.000000e+00> : vector<64x128xf32>
    %10 = tpu.matmul %8, %9, %cst {dimension_numbers = #tpu.dot_dimension_numbers<[1], [0], [0], [1], [0, 0, 1, 1], [], []>} : vector<64x8xbf16>, vector<8x128xbf16>, vector<64x128xf32> -> vector<64x128xf32>
    %c0_8 = arith.constant 0 : index
    %c0_9 = arith.constant 0 : index
    %11 = vector.load %arg6[%c0_8, %c0_9] : memref<1x128xf32, #tpu.memory_space<vmem>>, vector<1x128xf32>
    %12 = vector.broadcast %11 : vector<1x128xf32> to vector<64x128xf32>
    %13 = arith.addf %10, %12 : vector<64x128xf32>
    %14 = arith.truncf %13 : vector<64x128xf32> to vector<64x128xbf16>
    %15 = vector.shape_cast %14 : vector<64x128xbf16> to vector<1x64x128xbf16>
    %c0_10 = arith.constant 0 : index
    %c0_11 = arith.constant 0 : index
    %c0_12 = arith.constant 0 : index
    %16 = vector.load %arg7[%c0_10, %c0_11, %c0_12] : memref<1x64x128xbf16, #tpu.memory_space<vmem>>, vector<1x64x128xbf16>
    tpu.vector_store %arg7[%c0_10, %c0_11, %c0_12], %15 {strides = array<i32>} : memref<1x64x128xbf16, #tpu.memory_space<vmem>>, vector<1x64x128xbf16>,
    %c0_i32 = arith.constant 0 : i32
    %17 = arith.cmpi eq, %arg1, %c0_i32 : i32
    %18 = arith.extui %17 : i1 to i32
    %c0_i32_13 = arith.constant 0 : i32
    %19 = arith.cmpi ne, %18, %c0_i32_13 : i32
    scf.if %19 {
      %cst_28 = arith.constant 0.000000e+00 : f32
      %33 = vector.broadcast %cst_28 : f32 to vector<1x1x128xf32>
      %c0_29 = arith.constant 0 : index
      %c0_30 = arith.constant 0 : index
      %c0_31 = arith.constant 0 : index
      %34 = vector.load %arg8[%c0_29, %c0_30, %c0_31] : memref<1x1x128xf32, #tpu.memory_space<vmem>>, vector<1x1x128xf32>
      tpu.vector_store %arg8[%c0_29, %c0_30, %c0_31], %33 {strides = array<i32>} : memref<1x1x128xf32, #tpu.memory_space<vmem>>, vector<1x1x128xf32>,
      %cst_32 = arith.constant 0.000000e+00 : f32
      %35 = vector.broadcast %cst_32 : f32 to vector<1x1x128xf32>
      %c0_33 = arith.constant 0 : index
      %c0_34 = arith.constant 0 : index
      %c0_35 = arith.constant 0 : index
      %36 = vector.load %arg9[%c0_33, %c0_34, %c0_35] : memref<1x1x128xf32, #tpu.memory_space<vmem>>, vector<1x1x128xf32>
      tpu.vector_store %arg9[%c0_33, %c0_34, %c0_35], %35 {strides = array<i32>} : memref<1x1x128xf32, #tpu.memory_space<vmem>>, vector<1x1x128xf32>,
    } else {
    }
    %c0_14 = arith.constant 0 : index
    %c0_15 = arith.constant 0 : index
    %c0_16 = arith.constant 0 : index
    %20 = vector.load %arg8[%c0_14, %c0_15, %c0_16] : memref<1x1x128xf32, #tpu.memory_space<vmem>>, vector<1x1x128xf32>
    %cst_17 = arith.constant dense<0.000000e+00> : vector<128xf32>
    %21 = vector.multi_reduction <add>, %13, %cst_17 [0] : vector<64x128xf32> to vector<128xf32>
    %22 = vector.shape_cast %21 : vector<128xf32> to vector<1x128xf32>
    %23 = vector.shape_cast %22 : vector<1x128xf32> to vector<1x1x128xf32>
    %24 = arith.addf %20, %23 : vector<1x1x128xf32>
    %c0_18 = arith.constant 0 : index
    %c0_19 = arith.constant 0 : index
    %c0_20 = arith.constant 0 : index
    %25 = vector.load %arg8[%c0_18, %c0_19, %c0_20] : memref<1x1x128xf32, #tpu.memory_space<vmem>>, vector<1x1x128xf32>
    tpu.vector_store %arg8[%c0_18, %c0_19, %c0_20], %24 {strides = array<i32>} : memref<1x1x128xf32, #tpu.memory_space<vmem>>, vector<1x1x128xf32>,
    %c0_21 = arith.constant 0 : index
    %c0_22 = arith.constant 0 : index
    %c0_23 = arith.constant 0 : index
    %26 = vector.load %arg9[%c0_21, %c0_22, %c0_23] : memref<1x1x128xf32, #tpu.memory_space<vmem>>, vector<1x1x128xf32>
    %27 = arith.mulf %13, %13 : vector<64x128xf32>
    %cst_24 = arith.constant dense<0.000000e+00> : vector<128xf32>
    %28 = vector.multi_reduction <add>, %27, %cst_24 [0] : vector<64x128xf32> to vector<128xf32>
    %29 = vector.shape_cast %28 : vector<128xf32> to vector<1x128xf32>
    %30 = vector.shape_cast %29 : vector<1x128xf32> to vector<1x1x128xf32>
    %31 = arith.addf %26, %30 : vector<1x1x128xf32>
    %c0_25 = arith.constant 0 : index
    %c0_26 = arith.constant 0 : index
    %c0_27 = arith.constant 0 : index
    %32 = vector.load %arg9[%c0_25, %c0_26, %c0_27] : memref<1x1x128xf32, #tpu.memory_space<vmem>>, vector<1x1x128xf32>
    tpu.vector_store %arg9[%c0_25, %c0_26, %c0_27], %31 {strides = array<i32>} : memref<1x1x128xf32, #tpu.memory_space<vmem>>, vector<1x1x128xf32>,
    return
  }
  func.func @transform_0(%arg0: i32, %arg1: i32) -> (i32, i32, i32) {
    %c0_i32 = arith.constant 0 : i32
    %c0_i32_0 = arith.constant 0 : i32
    return %arg0, %arg1, %c0_i32 : i32, i32, i32
  }
  func.func @transform_1(%arg0: i32, %arg1: i32) -> (i32, i32) {
    %c0_i32 = arith.constant 0 : i32
    %c0_i32_0 = arith.constant 0 : i32
    %c0_i32_1 = arith.constant 0 : i32
    return %c0_i32, %c0_i32_0 : i32, i32
  }
  func.func @transform_2(%arg0: i32, %arg1: i32) -> (i32, i32) {
    %c0_i32 = arith.constant 0 : i32
    %c0_i32_0 = arith.constant 0 : i32
    %c0_i32_1 = arith.constant 0 : i32
    return %c0_i32, %c0_i32_0 : i32, i32
  }
  func.func @transform_3(%arg0: i32, %arg1: i32) -> (i32, i32) {
    %c0_i32 = arith.constant 0 : i32
    %c0_i32_0 = arith.constant 0 : i32
    %c0_i32_1 = arith.constant 0 : i32
    return %c0_i32, %c0_i32_0 : i32, i32
  }
  func.func @transform_4(%arg0: i32, %arg1: i32) -> (i32, i32) {
    %c0_i32 = arith.constant 0 : i32
    %c0_i32_0 = arith.constant 0 : i32
    %c0_i32_1 = arith.constant 0 : i32
    return %c0_i32, %c0_i32_0 : i32, i32
  }
  func.func @transform_5(%arg0: i32, %arg1: i32) -> (i32, i32, i32) {
    %c0_i32 = arith.constant 0 : i32
    %c0_i32_0 = arith.constant 0 : i32
    return %arg0, %arg1, %c0_i32 : i32, i32, i32
  }
  func.func @transform_6(%arg0: i32, %arg1: i32) -> (i32, i32, i32) {
    %c0_i32 = arith.constant 0 : i32
    %c0_i32_0 = arith.constant 0 : i32
    %c0_i32_1 = arith.constant 0 : i32
    return %arg0, %c0_i32, %c0_i32_0 : i32, i32, i32
  }
  func.func @transform_7(%arg0: i32, %arg1: i32) -> (i32, i32, i32) {
    %c0_i32 = arith.constant 0 : i32
    %c0_i32_0 = arith.constant 0 : i32
    %c0_i32_1 = arith.constant 0 : i32
    return %arg0, %c0_i32, %c0_i32_0 : i32, i32, i32
  }
}

module attributes {stable_mosaic.version = 11 : i64} {
  func.func @_enc_pointwise_kernel(%arg0: i32, %arg1: i32, %arg2: memref<1x64x128xbf16, #tpu.memory_space<vmem>>, %arg3: memref<1x128xf32, #tpu.memory_space<vmem>>, %arg4: memref<1x128xf32, #tpu.memory_space<vmem>>, %arg5: memref<128x128xbf16, #tpu.memory_space<vmem>>, %arg6: memref<1x128xf32, #tpu.memory_space<vmem>>, %arg7: memref<1x64x128xbf16, #tpu.memory_space<vmem>>, %arg8: memref<1x1x128xf32, #tpu.memory_space<vmem>>, %arg9: memref<1x1x128xf32, #tpu.memory_space<vmem>>) attributes {dimension_semantics = [#tpu.dimension_semantics<parallel>, #tpu.dimension_semantics<arbitrary>], iteration_bounds = array<i64: 2, 1>, scalar_prefetch = 0 : i64, scratch_operands = 0 : i64, tpu.core_type = #tpu.core_type<tc>, window_params = [{transform_indices = @transform_0, window_bounds = array<i64: 1, 64, 128>}, {pipeline_mode = #tpu.pipeline_mode<synchronous>, transform_indices = @transform_1, window_bounds = array<i64: 1, 128>}, {pipeline_mode = #tpu.pipeline_mode<synchronous>, transform_indices = @transform_2, window_bounds = array<i64: 1, 128>}, {pipeline_mode = #tpu.pipeline_mode<synchronous>, transform_indices = @transform_3, window_bounds = array<i64: 128, 128>}, {pipeline_mode = #tpu.pipeline_mode<synchronous>, transform_indices = @transform_4, window_bounds = array<i64: 1, 128>}, {transform_indices = @transform_5, window_bounds = array<i64: 1, 64, 128>}, {transform_indices = @transform_6, window_bounds = array<i64: 1, 1, 128>}, {transform_indices = @transform_7, window_bounds = array<i64: 1, 1, 128>}]} {
    %c0 = arith.constant 0 : index
    %c0_0 = arith.constant 0 : index
    %c0_1 = arith.constant 0 : index
    %0 = vector.load %arg2[%c0, %c0_0, %c0_1] : memref<1x64x128xbf16, #tpu.memory_space<vmem>>, vector<1x64x128xbf16>
    %1 = vector.shape_cast %0 : vector<1x64x128xbf16> to vector<64x128xbf16>
    %2 = arith.extf %1 : vector<64x128xbf16> to vector<64x128xf32>
    %c0_2 = arith.constant 0 : index
    %c0_3 = arith.constant 0 : index
    %3 = vector.load %arg3[%c0_2, %c0_3] : memref<1x128xf32, #tpu.memory_space<vmem>>, vector<1x128xf32>
    %4 = vector.broadcast %3 : vector<1x128xf32> to vector<64x128xf32>
    %5 = arith.subf %2, %4 : vector<64x128xf32>
    %c0_4 = arith.constant 0 : index
    %c0_5 = arith.constant 0 : index
    %6 = vector.load %arg4[%c0_4, %c0_5] : memref<1x128xf32, #tpu.memory_space<vmem>>, vector<1x128xf32>
    %7 = vector.broadcast %6 : vector<1x128xf32> to vector<64x128xf32>
    %8 = arith.mulf %5, %7 : vector<64x128xf32>
    %cst = arith.constant 0.000000e+00 : f32
    %9 = vector.broadcast %cst : f32 to vector<64x128xf32>
    %10 = arith.maximumf %8, %9 : vector<64x128xf32>
    %11 = arith.truncf %10 : vector<64x128xf32> to vector<64x128xbf16>
    %c0_6 = arith.constant 0 : index
    %c0_7 = arith.constant 0 : index
    %12 = vector.load %arg5[%c0_6, %c0_7] : memref<128x128xbf16, #tpu.memory_space<vmem>>, vector<128x128xbf16>
    %cst_8 = arith.constant dense<0.000000e+00> : vector<64x128xf32>
    %13 = tpu.matmul %11, %12, %cst_8 {dimension_numbers = #tpu.dot_dimension_numbers<[1], [0], [0], [1], [0, 0, 1, 1], [], []>} : vector<64x128xbf16>, vector<128x128xbf16>, vector<64x128xf32> -> vector<64x128xf32>
    %c0_9 = arith.constant 0 : index
    %c0_10 = arith.constant 0 : index
    %14 = vector.load %arg6[%c0_9, %c0_10] : memref<1x128xf32, #tpu.memory_space<vmem>>, vector<1x128xf32>
    %15 = vector.broadcast %14 : vector<1x128xf32> to vector<64x128xf32>
    %16 = arith.addf %13, %15 : vector<64x128xf32>
    %17 = arith.truncf %16 : vector<64x128xf32> to vector<64x128xbf16>
    %18 = vector.shape_cast %17 : vector<64x128xbf16> to vector<1x64x128xbf16>
    %c0_11 = arith.constant 0 : index
    %c0_12 = arith.constant 0 : index
    %c0_13 = arith.constant 0 : index
    %19 = vector.load %arg7[%c0_11, %c0_12, %c0_13] : memref<1x64x128xbf16, #tpu.memory_space<vmem>>, vector<1x64x128xbf16>
    tpu.vector_store %arg7[%c0_11, %c0_12, %c0_13], %18 {strides = array<i32>} : memref<1x64x128xbf16, #tpu.memory_space<vmem>>, vector<1x64x128xbf16>,
    %c0_i32 = arith.constant 0 : i32
    %20 = arith.cmpi eq, %arg1, %c0_i32 : i32
    %21 = arith.extui %20 : i1 to i32
    %c0_i32_14 = arith.constant 0 : i32
    %22 = arith.cmpi ne, %21, %c0_i32_14 : i32
    scf.if %22 {
      %cst_29 = arith.constant 0.000000e+00 : f32
      %36 = vector.broadcast %cst_29 : f32 to vector<1x1x128xf32>
      %c0_30 = arith.constant 0 : index
      %c0_31 = arith.constant 0 : index
      %c0_32 = arith.constant 0 : index
      %37 = vector.load %arg8[%c0_30, %c0_31, %c0_32] : memref<1x1x128xf32, #tpu.memory_space<vmem>>, vector<1x1x128xf32>
      tpu.vector_store %arg8[%c0_30, %c0_31, %c0_32], %36 {strides = array<i32>} : memref<1x1x128xf32, #tpu.memory_space<vmem>>, vector<1x1x128xf32>,
      %cst_33 = arith.constant 0.000000e+00 : f32
      %38 = vector.broadcast %cst_33 : f32 to vector<1x1x128xf32>
      %c0_34 = arith.constant 0 : index
      %c0_35 = arith.constant 0 : index
      %c0_36 = arith.constant 0 : index
      %39 = vector.load %arg9[%c0_34, %c0_35, %c0_36] : memref<1x1x128xf32, #tpu.memory_space<vmem>>, vector<1x1x128xf32>
      tpu.vector_store %arg9[%c0_34, %c0_35, %c0_36], %38 {strides = array<i32>} : memref<1x1x128xf32, #tpu.memory_space<vmem>>, vector<1x1x128xf32>,
    } else {
    }
    %c0_15 = arith.constant 0 : index
    %c0_16 = arith.constant 0 : index
    %c0_17 = arith.constant 0 : index
    %23 = vector.load %arg8[%c0_15, %c0_16, %c0_17] : memref<1x1x128xf32, #tpu.memory_space<vmem>>, vector<1x1x128xf32>
    %cst_18 = arith.constant dense<0.000000e+00> : vector<128xf32>
    %24 = vector.multi_reduction <add>, %16, %cst_18 [0] : vector<64x128xf32> to vector<128xf32>
    %25 = vector.shape_cast %24 : vector<128xf32> to vector<1x128xf32>
    %26 = vector.shape_cast %25 : vector<1x128xf32> to vector<1x1x128xf32>
    %27 = arith.addf %23, %26 : vector<1x1x128xf32>
    %c0_19 = arith.constant 0 : index
    %c0_20 = arith.constant 0 : index
    %c0_21 = arith.constant 0 : index
    %28 = vector.load %arg8[%c0_19, %c0_20, %c0_21] : memref<1x1x128xf32, #tpu.memory_space<vmem>>, vector<1x1x128xf32>
    tpu.vector_store %arg8[%c0_19, %c0_20, %c0_21], %27 {strides = array<i32>} : memref<1x1x128xf32, #tpu.memory_space<vmem>>, vector<1x1x128xf32>,
    %c0_22 = arith.constant 0 : index
    %c0_23 = arith.constant 0 : index
    %c0_24 = arith.constant 0 : index
    %29 = vector.load %arg9[%c0_22, %c0_23, %c0_24] : memref<1x1x128xf32, #tpu.memory_space<vmem>>, vector<1x1x128xf32>
    %30 = arith.mulf %16, %16 : vector<64x128xf32>
    %cst_25 = arith.constant dense<0.000000e+00> : vector<128xf32>
    %31 = vector.multi_reduction <add>, %30, %cst_25 [0] : vector<64x128xf32> to vector<128xf32>
    %32 = vector.shape_cast %31 : vector<128xf32> to vector<1x128xf32>
    %33 = vector.shape_cast %32 : vector<1x128xf32> to vector<1x1x128xf32>
    %34 = arith.addf %29, %33 : vector<1x1x128xf32>
    %c0_26 = arith.constant 0 : index
    %c0_27 = arith.constant 0 : index
    %c0_28 = arith.constant 0 : index
    %35 = vector.load %arg9[%c0_26, %c0_27, %c0_28] : memref<1x1x128xf32, #tpu.memory_space<vmem>>, vector<1x1x128xf32>
    tpu.vector_store %arg9[%c0_26, %c0_27, %c0_28], %34 {strides = array<i32>} : memref<1x1x128xf32, #tpu.memory_space<vmem>>, vector<1x1x128xf32>,
    return
  }
  func.func @transform_0(%arg0: i32, %arg1: i32) -> (i32, i32, i32) {
    %c0_i32 = arith.constant 0 : i32
    %c0_i32_0 = arith.constant 0 : i32
    return %arg0, %arg1, %c0_i32 : i32, i32, i32
  }
  func.func @transform_1(%arg0: i32, %arg1: i32) -> (i32, i32) {
    %c0_i32 = arith.constant 0 : i32
    %c0_i32_0 = arith.constant 0 : i32
    %c0_i32_1 = arith.constant 0 : i32
    return %c0_i32, %c0_i32_0 : i32, i32
  }
  func.func @transform_2(%arg0: i32, %arg1: i32) -> (i32, i32) {
    %c0_i32 = arith.constant 0 : i32
    %c0_i32_0 = arith.constant 0 : i32
    %c0_i32_1 = arith.constant 0 : i32
    return %c0_i32, %c0_i32_0 : i32, i32
  }
  func.func @transform_3(%arg0: i32, %arg1: i32) -> (i32, i32) {
    %c0_i32 = arith.constant 0 : i32
    %c0_i32_0 = arith.constant 0 : i32
    %c0_i32_1 = arith.constant 0 : i32
    return %c0_i32, %c0_i32_0 : i32, i32
  }
  func.func @transform_4(%arg0: i32, %arg1: i32) -> (i32, i32) {
    %c0_i32 = arith.constant 0 : i32
    %c0_i32_0 = arith.constant 0 : i32
    %c0_i32_1 = arith.constant 0 : i32
    return %c0_i32, %c0_i32_0 : i32, i32
  }
  func.func @transform_5(%arg0: i32, %arg1: i32) -> (i32, i32, i32) {
    %c0_i32 = arith.constant 0 : i32
    %c0_i32_0 = arith.constant 0 : i32
    return %arg0, %arg1, %c0_i32 : i32, i32, i32
  }
  func.func @transform_6(%arg0: i32, %arg1: i32) -> (i32, i32, i32) {
    %c0_i32 = arith.constant 0 : i32
    %c0_i32_0 = arith.constant 0 : i32
    %c0_i32_1 = arith.constant 0 : i32
    return %arg0, %c0_i32, %c0_i32_0 : i32, i32, i32
  }
  func.func @transform_7(%arg0: i32, %arg1: i32) -> (i32, i32, i32) {
    %c0_i32 = arith.constant 0 : i32
    %c0_i32_0 = arith.constant 0 : i32
    %c0_i32_1 = arith.constant 0 : i32
    return %arg0, %c0_i32, %c0_i32_0 : i32, i32, i32
  }
}

module attributes {stable_mosaic.version = 11 : i64} {
  func.func @_enc_pointwise_kernel(%arg0: i32, %arg1: i32, %arg2: memref<1x64x128xbf16, #tpu.memory_space<vmem>>, %arg3: memref<1x128xf32, #tpu.memory_space<vmem>>, %arg4: memref<1x128xf32, #tpu.memory_space<vmem>>, %arg5: memref<128x256xbf16, #tpu.memory_space<vmem>>, %arg6: memref<1x256xf32, #tpu.memory_space<vmem>>, %arg7: memref<1x64x256xbf16, #tpu.memory_space<vmem>>, %arg8: memref<1x1x256xf32, #tpu.memory_space<vmem>>, %arg9: memref<1x1x256xf32, #tpu.memory_space<vmem>>) attributes {dimension_semantics = [#tpu.dimension_semantics<parallel>, #tpu.dimension_semantics<arbitrary>], iteration_bounds = array<i64: 2, 1>, scalar_prefetch = 0 : i64, scratch_operands = 0 : i64, tpu.core_type = #tpu.core_type<tc>, window_params = [{transform_indices = @transform_0, window_bounds = array<i64: 1, 64, 128>}, {pipeline_mode = #tpu.pipeline_mode<synchronous>, transform_indices = @transform_1, window_bounds = array<i64: 1, 128>}, {pipeline_mode = #tpu.pipeline_mode<synchronous>, transform_indices = @transform_2, window_bounds = array<i64: 1, 128>}, {pipeline_mode = #tpu.pipeline_mode<synchronous>, transform_indices = @transform_3, window_bounds = array<i64: 128, 256>}, {pipeline_mode = #tpu.pipeline_mode<synchronous>, transform_indices = @transform_4, window_bounds = array<i64: 1, 256>}, {transform_indices = @transform_5, window_bounds = array<i64: 1, 64, 256>}, {transform_indices = @transform_6, window_bounds = array<i64: 1, 1, 256>}, {transform_indices = @transform_7, window_bounds = array<i64: 1, 1, 256>}]} {
    %c0 = arith.constant 0 : index
    %c0_0 = arith.constant 0 : index
    %c0_1 = arith.constant 0 : index
    %0 = vector.load %arg2[%c0, %c0_0, %c0_1] : memref<1x64x128xbf16, #tpu.memory_space<vmem>>, vector<1x64x128xbf16>
    %1 = vector.shape_cast %0 : vector<1x64x128xbf16> to vector<64x128xbf16>
    %2 = arith.extf %1 : vector<64x128xbf16> to vector<64x128xf32>
    %c0_2 = arith.constant 0 : index
    %c0_3 = arith.constant 0 : index
    %3 = vector.load %arg3[%c0_2, %c0_3] : memref<1x128xf32, #tpu.memory_space<vmem>>, vector<1x128xf32>
    %4 = vector.broadcast %3 : vector<1x128xf32> to vector<64x128xf32>
    %5 = arith.subf %2, %4 : vector<64x128xf32>
    %c0_4 = arith.constant 0 : index
    %c0_5 = arith.constant 0 : index
    %6 = vector.load %arg4[%c0_4, %c0_5] : memref<1x128xf32, #tpu.memory_space<vmem>>, vector<1x128xf32>
    %7 = vector.broadcast %6 : vector<1x128xf32> to vector<64x128xf32>
    %8 = arith.mulf %5, %7 : vector<64x128xf32>
    %cst = arith.constant 0.000000e+00 : f32
    %9 = vector.broadcast %cst : f32 to vector<64x128xf32>
    %10 = arith.maximumf %8, %9 : vector<64x128xf32>
    %11 = arith.truncf %10 : vector<64x128xf32> to vector<64x128xbf16>
    %c0_6 = arith.constant 0 : index
    %c0_7 = arith.constant 0 : index
    %12 = vector.load %arg5[%c0_6, %c0_7] : memref<128x256xbf16, #tpu.memory_space<vmem>>, vector<128x256xbf16>
    %cst_8 = arith.constant dense<0.000000e+00> : vector<64x256xf32>
    %13 = tpu.matmul %11, %12, %cst_8 {dimension_numbers = #tpu.dot_dimension_numbers<[1], [0], [0], [1], [0, 0, 1, 1], [], []>} : vector<64x128xbf16>, vector<128x256xbf16>, vector<64x256xf32> -> vector<64x256xf32>
    %c0_9 = arith.constant 0 : index
    %c0_10 = arith.constant 0 : index
    %14 = vector.load %arg6[%c0_9, %c0_10] : memref<1x256xf32, #tpu.memory_space<vmem>>, vector<1x256xf32>
    %15 = vector.broadcast %14 : vector<1x256xf32> to vector<64x256xf32>
    %16 = arith.addf %13, %15 : vector<64x256xf32>
    %17 = arith.truncf %16 : vector<64x256xf32> to vector<64x256xbf16>
    %18 = vector.shape_cast %17 : vector<64x256xbf16> to vector<1x64x256xbf16>
    %c0_11 = arith.constant 0 : index
    %c0_12 = arith.constant 0 : index
    %c0_13 = arith.constant 0 : index
    %19 = vector.load %arg7[%c0_11, %c0_12, %c0_13] : memref<1x64x256xbf16, #tpu.memory_space<vmem>>, vector<1x64x256xbf16>
    tpu.vector_store %arg7[%c0_11, %c0_12, %c0_13], %18 {strides = array<i32>} : memref<1x64x256xbf16, #tpu.memory_space<vmem>>, vector<1x64x256xbf16>,
    %c0_i32 = arith.constant 0 : i32
    %20 = arith.cmpi eq, %arg1, %c0_i32 : i32
    %21 = arith.extui %20 : i1 to i32
    %c0_i32_14 = arith.constant 0 : i32
    %22 = arith.cmpi ne, %21, %c0_i32_14 : i32
    scf.if %22 {
      %cst_29 = arith.constant 0.000000e+00 : f32
      %36 = vector.broadcast %cst_29 : f32 to vector<1x1x256xf32>
      %c0_30 = arith.constant 0 : index
      %c0_31 = arith.constant 0 : index
      %c0_32 = arith.constant 0 : index
      %37 = vector.load %arg8[%c0_30, %c0_31, %c0_32] : memref<1x1x256xf32, #tpu.memory_space<vmem>>, vector<1x1x256xf32>
      tpu.vector_store %arg8[%c0_30, %c0_31, %c0_32], %36 {strides = array<i32>} : memref<1x1x256xf32, #tpu.memory_space<vmem>>, vector<1x1x256xf32>,
      %cst_33 = arith.constant 0.000000e+00 : f32
      %38 = vector.broadcast %cst_33 : f32 to vector<1x1x256xf32>
      %c0_34 = arith.constant 0 : index
      %c0_35 = arith.constant 0 : index
      %c0_36 = arith.constant 0 : index
      %39 = vector.load %arg9[%c0_34, %c0_35, %c0_36] : memref<1x1x256xf32, #tpu.memory_space<vmem>>, vector<1x1x256xf32>
      tpu.vector_store %arg9[%c0_34, %c0_35, %c0_36], %38 {strides = array<i32>} : memref<1x1x256xf32, #tpu.memory_space<vmem>>, vector<1x1x256xf32>,
    } else {
    }
    %c0_15 = arith.constant 0 : index
    %c0_16 = arith.constant 0 : index
    %c0_17 = arith.constant 0 : index
    %23 = vector.load %arg8[%c0_15, %c0_16, %c0_17] : memref<1x1x256xf32, #tpu.memory_space<vmem>>, vector<1x1x256xf32>
    %cst_18 = arith.constant dense<0.000000e+00> : vector<256xf32>
    %24 = vector.multi_reduction <add>, %16, %cst_18 [0] : vector<64x256xf32> to vector<256xf32>
    %25 = vector.shape_cast %24 : vector<256xf32> to vector<1x256xf32>
    %26 = vector.shape_cast %25 : vector<1x256xf32> to vector<1x1x256xf32>
    %27 = arith.addf %23, %26 : vector<1x1x256xf32>
    %c0_19 = arith.constant 0 : index
    %c0_20 = arith.constant 0 : index
    %c0_21 = arith.constant 0 : index
    %28 = vector.load %arg8[%c0_19, %c0_20, %c0_21] : memref<1x1x256xf32, #tpu.memory_space<vmem>>, vector<1x1x256xf32>
    tpu.vector_store %arg8[%c0_19, %c0_20, %c0_21], %27 {strides = array<i32>} : memref<1x1x256xf32, #tpu.memory_space<vmem>>, vector<1x1x256xf32>,
    %c0_22 = arith.constant 0 : index
    %c0_23 = arith.constant 0 : index
    %c0_24 = arith.constant 0 : index
    %29 = vector.load %arg9[%c0_22, %c0_23, %c0_24] : memref<1x1x256xf32, #tpu.memory_space<vmem>>, vector<1x1x256xf32>
    %30 = arith.mulf %16, %16 : vector<64x256xf32>
    %cst_25 = arith.constant dense<0.000000e+00> : vector<256xf32>
    %31 = vector.multi_reduction <add>, %30, %cst_25 [0] : vector<64x256xf32> to vector<256xf32>
    %32 = vector.shape_cast %31 : vector<256xf32> to vector<1x256xf32>
    %33 = vector.shape_cast %32 : vector<1x256xf32> to vector<1x1x256xf32>
    %34 = arith.addf %29, %33 : vector<1x1x256xf32>
    %c0_26 = arith.constant 0 : index
    %c0_27 = arith.constant 0 : index
    %c0_28 = arith.constant 0 : index
    %35 = vector.load %arg9[%c0_26, %c0_27, %c0_28] : memref<1x1x256xf32, #tpu.memory_space<vmem>>, vector<1x1x256xf32>
    tpu.vector_store %arg9[%c0_26, %c0_27, %c0_28], %34 {strides = array<i32>} : memref<1x1x256xf32, #tpu.memory_space<vmem>>, vector<1x1x256xf32>,
    return
  }
  func.func @transform_0(%arg0: i32, %arg1: i32) -> (i32, i32, i32) {
    %c0_i32 = arith.constant 0 : i32
    %c0_i32_0 = arith.constant 0 : i32
    return %arg0, %arg1, %c0_i32 : i32, i32, i32
  }
  func.func @transform_1(%arg0: i32, %arg1: i32) -> (i32, i32) {
    %c0_i32 = arith.constant 0 : i32
    %c0_i32_0 = arith.constant 0 : i32
    %c0_i32_1 = arith.constant 0 : i32
    return %c0_i32, %c0_i32_0 : i32, i32
  }
  func.func @transform_2(%arg0: i32, %arg1: i32) -> (i32, i32) {
    %c0_i32 = arith.constant 0 : i32
    %c0_i32_0 = arith.constant 0 : i32
    %c0_i32_1 = arith.constant 0 : i32
    return %c0_i32, %c0_i32_0 : i32, i32
  }
  func.func @transform_3(%arg0: i32, %arg1: i32) -> (i32, i32) {
    %c0_i32 = arith.constant 0 : i32
    %c0_i32_0 = arith.constant 0 : i32
    %c0_i32_1 = arith.constant 0 : i32
    return %c0_i32, %c0_i32_0 : i32, i32
  }
  func.func @transform_4(%arg0: i32, %arg1: i32) -> (i32, i32) {
    %c0_i32 = arith.constant 0 : i32
    %c0_i32_0 = arith.constant 0 : i32
    %c0_i32_1 = arith.constant 0 : i32
    return %c0_i32, %c0_i32_0 : i32, i32
  }
  func.func @transform_5(%arg0: i32, %arg1: i32) -> (i32, i32, i32) {
    %c0_i32 = arith.constant 0 : i32
    %c0_i32_0 = arith.constant 0 : i32
    return %arg0, %arg1, %c0_i32 : i32, i32, i32
  }
  func.func @transform_6(%arg0: i32, %arg1: i32) -> (i32, i32, i32) {
    %c0_i32 = arith.constant 0 : i32
    %c0_i32_0 = arith.constant 0 : i32
    %c0_i32_1 = arith.constant 0 : i32
    return %arg0, %c0_i32, %c0_i32_0 : i32, i32, i32
  }
  func.func @transform_7(%arg0: i32, %arg1: i32) -> (i32, i32, i32) {
    %c0_i32 = arith.constant 0 : i32
    %c0_i32_0 = arith.constant 0 : i32
    %c0_i32_1 = arith.constant 0 : i32
    return %arg0, %c0_i32, %c0_i32_0 : i32, i32, i32
  }
}

module attributes {stable_mosaic.version = 11 : i64} {
  func.func @_enc_pointwise_kernel(%arg0: i32, %arg1: i32, %arg2: memref<1x64x256xbf16, #tpu.memory_space<vmem>>, %arg3: memref<1x256xf32, #tpu.memory_space<vmem>>, %arg4: memref<1x256xf32, #tpu.memory_space<vmem>>, %arg5: memref<256x512xbf16, #tpu.memory_space<vmem>>, %arg6: memref<1x512xf32, #tpu.memory_space<vmem>>, %arg7: memref<1x1x512xf32, #tpu.memory_space<vmem>>, %arg8: memref<1x1x512xf32, #tpu.memory_space<vmem>>, %arg9: memref<1x1x512xf32, #tpu.memory_space<vmem>>) attributes {dimension_semantics = [#tpu.dimension_semantics<parallel>, #tpu.dimension_semantics<arbitrary>], iteration_bounds = array<i64: 2, 1>, scalar_prefetch = 0 : i64, scratch_operands = 0 : i64, tpu.core_type = #tpu.core_type<tc>, window_params = [{transform_indices = @transform_0, window_bounds = array<i64: 1, 64, 256>}, {pipeline_mode = #tpu.pipeline_mode<synchronous>, transform_indices = @transform_1, window_bounds = array<i64: 1, 256>}, {pipeline_mode = #tpu.pipeline_mode<synchronous>, transform_indices = @transform_2, window_bounds = array<i64: 1, 256>}, {pipeline_mode = #tpu.pipeline_mode<synchronous>, transform_indices = @transform_3, window_bounds = array<i64: 256, 512>}, {pipeline_mode = #tpu.pipeline_mode<synchronous>, transform_indices = @transform_4, window_bounds = array<i64: 1, 512>}, {transform_indices = @transform_5, window_bounds = array<i64: 1, 1, 512>}, {transform_indices = @transform_6, window_bounds = array<i64: 1, 1, 512>}, {transform_indices = @transform_7, window_bounds = array<i64: 1, 1, 512>}]} {
    %c0 = arith.constant 0 : index
    %c0_0 = arith.constant 0 : index
    %c0_1 = arith.constant 0 : index
    %0 = vector.load %arg2[%c0, %c0_0, %c0_1] : memref<1x64x256xbf16, #tpu.memory_space<vmem>>, vector<1x64x256xbf16>
    %1 = vector.shape_cast %0 : vector<1x64x256xbf16> to vector<64x256xbf16>
    %2 = arith.extf %1 : vector<64x256xbf16> to vector<64x256xf32>
    %c0_2 = arith.constant 0 : index
    %c0_3 = arith.constant 0 : index
    %3 = vector.load %arg3[%c0_2, %c0_3] : memref<1x256xf32, #tpu.memory_space<vmem>>, vector<1x256xf32>
    %4 = vector.broadcast %3 : vector<1x256xf32> to vector<64x256xf32>
    %5 = arith.subf %2, %4 : vector<64x256xf32>
    %c0_4 = arith.constant 0 : index
    %c0_5 = arith.constant 0 : index
    %6 = vector.load %arg4[%c0_4, %c0_5] : memref<1x256xf32, #tpu.memory_space<vmem>>, vector<1x256xf32>
    %7 = vector.broadcast %6 : vector<1x256xf32> to vector<64x256xf32>
    %8 = arith.mulf %5, %7 : vector<64x256xf32>
    %cst = arith.constant 0.000000e+00 : f32
    %9 = vector.broadcast %cst : f32 to vector<64x256xf32>
    %10 = arith.maximumf %8, %9 : vector<64x256xf32>
    %11 = arith.truncf %10 : vector<64x256xf32> to vector<64x256xbf16>
    %c0_6 = arith.constant 0 : index
    %c0_7 = arith.constant 0 : index
    %12 = vector.load %arg5[%c0_6, %c0_7] : memref<256x512xbf16, #tpu.memory_space<vmem>>, vector<256x512xbf16>
    %cst_8 = arith.constant dense<0.000000e+00> : vector<64x512xf32>
    %13 = tpu.matmul %11, %12, %cst_8 {dimension_numbers = #tpu.dot_dimension_numbers<[1], [0], [0], [1], [0, 0, 1, 1], [], []>} : vector<64x256xbf16>, vector<256x512xbf16>, vector<64x512xf32> -> vector<64x512xf32>
    %c0_9 = arith.constant 0 : index
    %c0_10 = arith.constant 0 : index
    %14 = vector.load %arg6[%c0_9, %c0_10] : memref<1x512xf32, #tpu.memory_space<vmem>>, vector<1x512xf32>
    %15 = vector.broadcast %14 : vector<1x512xf32> to vector<64x512xf32>
    %16 = arith.addf %13, %15 : vector<64x512xf32>
    %c0_i32 = arith.constant 0 : i32
    %17 = arith.cmpi eq, %arg1, %c0_i32 : i32
    %18 = arith.extui %17 : i1 to i32
    %c0_i32_11 = arith.constant 0 : i32
    %19 = arith.cmpi ne, %18, %c0_i32_11 : i32
    scf.if %19 {
      %cst_33 = arith.constant 0.000000e+00 : f32
      %39 = vector.broadcast %cst_33 : f32 to vector<1x1x512xf32>
      %c0_34 = arith.constant 0 : index
      %c0_35 = arith.constant 0 : index
      %c0_36 = arith.constant 0 : index
      %40 = vector.load %arg7[%c0_34, %c0_35, %c0_36] : memref<1x1x512xf32, #tpu.memory_space<vmem>>, vector<1x1x512xf32>
      tpu.vector_store %arg7[%c0_34, %c0_35, %c0_36], %39 {strides = array<i32>} : memref<1x1x512xf32, #tpu.memory_space<vmem>>, vector<1x1x512xf32>,
      %cst_37 = arith.constant 0.000000e+00 : f32
      %41 = vector.broadcast %cst_37 : f32 to vector<1x1x512xf32>
      %c0_38 = arith.constant 0 : index
      %c0_39 = arith.constant 0 : index
      %c0_40 = arith.constant 0 : index
      %42 = vector.load %arg8[%c0_38, %c0_39, %c0_40] : memref<1x1x512xf32, #tpu.memory_space<vmem>>, vector<1x1x512xf32>
      tpu.vector_store %arg8[%c0_38, %c0_39, %c0_40], %41 {strides = array<i32>} : memref<1x1x512xf32, #tpu.memory_space<vmem>>, vector<1x1x512xf32>,
      %cst_41 = arith.constant 0xFF800000 : f32
      %43 = vector.broadcast %cst_41 : f32 to vector<1x1x512xf32>
      %c0_42 = arith.constant 0 : index
      %c0_43 = arith.constant 0 : index
      %c0_44 = arith.constant 0 : index
      %44 = vector.load %arg9[%c0_42, %c0_43, %c0_44] : memref<1x1x512xf32, #tpu.memory_space<vmem>>, vector<1x1x512xf32>
      tpu.vector_store %arg9[%c0_42, %c0_43, %c0_44], %43 {strides = array<i32>} : memref<1x1x512xf32, #tpu.memory_space<vmem>>, vector<1x1x512xf32>,
    } else {
    }
    %c0_12 = arith.constant 0 : index
    %c0_13 = arith.constant 0 : index
    %c0_14 = arith.constant 0 : index
    %20 = vector.load %arg7[%c0_12, %c0_13, %c0_14] : memref<1x1x512xf32, #tpu.memory_space<vmem>>, vector<1x1x512xf32>
    %cst_15 = arith.constant dense<0.000000e+00> : vector<512xf32>
    %21 = vector.multi_reduction <add>, %16, %cst_15 [0] : vector<64x512xf32> to vector<512xf32>
    %22 = vector.shape_cast %21 : vector<512xf32> to vector<1x512xf32>
    %23 = vector.shape_cast %22 : vector<1x512xf32> to vector<1x1x512xf32>
    %24 = arith.addf %20, %23 : vector<1x1x512xf32>
    %c0_16 = arith.constant 0 : index
    %c0_17 = arith.constant 0 : index
    %c0_18 = arith.constant 0 : index
    %25 = vector.load %arg7[%c0_16, %c0_17, %c0_18] : memref<1x1x512xf32, #tpu.memory_space<vmem>>, vector<1x1x512xf32>
    tpu.vector_store %arg7[%c0_16, %c0_17, %c0_18], %24 {strides = array<i32>} : memref<1x1x512xf32, #tpu.memory_space<vmem>>, vector<1x1x512xf32>,
    %c0_19 = arith.constant 0 : index
    %c0_20 = arith.constant 0 : index
    %c0_21 = arith.constant 0 : index
    %26 = vector.load %arg8[%c0_19, %c0_20, %c0_21] : memref<1x1x512xf32, #tpu.memory_space<vmem>>, vector<1x1x512xf32>
    %27 = arith.mulf %16, %16 : vector<64x512xf32>
    %cst_22 = arith.constant dense<0.000000e+00> : vector<512xf32>
    %28 = vector.multi_reduction <add>, %27, %cst_22 [0] : vector<64x512xf32> to vector<512xf32>
    %29 = vector.shape_cast %28 : vector<512xf32> to vector<1x512xf32>
    %30 = vector.shape_cast %29 : vector<1x512xf32> to vector<1x1x512xf32>
    %31 = arith.addf %26, %30 : vector<1x1x512xf32>
    %c0_23 = arith.constant 0 : index
    %c0_24 = arith.constant 0 : index
    %c0_25 = arith.constant 0 : index
    %32 = vector.load %arg8[%c0_23, %c0_24, %c0_25] : memref<1x1x512xf32, #tpu.memory_space<vmem>>, vector<1x1x512xf32>
    tpu.vector_store %arg8[%c0_23, %c0_24, %c0_25], %31 {strides = array<i32>} : memref<1x1x512xf32, #tpu.memory_space<vmem>>, vector<1x1x512xf32>,
    %c0_26 = arith.constant 0 : index
    %c0_27 = arith.constant 0 : index
    %c0_28 = arith.constant 0 : index
    %33 = vector.load %arg9[%c0_26, %c0_27, %c0_28] : memref<1x1x512xf32, #tpu.memory_space<vmem>>, vector<1x1x512xf32>
    %cst_29 = arith.constant dense<0xFF800000> : vector<512xf32>
    %34 = vector.multi_reduction <maximumf>, %16, %cst_29 [0] : vector<64x512xf32> to vector<512xf32>
    %35 = vector.shape_cast %34 : vector<512xf32> to vector<1x512xf32>
    %36 = vector.shape_cast %35 : vector<1x512xf32> to vector<1x1x512xf32>
    %37 = arith.maximumf %33, %36 : vector<1x1x512xf32>
    %c0_30 = arith.constant 0 : index
    %c0_31 = arith.constant 0 : index
    %c0_32 = arith.constant 0 : index
    %38 = vector.load %arg9[%c0_30, %c0_31, %c0_32] : memref<1x1x512xf32, #tpu.memory_space<vmem>>, vector<1x1x512xf32>
    tpu.vector_store %arg9[%c0_30, %c0_31, %c0_32], %37 {strides = array<i32>} : memref<1x1x512xf32, #tpu.memory_space<vmem>>, vector<1x1x512xf32>,
    return
  }
  func.func @transform_0(%arg0: i32, %arg1: i32) -> (i32, i32, i32) {
    %c0_i32 = arith.constant 0 : i32
    %c0_i32_0 = arith.constant 0 : i32
    return %arg0, %arg1, %c0_i32 : i32, i32, i32
  }
  func.func @transform_1(%arg0: i32, %arg1: i32) -> (i32, i32) {
    %c0_i32 = arith.constant 0 : i32
    %c0_i32_0 = arith.constant 0 : i32
    %c0_i32_1 = arith.constant 0 : i32
    return %c0_i32, %c0_i32_0 : i32, i32
  }
  func.func @transform_2(%arg0: i32, %arg1: i32) -> (i32, i32) {
    %c0_i32 = arith.constant 0 : i32
    %c0_i32_0 = arith.constant 0 : i32
    %c0_i32_1 = arith.constant 0 : i32
    return %c0_i32, %c0_i32_0 : i32, i32
  }
  func.func @transform_3(%arg0: i32, %arg1: i32) -> (i32, i32) {
    %c0_i32 = arith.constant 0 : i32
    %c0_i32_0 = arith.constant 0 : i32
    %c0_i32_1 = arith.constant 0 : i32
    return %c0_i32, %c0_i32_0 : i32, i32
  }
  func.func @transform_4(%arg0: i32, %arg1: i32) -> (i32, i32) {
    %c0_i32 = arith.constant 0 : i32
    %c0_i32_0 = arith.constant 0 : i32
    %c0_i32_1 = arith.constant 0 : i32
    return %c0_i32, %c0_i32_0 : i32, i32
  }
  func.func @transform_5(%arg0: i32, %arg1: i32) -> (i32, i32, i32) {
    %c0_i32 = arith.constant 0 : i32
    %c0_i32_0 = arith.constant 0 : i32
    %c0_i32_1 = arith.constant 0 : i32
    return %arg0, %c0_i32, %c0_i32_0 : i32, i32, i32
  }
  func.func @transform_6(%arg0: i32, %arg1: i32) -> (i32, i32, i32) {
    %c0_i32 = arith.constant 0 : i32
    %c0_i32_0 = arith.constant 0 : i32
    %c0_i32_1 = arith.constant 0 : i32
    return %arg0, %c0_i32, %c0_i32_0 : i32, i32, i32
  }
  func.func @transform_7(%arg0: i32, %arg1: i32) -> (i32, i32, i32) {
    %c0_i32 = arith.constant 0 : i32
    %c0_i32_0 = arith.constant 0 : i32
    %c0_i32_1 = arith.constant 0 : i32
    return %arg0, %c0_i32, %c0_i32_0 : i32, i32, i32
  }
}

module attributes {stable_mosaic.version = 11 : i64} {
  func.func @_head_kernel(%arg0: memref<2x512xf32, #tpu.memory_space<vmem>>, %arg1: memref<1x512xf32, #tpu.memory_space<vmem>>, %arg2: memref<1x512xf32, #tpu.memory_space<vmem>>, %arg3: memref<512x256xbf16, #tpu.memory_space<vmem>>, %arg4: memref<1x256xf32, #tpu.memory_space<vmem>>, %arg5: memref<256x128xbf16, #tpu.memory_space<vmem>>, %arg6: memref<1x128xf32, #tpu.memory_space<vmem>>, %arg7: memref<128x64xbf16, #tpu.memory_space<vmem>>, %arg8: memref<1x64xf32, #tpu.memory_space<vmem>>, %arg9: memref<2x64xf32, #tpu.memory_space<vmem>>) attributes {dimension_semantics = [], scalar_prefetch = 0 : i64, scratch_operands = 0 : i64, tpu.core_type = #tpu.core_type<tc>} {
    %c0 = arith.constant 0 : index
    %c0_0 = arith.constant 0 : index
    %0 = vector.load %arg0[%c0, %c0_0] : memref<2x512xf32, #tpu.memory_space<vmem>>, vector<2x512xf32>
    %c0_1 = arith.constant 0 : index
    %c0_2 = arith.constant 0 : index
    %1 = vector.load %arg1[%c0_1, %c0_2] : memref<1x512xf32, #tpu.memory_space<vmem>>, vector<1x512xf32>
    %2 = vector.broadcast %1 : vector<1x512xf32> to vector<2x512xf32>
    %3 = arith.subf %0, %2 : vector<2x512xf32>
    %c0_3 = arith.constant 0 : index
    %c0_4 = arith.constant 0 : index
    %4 = vector.load %arg2[%c0_3, %c0_4] : memref<1x512xf32, #tpu.memory_space<vmem>>, vector<1x512xf32>
    %5 = vector.broadcast %4 : vector<1x512xf32> to vector<2x512xf32>
    %6 = arith.mulf %3, %5 : vector<2x512xf32>
    %7 = arith.truncf %6 : vector<2x512xf32> to vector<2x512xbf16>
    %c0_5 = arith.constant 0 : index
    %c0_6 = arith.constant 0 : index
    %8 = vector.load %arg3[%c0_5, %c0_6] : memref<512x256xbf16, #tpu.memory_space<vmem>>, vector<512x256xbf16>
    %cst = arith.constant dense<0.000000e+00> : vector<2x256xf32>
    %9 = tpu.matmul %7, %8, %cst {dimension_numbers = #tpu.dot_dimension_numbers<[1], [0], [0], [1], [0, 0, 1, 1], [], []>} : vector<2x512xbf16>, vector<512x256xbf16>, vector<2x256xf32> -> vector<2x256xf32>
    %c0_7 = arith.constant 0 : index
    %c0_8 = arith.constant 0 : index
    %10 = vector.load %arg4[%c0_7, %c0_8] : memref<1x256xf32, #tpu.memory_space<vmem>>, vector<1x256xf32>
    %11 = vector.broadcast %10 : vector<1x256xf32> to vector<2x256xf32>
    %12 = arith.addf %9, %11 : vector<2x256xf32>
    %cst_9 = arith.constant dense<0.000000e+00> : vector<256xf32>
    %13 = vector.multi_reduction <add>, %12, %cst_9 [0] : vector<2x256xf32> to vector<256xf32>
    %14 = vector.shape_cast %13 : vector<256xf32> to vector<1x256xf32>
    %cst_10 = arith.constant 2.000000e+00 : f32
    %15 = vector.broadcast %cst_10 : f32 to vector<1x256xf32>
    %16 = arith.divf %14, %15 : vector<1x256xf32>
    %17 = vector.broadcast %16 : vector<1x256xf32> to vector<2x256xf32>
    %18 = arith.subf %12, %17 : vector<2x256xf32>
    %19 = arith.mulf %18, %18 : vector<2x256xf32>
    %cst_11 = arith.constant dense<0.000000e+00> : vector<256xf32>
    %20 = vector.multi_reduction <add>, %19, %cst_11 [0] : vector<2x256xf32> to vector<256xf32>
    %21 = vector.shape_cast %20 : vector<256xf32> to vector<1x256xf32>
    %cst_12 = arith.constant 2.000000e+00 : f32
    %22 = vector.broadcast %cst_12 : f32 to vector<1x256xf32>
    %23 = arith.divf %21, %22 : vector<1x256xf32>
    %24 = vector.broadcast %16 : vector<1x256xf32> to vector<2x256xf32>
    %25 = arith.subf %12, %24 : vector<2x256xf32>
    %cst_13 = arith.constant 9.99999974E-6 : f32
    %26 = vector.broadcast %cst_13 : f32 to vector<1x256xf32>
    %27 = arith.addf %23, %26 : vector<1x256xf32>
    %28 = math.rsqrt %27 : vector<1x256xf32>
    %29 = vector.broadcast %28 : vector<1x256xf32> to vector<2x256xf32>
    %30 = arith.mulf %25, %29 : vector<2x256xf32>
    %cst_14 = arith.constant 0.000000e+00 : f32
    %31 = vector.broadcast %cst_14 : f32 to vector<2x256xf32>
    %32 = arith.maximumf %30, %31 : vector<2x256xf32>
    %33 = arith.truncf %32 : vector<2x256xf32> to vector<2x256xbf16>
    %c0_15 = arith.constant 0 : index
    %c0_16 = arith.constant 0 : index
    %34 = vector.load %arg5[%c0_15, %c0_16] : memref<256x128xbf16, #tpu.memory_space<vmem>>, vector<256x128xbf16>
    %cst_17 = arith.constant dense<0.000000e+00> : vector<2x128xf32>
    %35 = tpu.matmul %33, %34, %cst_17 {dimension_numbers = #tpu.dot_dimension_numbers<[1], [0], [0], [1], [0, 0, 1, 1], [], []>} : vector<2x256xbf16>, vector<256x128xbf16>, vector<2x128xf32> -> vector<2x128xf32>
    %c0_18 = arith.constant 0 : index
    %c0_19 = arith.constant 0 : index
    %36 = vector.load %arg6[%c0_18, %c0_19] : memref<1x128xf32, #tpu.memory_space<vmem>>, vector<1x128xf32>
    %37 = vector.broadcast %36 : vector<1x128xf32> to vector<2x128xf32>
    %38 = arith.addf %35, %37 : vector<2x128xf32>
    %cst_20 = arith.constant dense<0.000000e+00> : vector<128xf32>
    %39 = vector.multi_reduction <add>, %38, %cst_20 [0] : vector<2x128xf32> to vector<128xf32>
    %40 = vector.shape_cast %39 : vector<128xf32> to vector<1x128xf32>
    %cst_21 = arith.constant 2.000000e+00 : f32
    %41 = vector.broadcast %cst_21 : f32 to vector<1x128xf32>
    %42 = arith.divf %40, %41 : vector<1x128xf32>
    %43 = vector.broadcast %42 : vector<1x128xf32> to vector<2x128xf32>
    %44 = arith.subf %38, %43 : vector<2x128xf32>
    %45 = arith.mulf %44, %44 : vector<2x128xf32>
    %cst_22 = arith.constant dense<0.000000e+00> : vector<128xf32>
    %46 = vector.multi_reduction <add>, %45, %cst_22 [0] : vector<2x128xf32> to vector<128xf32>
    %47 = vector.shape_cast %46 : vector<128xf32> to vector<1x128xf32>
    %cst_23 = arith.constant 2.000000e+00 : f32
    %48 = vector.broadcast %cst_23 : f32 to vector<1x128xf32>
    %49 = arith.divf %47, %48 : vector<1x128xf32>
    %50 = vector.broadcast %42 : vector<1x128xf32> to vector<2x128xf32>
    %51 = arith.subf %38, %50 : vector<2x128xf32>
    %cst_24 = arith.constant 9.99999974E-6 : f32
    %52 = vector.broadcast %cst_24 : f32 to vector<1x128xf32>
    %53 = arith.addf %49, %52 : vector<1x128xf32>
    %54 = math.rsqrt %53 : vector<1x128xf32>
    %55 = vector.broadcast %54 : vector<1x128xf32> to vector<2x128xf32>
    %56 = arith.mulf %51, %55 : vector<2x128xf32>
    %cst_25 = arith.constant 0.000000e+00 : f32
    %57 = vector.broadcast %cst_25 : f32 to vector<2x128xf32>
    %58 = arith.maximumf %56, %57 : vector<2x128xf32>
    %59 = arith.truncf %58 : vector<2x128xf32> to vector<2x128xbf16>
    %c0_26 = arith.constant 0 : index
    %c0_27 = arith.constant 0 : index
    %60 = vector.load %arg7[%c0_26, %c0_27] : memref<128x64xbf16, #tpu.memory_space<vmem>>, vector<128x64xbf16>
    %cst_28 = arith.constant dense<0.000000e+00> : vector<2x64xf32>
    %61 = tpu.matmul %59, %60, %cst_28 {dimension_numbers = #tpu.dot_dimension_numbers<[1], [0], [0], [1], [0, 0, 1, 1], [], []>} : vector<2x128xbf16>, vector<128x64xbf16>, vector<2x64xf32> -> vector<2x64xf32>
    %c0_29 = arith.constant 0 : index
    %c0_30 = arith.constant 0 : index
    %62 = vector.load %arg8[%c0_29, %c0_30] : memref<1x64xf32, #tpu.memory_space<vmem>>, vector<1x64xf32>
    %63 = vector.broadcast %62 : vector<1x64xf32> to vector<2x64xf32>
    %64 = arith.addf %61, %63 : vector<2x64xf32>
    %c0_31 = arith.constant 0 : index
    %c0_32 = arith.constant 0 : index
    %65 = vector.load %arg9[%c0_31, %c0_32] : memref<2x64xf32, #tpu.memory_space<vmem>>, vector<2x64xf32>
    tpu.vector_store %arg9[%c0_31, %c0_32], %64 {strides = array<i32>} : memref<2x64xf32, #tpu.memory_space<vmem>>, vector<2x64xf32>,
    return
  }
}

module attributes {stable_mosaic.version = 11 : i64} {
  func.func @_dec_layer1_kernel(%arg0: i32, %arg1: i32, %arg2: i32, %arg3: memref<1x32x8xf32, #tpu.memory_space<vmem>>, %arg4: memref<1x1x64xbf16, #tpu.memory_space<vmem>>, %arg5: memref<1x8x128xbf16, #tpu.memory_space<vmem>>, %arg6: memref<1x64x128xbf16, #tpu.memory_space<vmem>>, %arg7: memref<1x1x128xf32, #tpu.memory_space<vmem>>, %arg8: memref<1x1x32x128xbf16, #tpu.memory_space<vmem>>, %arg9: memref<1x1x1x128xf32, #tpu.memory_space<vmem>>, %arg10: memref<1x1x1x128xf32, #tpu.memory_space<vmem>>) attributes {dimension_semantics = [#tpu.dimension_semantics<parallel>, #tpu.dimension_semantics<parallel>, #tpu.dimension_semantics<arbitrary>], iteration_bounds = array<i64: 2, 2, 1>, scalar_prefetch = 0 : i64, scratch_operands = 0 : i64, tpu.core_type = #tpu.core_type<tc>, window_params = [{transform_indices = @transform_0, window_bounds = array<i64: 1, 32, 8>}, {transform_indices = @transform_1, window_bounds = array<i64: 1, 1, 64>}, {transform_indices = @transform_2, window_bounds = array<i64: 1, 8, 128>}, {transform_indices = @transform_3, window_bounds = array<i64: 1, 64, 128>}, {transform_indices = @transform_4, window_bounds = array<i64: 1, 1, 128>}, {transform_indices = @transform_5, window_bounds = array<i64: 1, 1, 32, 128>}, {transform_indices = @transform_6, window_bounds = array<i64: 1, 1, 1, 128>}, {transform_indices = @transform_7, window_bounds = array<i64: 1, 1, 1, 128>}]} {
    %c0 = arith.constant 0 : index
    %c0_0 = arith.constant 0 : index
    %c0_1 = arith.constant 0 : index
    %0 = vector.load %arg3[%c0, %c0_0, %c0_1] : memref<1x32x8xf32, #tpu.memory_space<vmem>>, vector<1x32x8xf32>
    %1 = vector.shape_cast %0 : vector<1x32x8xf32> to vector<32x8xf32>
    %2 = arith.truncf %1 : vector<32x8xf32> to vector<32x8xbf16>
    %c0_2 = arith.constant 0 : index
    %c0_3 = arith.constant 0 : index
    %c0_4 = arith.constant 0 : index
    %3 = vector.load %arg5[%c0_2, %c0_3, %c0_4] : memref<1x8x128xbf16, #tpu.memory_space<vmem>>, vector<1x8x128xbf16>
    %4 = vector.shape_cast %3 : vector<1x8x128xbf16> to vector<8x128xbf16>
    %cst = arith.constant dense<0.000000e+00> : vector<32x128xf32>
    %5 = tpu.matmul %2, %4, %cst {dimension_numbers = #tpu.dot_dimension_numbers<[1], [0], [0], [1], [0, 0, 1, 1], [], []>} : vector<32x8xbf16>, vector<8x128xbf16>, vector<32x128xf32> -> vector<32x128xf32>
    %c0_5 = arith.constant 0 : index
    %c0_6 = arith.constant 0 : index
    %c0_7 = arith.constant 0 : index
    %6 = vector.load %arg4[%c0_5, %c0_6, %c0_7] : memref<1x1x64xbf16, #tpu.memory_space<vmem>>, vector<1x1x64xbf16>
    %7 = vector.shape_cast %6 : vector<1x1x64xbf16> to vector<1x64xbf16>
    %c0_8 = arith.constant 0 : index
    %c0_9 = arith.constant 0 : index
    %c0_10 = arith.constant 0 : index
    %8 = vector.load %arg6[%c0_8, %c0_9, %c0_10] : memref<1x64x128xbf16, #tpu.memory_space<vmem>>, vector<1x64x128xbf16>
    %9 = vector.shape_cast %8 : vector<1x64x128xbf16> to vector<64x128xbf16>
    %cst_11 = arith.constant dense<0.000000e+00> : vector<1x128xf32>
    %10 = tpu.matmul %7, %9, %cst_11 {dimension_numbers = #tpu.dot_dimension_numbers<[1], [0], [0], [1], [0, 0, 1, 1], [], []>} : vector<1x64xbf16>, vector<64x128xbf16>, vector<1x128xf32> -> vector<1x128xf32>
    %11 = vector.broadcast %10 : vector<1x128xf32> to vector<32x128xf32>
    %12 = arith.addf %5, %11 : vector<32x128xf32>
    %c0_12 = arith.constant 0 : index
    %c0_13 = arith.constant 0 : index
    %c0_14 = arith.constant 0 : index
    %13 = vector.load %arg7[%c0_12, %c0_13, %c0_14] : memref<1x1x128xf32, #tpu.memory_space<vmem>>, vector<1x1x128xf32>
    %14 = vector.shape_cast %13 : vector<1x1x128xf32> to vector<1x128xf32>
    %15 = vector.broadcast %14 : vector<1x128xf32> to vector<32x128xf32>
    %16 = arith.addf %12, %15 : vector<32x128xf32>
    %17 = arith.truncf %16 : vector<32x128xf32> to vector<32x128xbf16>
    %18 = vector.shape_cast %17 : vector<32x128xbf16> to vector<1x1x32x128xbf16>
    %c0_15 = arith.constant 0 : index
    %c0_16 = arith.constant 0 : index
    %c0_17 = arith.constant 0 : index
    %c0_18 = arith.constant 0 : index
    %19 = vector.load %arg8[%c0_15, %c0_16, %c0_17, %c0_18] : memref<1x1x32x128xbf16, #tpu.memory_space<vmem>>, vector<1x1x32x128xbf16>
    tpu.vector_store %arg8[%c0_15, %c0_16, %c0_17, %c0_18], %18 {strides = array<i32>} : memref<1x1x32x128xbf16, #tpu.memory_space<vmem>>, vector<1x1x32x128xbf16>,
    %c0_i32 = arith.constant 0 : i32
    %20 = arith.cmpi eq, %arg2, %c0_i32 : i32
    %21 = arith.extui %20 : i1 to i32
    %c0_i32_19 = arith.constant 0 : i32
    %22 = arith.cmpi ne, %21, %c0_i32_19 : i32
    scf.if %22 {
      %cst_38 = arith.constant 0.000000e+00 : f32
      %36 = vector.broadcast %cst_38 : f32 to vector<1x1x1x128xf32>
      %c0_39 = arith.constant 0 : index
      %c0_40 = arith.constant 0 : index
      %c0_41 = arith.constant 0 : index
      %c0_42 = arith.constant 0 : index
      %37 = vector.load %arg9[%c0_39, %c0_40, %c0_41, %c0_42] : memref<1x1x1x128xf32, #tpu.memory_space<vmem>>, vector<1x1x1x128xf32>
      tpu.vector_store %arg9[%c0_39, %c0_40, %c0_41, %c0_42], %36 {strides = array<i32>} : memref<1x1x1x128xf32, #tpu.memory_space<vmem>>, vector<1x1x1x128xf32>,
      %cst_43 = arith.constant 0.000000e+00 : f32
      %38 = vector.broadcast %cst_43 : f32 to vector<1x1x1x128xf32>
      %c0_44 = arith.constant 0 : index
      %c0_45 = arith.constant 0 : index
      %c0_46 = arith.constant 0 : index
      %c0_47 = arith.constant 0 : index
      %39 = vector.load %arg10[%c0_44, %c0_45, %c0_46, %c0_47] : memref<1x1x1x128xf32, #tpu.memory_space<vmem>>, vector<1x1x1x128xf32>
      tpu.vector_store %arg10[%c0_44, %c0_45, %c0_46, %c0_47], %38 {strides = array<i32>} : memref<1x1x1x128xf32, #tpu.memory_space<vmem>>, vector<1x1x1x128xf32>,
    } else {
    }
    %c0_20 = arith.constant 0 : index
    %c0_21 = arith.constant 0 : index
    %c0_22 = arith.constant 0 : index
    %c0_23 = arith.constant 0 : index
    %23 = vector.load %arg9[%c0_20, %c0_21, %c0_22, %c0_23] : memref<1x1x1x128xf32, #tpu.memory_space<vmem>>, vector<1x1x1x128xf32>
    %cst_24 = arith.constant dense<0.000000e+00> : vector<128xf32>
    %24 = vector.multi_reduction <add>, %16, %cst_24 [0] : vector<32x128xf32> to vector<128xf32>
    %25 = vector.shape_cast %24 : vector<128xf32> to vector<1x128xf32>
    %26 = vector.shape_cast %25 : vector<1x128xf32> to vector<1x1x1x128xf32>
    %27 = arith.addf %23, %26 : vector<1x1x1x128xf32>
    %c0_25 = arith.constant 0 : index
    %c0_26 = arith.constant 0 : index
    %c0_27 = arith.constant 0 : index
    %c0_28 = arith.constant 0 : index
    %28 = vector.load %arg9[%c0_25, %c0_26, %c0_27, %c0_28] : memref<1x1x1x128xf32, #tpu.memory_space<vmem>>, vector<1x1x1x128xf32>
    tpu.vector_store %arg9[%c0_25, %c0_26, %c0_27, %c0_28], %27 {strides = array<i32>} : memref<1x1x1x128xf32, #tpu.memory_space<vmem>>, vector<1x1x1x128xf32>,
    %c0_29 = arith.constant 0 : index
    %c0_30 = arith.constant 0 : index
    %c0_31 = arith.constant 0 : index
    %c0_32 = arith.constant 0 : index
    %29 = vector.load %arg10[%c0_29, %c0_30, %c0_31, %c0_32] : memref<1x1x1x128xf32, #tpu.memory_space<vmem>>, vector<1x1x1x128xf32>
    %30 = arith.mulf %16, %16 : vector<32x128xf32>
    %cst_33 = arith.constant dense<0.000000e+00> : vector<128xf32>
    %31 = vector.multi_reduction <add>, %30, %cst_33 [0] : vector<32x128xf32> to vector<128xf32>
    %32 = vector.shape_cast %31 : vector<128xf32> to vector<1x128xf32>
    %33 = vector.shape_cast %32 : vector<1x128xf32> to vector<1x1x1x128xf32>
    %34 = arith.addf %29, %33 : vector<1x1x1x128xf32>
    %c0_34 = arith.constant 0 : index
    %c0_35 = arith.constant 0 : index
    %c0_36 = arith.constant 0 : index
    %c0_37 = arith.constant 0 : index
    %35 = vector.load %arg10[%c0_34, %c0_35, %c0_36, %c0_37] : memref<1x1x1x128xf32, #tpu.memory_space<vmem>>, vector<1x1x1x128xf32>
    tpu.vector_store %arg10[%c0_34, %c0_35, %c0_36, %c0_37], %34 {strides = array<i32>} : memref<1x1x1x128xf32, #tpu.memory_space<vmem>>, vector<1x1x1x128xf32>,
    return
  }
  func.func @transform_0(%arg0: i32, %arg1: i32, %arg2: i32) -> (i32, i32, i32) {
    %c0_i32 = arith.constant 0 : i32
    %c0_i32_0 = arith.constant 0 : i32
    return %arg0, %arg2, %c0_i32 : i32, i32, i32
  }
  func.func @transform_1(%arg0: i32, %arg1: i32, %arg2: i32) -> (i32, i32, i32) {
    %c0_i32 = arith.constant 0 : i32
    %c0_i32_0 = arith.constant 0 : i32
    %c0_i32_1 = arith.constant 0 : i32
    return %arg1, %c0_i32, %c0_i32_0 : i32, i32, i32
  }
  func.func @transform_2(%arg0: i32, %arg1: i32, %arg2: i32) -> (i32, i32, i32) {
    %c0_i32 = arith.constant 0 : i32
    %c0_i32_0 = arith.constant 0 : i32
    %c0_i32_1 = arith.constant 0 : i32
    return %arg0, %c0_i32, %c0_i32_0 : i32, i32, i32
  }
  func.func @transform_3(%arg0: i32, %arg1: i32, %arg2: i32) -> (i32, i32, i32) {
    %c0_i32 = arith.constant 0 : i32
    %c0_i32_0 = arith.constant 0 : i32
    %c0_i32_1 = arith.constant 0 : i32
    return %arg0, %c0_i32, %c0_i32_0 : i32, i32, i32
  }
  func.func @transform_4(%arg0: i32, %arg1: i32, %arg2: i32) -> (i32, i32, i32) {
    %c0_i32 = arith.constant 0 : i32
    %c0_i32_0 = arith.constant 0 : i32
    %c0_i32_1 = arith.constant 0 : i32
    return %arg0, %c0_i32, %c0_i32_0 : i32, i32, i32
  }
  func.func @transform_5(%arg0: i32, %arg1: i32, %arg2: i32) -> (i32, i32, i32, i32) {
    %c0_i32 = arith.constant 0 : i32
    %c0_i32_0 = arith.constant 0 : i32
    return %arg0, %arg1, %arg2, %c0_i32 : i32, i32, i32, i32
  }
  func.func @transform_6(%arg0: i32, %arg1: i32, %arg2: i32) -> (i32, i32, i32, i32) {
    %c0_i32 = arith.constant 0 : i32
    %c0_i32_0 = arith.constant 0 : i32
    %c0_i32_1 = arith.constant 0 : i32
    return %arg0, %arg1, %c0_i32, %c0_i32_0 : i32, i32, i32, i32
  }
  func.func @transform_7(%arg0: i32, %arg1: i32, %arg2: i32) -> (i32, i32, i32, i32) {
    %c0_i32 = arith.constant 0 : i32
    %c0_i32_0 = arith.constant 0 : i32
    %c0_i32_1 = arith.constant 0 : i32
    return %arg0, %arg1, %c0_i32, %c0_i32_0 : i32, i32, i32, i32
  }
}

module attributes {stable_mosaic.version = 11 : i64} {
  func.func @_dec_pointwise_kernel(%arg0: i32, %arg1: i32, %arg2: i32, %arg3: memref<1x1x32x128xbf16, #tpu.memory_space<vmem>>, %arg4: memref<1x1x128xf32, #tpu.memory_space<vmem>>, %arg5: memref<1x1x128xf32, #tpu.memory_space<vmem>>, %arg6: memref<1x128x128xbf16, #tpu.memory_space<vmem>>, %arg7: memref<1x1x128xf32, #tpu.memory_space<vmem>>, %arg8: memref<1x1x32x128xbf16, #tpu.memory_space<vmem>>, %arg9: memref<1x1x1x128xf32, #tpu.memory_space<vmem>>, %arg10: memref<1x1x1x128xf32, #tpu.memory_space<vmem>>) attributes {dimension_semantics = [#tpu.dimension_semantics<parallel>, #tpu.dimension_semantics<parallel>, #tpu.dimension_semantics<arbitrary>], iteration_bounds = array<i64: 2, 2, 1>, scalar_prefetch = 0 : i64, scratch_operands = 0 : i64, tpu.core_type = #tpu.core_type<tc>, window_params = [{transform_indices = @transform_0, window_bounds = array<i64: 1, 1, 32, 128>}, {transform_indices = @transform_1, window_bounds = array<i64: 1, 1, 128>}, {transform_indices = @transform_2, window_bounds = array<i64: 1, 1, 128>}, {transform_indices = @transform_3, window_bounds = array<i64: 1, 128, 128>}, {transform_indices = @transform_4, window_bounds = array<i64: 1, 1, 128>}, {transform_indices = @transform_5, window_bounds = array<i64: 1, 1, 32, 128>}, {transform_indices = @transform_6, window_bounds = array<i64: 1, 1, 1, 128>}, {transform_indices = @transform_7, window_bounds = array<i64: 1, 1, 1, 128>}]} {
    %c0 = arith.constant 0 : index
    %c0_0 = arith.constant 0 : index
    %c0_1 = arith.constant 0 : index
    %c0_2 = arith.constant 0 : index
    %0 = vector.load %arg3[%c0, %c0_0, %c0_1, %c0_2] : memref<1x1x32x128xbf16, #tpu.memory_space<vmem>>, vector<1x1x32x128xbf16>
    %1 = vector.shape_cast %0 : vector<1x1x32x128xbf16> to vector<32x128xbf16>
    %2 = arith.extf %1 : vector<32x128xbf16> to vector<32x128xf32>
    %c0_3 = arith.constant 0 : index
    %c0_4 = arith.constant 0 : index
    %c0_5 = arith.constant 0 : index
    %3 = vector.load %arg4[%c0_3, %c0_4, %c0_5] : memref<1x1x128xf32, #tpu.memory_space<vmem>>, vector<1x1x128xf32>
    %4 = vector.shape_cast %3 : vector<1x1x128xf32> to vector<1x128xf32>
    %5 = vector.broadcast %4 : vector<1x128xf32> to vector<32x128xf32>
    %6 = arith.subf %2, %5 : vector<32x128xf32>
    %c0_6 = arith.constant 0 : index
    %c0_7 = arith.constant 0 : index
    %c0_8 = arith.constant 0 : index
    %7 = vector.load %arg5[%c0_6, %c0_7, %c0_8] : memref<1x1x128xf32, #tpu.memory_space<vmem>>, vector<1x1x128xf32>
    %8 = vector.shape_cast %7 : vector<1x1x128xf32> to vector<1x128xf32>
    %9 = vector.broadcast %8 : vector<1x128xf32> to vector<32x128xf32>
    %10 = arith.mulf %6, %9 : vector<32x128xf32>
    %cst = arith.constant 0.000000e+00 : f32
    %11 = vector.broadcast %cst : f32 to vector<32x128xf32>
    %12 = arith.maximumf %10, %11 : vector<32x128xf32>
    %13 = arith.truncf %12 : vector<32x128xf32> to vector<32x128xbf16>
    %c0_9 = arith.constant 0 : index
    %c0_10 = arith.constant 0 : index
    %c0_11 = arith.constant 0 : index
    %14 = vector.load %arg6[%c0_9, %c0_10, %c0_11] : memref<1x128x128xbf16, #tpu.memory_space<vmem>>, vector<1x128x128xbf16>
    %15 = vector.shape_cast %14 : vector<1x128x128xbf16> to vector<128x128xbf16>
    %cst_12 = arith.constant dense<0.000000e+00> : vector<32x128xf32>
    %16 = tpu.matmul %13, %15, %cst_12 {dimension_numbers = #tpu.dot_dimension_numbers<[1], [0], [0], [1], [0, 0, 1, 1], [], []>} : vector<32x128xbf16>, vector<128x128xbf16>, vector<32x128xf32> -> vector<32x128xf32>
    %c0_13 = arith.constant 0 : index
    %c0_14 = arith.constant 0 : index
    %c0_15 = arith.constant 0 : index
    %17 = vector.load %arg7[%c0_13, %c0_14, %c0_15] : memref<1x1x128xf32, #tpu.memory_space<vmem>>, vector<1x1x128xf32>
    %18 = vector.shape_cast %17 : vector<1x1x128xf32> to vector<1x128xf32>
    %19 = vector.broadcast %18 : vector<1x128xf32> to vector<32x128xf32>
    %20 = arith.addf %16, %19 : vector<32x128xf32>
    %21 = arith.truncf %20 : vector<32x128xf32> to vector<32x128xbf16>
    %22 = vector.shape_cast %21 : vector<32x128xbf16> to vector<1x1x32x128xbf16>
    %c0_16 = arith.constant 0 : index
    %c0_17 = arith.constant 0 : index
    %c0_18 = arith.constant 0 : index
    %c0_19 = arith.constant 0 : index
    %23 = vector.load %arg8[%c0_16, %c0_17, %c0_18, %c0_19] : memref<1x1x32x128xbf16, #tpu.memory_space<vmem>>, vector<1x1x32x128xbf16>
    tpu.vector_store %arg8[%c0_16, %c0_17, %c0_18, %c0_19], %22 {strides = array<i32>} : memref<1x1x32x128xbf16, #tpu.memory_space<vmem>>, vector<1x1x32x128xbf16>,
    %c0_i32 = arith.constant 0 : i32
    %24 = arith.cmpi eq, %arg2, %c0_i32 : i32
    %25 = arith.extui %24 : i1 to i32
    %c0_i32_20 = arith.constant 0 : i32
    %26 = arith.cmpi ne, %25, %c0_i32_20 : i32
    scf.if %26 {
      %cst_39 = arith.constant 0.000000e+00 : f32
      %40 = vector.broadcast %cst_39 : f32 to vector<1x1x1x128xf32>
      %c0_40 = arith.constant 0 : index
      %c0_41 = arith.constant 0 : index
      %c0_42 = arith.constant 0 : index
      %c0_43 = arith.constant 0 : index
      %41 = vector.load %arg9[%c0_40, %c0_41, %c0_42, %c0_43] : memref<1x1x1x128xf32, #tpu.memory_space<vmem>>, vector<1x1x1x128xf32>
      tpu.vector_store %arg9[%c0_40, %c0_41, %c0_42, %c0_43], %40 {strides = array<i32>} : memref<1x1x1x128xf32, #tpu.memory_space<vmem>>, vector<1x1x1x128xf32>,
      %cst_44 = arith.constant 0.000000e+00 : f32
      %42 = vector.broadcast %cst_44 : f32 to vector<1x1x1x128xf32>
      %c0_45 = arith.constant 0 : index
      %c0_46 = arith.constant 0 : index
      %c0_47 = arith.constant 0 : index
      %c0_48 = arith.constant 0 : index
      %43 = vector.load %arg10[%c0_45, %c0_46, %c0_47, %c0_48] : memref<1x1x1x128xf32, #tpu.memory_space<vmem>>, vector<1x1x1x128xf32>
      tpu.vector_store %arg10[%c0_45, %c0_46, %c0_47, %c0_48], %42 {strides = array<i32>} : memref<1x1x1x128xf32, #tpu.memory_space<vmem>>, vector<1x1x1x128xf32>,
    } else {
    }
    %c0_21 = arith.constant 0 : index
    %c0_22 = arith.constant 0 : index
    %c0_23 = arith.constant 0 : index
    %c0_24 = arith.constant 0 : index
    %27 = vector.load %arg9[%c0_21, %c0_22, %c0_23, %c0_24] : memref<1x1x1x128xf32, #tpu.memory_space<vmem>>, vector<1x1x1x128xf32>
    %cst_25 = arith.constant dense<0.000000e+00> : vector<128xf32>
    %28 = vector.multi_reduction <add>, %20, %cst_25 [0] : vector<32x128xf32> to vector<128xf32>
    %29 = vector.shape_cast %28 : vector<128xf32> to vector<1x128xf32>
    %30 = vector.shape_cast %29 : vector<1x128xf32> to vector<1x1x1x128xf32>
    %31 = arith.addf %27, %30 : vector<1x1x1x128xf32>
    %c0_26 = arith.constant 0 : index
    %c0_27 = arith.constant 0 : index
    %c0_28 = arith.constant 0 : index
    %c0_29 = arith.constant 0 : index
    %32 = vector.load %arg9[%c0_26, %c0_27, %c0_28, %c0_29] : memref<1x1x1x128xf32, #tpu.memory_space<vmem>>, vector<1x1x1x128xf32>
    tpu.vector_store %arg9[%c0_26, %c0_27, %c0_28, %c0_29], %31 {strides = array<i32>} : memref<1x1x1x128xf32, #tpu.memory_space<vmem>>, vector<1x1x1x128xf32>,
    %c0_30 = arith.constant 0 : index
    %c0_31 = arith.constant 0 : index
    %c0_32 = arith.constant 0 : index
    %c0_33 = arith.constant 0 : index
    %33 = vector.load %arg10[%c0_30, %c0_31, %c0_32, %c0_33] : memref<1x1x1x128xf32, #tpu.memory_space<vmem>>, vector<1x1x1x128xf32>
    %34 = arith.mulf %20, %20 : vector<32x128xf32>
    %cst_34 = arith.constant dense<0.000000e+00> : vector<128xf32>
    %35 = vector.multi_reduction <add>, %34, %cst_34 [0] : vector<32x128xf32> to vector<128xf32>
    %36 = vector.shape_cast %35 : vector<128xf32> to vector<1x128xf32>
    %37 = vector.shape_cast %36 : vector<1x128xf32> to vector<1x1x1x128xf32>
    %38 = arith.addf %33, %37 : vector<1x1x1x128xf32>
    %c0_35 = arith.constant 0 : index
    %c0_36 = arith.constant 0 : index
    %c0_37 = arith.constant 0 : index
    %c0_38 = arith.constant 0 : index
    %39 = vector.load %arg10[%c0_35, %c0_36, %c0_37, %c0_38] : memref<1x1x1x128xf32, #tpu.memory_space<vmem>>, vector<1x1x1x128xf32>
    tpu.vector_store %arg10[%c0_35, %c0_36, %c0_37, %c0_38], %38 {strides = array<i32>} : memref<1x1x1x128xf32, #tpu.memory_space<vmem>>, vector<1x1x1x128xf32>,
    return
  }
  func.func @transform_0(%arg0: i32, %arg1: i32, %arg2: i32) -> (i32, i32, i32, i32) {
    %c0_i32 = arith.constant 0 : i32
    %c0_i32_0 = arith.constant 0 : i32
    return %arg0, %arg1, %arg2, %c0_i32 : i32, i32, i32, i32
  }
  func.func @transform_1(%arg0: i32, %arg1: i32, %arg2: i32) -> (i32, i32, i32) {
    %c0_i32 = arith.constant 0 : i32
    %c0_i32_0 = arith.constant 0 : i32
    %c0_i32_1 = arith.constant 0 : i32
    return %arg0, %c0_i32, %c0_i32_0 : i32, i32, i32
  }
  func.func @transform_2(%arg0: i32, %arg1: i32, %arg2: i32) -> (i32, i32, i32) {
    %c0_i32 = arith.constant 0 : i32
    %c0_i32_0 = arith.constant 0 : i32
    %c0_i32_1 = arith.constant 0 : i32
    return %arg0, %c0_i32, %c0_i32_0 : i32, i32, i32
  }
  func.func @transform_3(%arg0: i32, %arg1: i32, %arg2: i32) -> (i32, i32, i32) {
    %c0_i32 = arith.constant 0 : i32
    %c0_i32_0 = arith.constant 0 : i32
    %c0_i32_1 = arith.constant 0 : i32
    return %arg0, %c0_i32, %c0_i32_0 : i32, i32, i32
  }
  func.func @transform_4(%arg0: i32, %arg1: i32, %arg2: i32) -> (i32, i32, i32) {
    %c0_i32 = arith.constant 0 : i32
    %c0_i32_0 = arith.constant 0 : i32
    %c0_i32_1 = arith.constant 0 : i32
    return %arg0, %c0_i32, %c0_i32_0 : i32, i32, i32
  }
  func.func @transform_5(%arg0: i32, %arg1: i32, %arg2: i32) -> (i32, i32, i32, i32) {
    %c0_i32 = arith.constant 0 : i32
    %c0_i32_0 = arith.constant 0 : i32
    return %arg0, %arg1, %arg2, %c0_i32 : i32, i32, i32, i32
  }
  func.func @transform_6(%arg0: i32, %arg1: i32, %arg2: i32) -> (i32, i32, i32, i32) {
    %c0_i32 = arith.constant 0 : i32
    %c0_i32_0 = arith.constant 0 : i32
    %c0_i32_1 = arith.constant 0 : i32
    return %arg0, %arg1, %c0_i32, %c0_i32_0 : i32, i32, i32, i32
  }
  func.func @transform_7(%arg0: i32, %arg1: i32, %arg2: i32) -> (i32, i32, i32, i32) {
    %c0_i32 = arith.constant 0 : i32
    %c0_i32_0 = arith.constant 0 : i32
    %c0_i32_1 = arith.constant 0 : i32
    return %arg0, %arg1, %c0_i32, %c0_i32_0 : i32, i32, i32, i32
  }
}

module attributes {stable_mosaic.version = 11 : i64} {
  func.func @_dec_pointwise_kernel(%arg0: i32, %arg1: i32, %arg2: i32, %arg3: memref<1x1x32x128xbf16, #tpu.memory_space<vmem>>, %arg4: memref<1x1x128xf32, #tpu.memory_space<vmem>>, %arg5: memref<1x1x128xf32, #tpu.memory_space<vmem>>, %arg6: memref<1x128x128xbf16, #tpu.memory_space<vmem>>, %arg7: memref<1x1x128xf32, #tpu.memory_space<vmem>>, %arg8: memref<1x1x32x128xf32, #tpu.memory_space<vmem>>) attributes {dimension_semantics = [#tpu.dimension_semantics<parallel>, #tpu.dimension_semantics<parallel>, #tpu.dimension_semantics<arbitrary>], iteration_bounds = array<i64: 2, 2, 1>, scalar_prefetch = 0 : i64, scratch_operands = 0 : i64, tpu.core_type = #tpu.core_type<tc>, window_params = [{transform_indices = @transform_0, window_bounds = array<i64: 1, 1, 32, 128>}, {transform_indices = @transform_1, window_bounds = array<i64: 1, 1, 128>}, {transform_indices = @transform_2, window_bounds = array<i64: 1, 1, 128>}, {transform_indices = @transform_3, window_bounds = array<i64: 1, 128, 128>}, {transform_indices = @transform_4, window_bounds = array<i64: 1, 1, 128>}, {transform_indices = @transform_5, window_bounds = array<i64: 1, 1, 32, 128>}]} {
    %c0 = arith.constant 0 : index
    %c0_0 = arith.constant 0 : index
    %c0_1 = arith.constant 0 : index
    %c0_2 = arith.constant 0 : index
    %0 = vector.load %arg3[%c0, %c0_0, %c0_1, %c0_2] : memref<1x1x32x128xbf16, #tpu.memory_space<vmem>>, vector<1x1x32x128xbf16>
    %1 = vector.shape_cast %0 : vector<1x1x32x128xbf16> to vector<32x128xbf16>
    %2 = arith.extf %1 : vector<32x128xbf16> to vector<32x128xf32>
    %c0_3 = arith.constant 0 : index
    %c0_4 = arith.constant 0 : index
    %c0_5 = arith.constant 0 : index
    %3 = vector.load %arg4[%c0_3, %c0_4, %c0_5] : memref<1x1x128xf32, #tpu.memory_space<vmem>>, vector<1x1x128xf32>
    %4 = vector.shape_cast %3 : vector<1x1x128xf32> to vector<1x128xf32>
    %5 = vector.broadcast %4 : vector<1x128xf32> to vector<32x128xf32>
    %6 = arith.subf %2, %5 : vector<32x128xf32>
    %c0_6 = arith.constant 0 : index
    %c0_7 = arith.constant 0 : index
    %c0_8 = arith.constant 0 : index
    %7 = vector.load %arg5[%c0_6, %c0_7, %c0_8] : memref<1x1x128xf32, #tpu.memory_space<vmem>>, vector<1x1x128xf32>
    %8 = vector.shape_cast %7 : vector<1x1x128xf32> to vector<1x128xf32>
    %9 = vector.broadcast %8 : vector<1x128xf32> to vector<32x128xf32>
    %10 = arith.mulf %6, %9 : vector<32x128xf32>
    %cst = arith.constant 0.000000e+00 : f32
    %11 = vector.broadcast %cst : f32 to vector<32x128xf32>
    %12 = arith.maximumf %10, %11 : vector<32x128xf32>
    %13 = arith.truncf %12 : vector<32x128xf32> to vector<32x128xbf16>
    %c0_9 = arith.constant 0 : index
    %c0_10 = arith.constant 0 : index
    %c0_11 = arith.constant 0 : index
    %14 = vector.load %arg6[%c0_9, %c0_10, %c0_11] : memref<1x128x128xbf16, #tpu.memory_space<vmem>>, vector<1x128x128xbf16>
    %15 = vector.shape_cast %14 : vector<1x128x128xbf16> to vector<128x128xbf16>
    %cst_12 = arith.constant dense<0.000000e+00> : vector<32x128xf32>
    %16 = tpu.matmul %13, %15, %cst_12 {dimension_numbers = #tpu.dot_dimension_numbers<[1], [0], [0], [1], [0, 0, 1, 1], [], []>} : vector<32x128xbf16>, vector<128x128xbf16>, vector<32x128xf32> -> vector<32x128xf32>
    %c0_13 = arith.constant 0 : index
    %c0_14 = arith.constant 0 : index
    %c0_15 = arith.constant 0 : index
    %17 = vector.load %arg7[%c0_13, %c0_14, %c0_15] : memref<1x1x128xf32, #tpu.memory_space<vmem>>, vector<1x1x128xf32>
    %18 = vector.shape_cast %17 : vector<1x1x128xf32> to vector<1x128xf32>
    %19 = vector.broadcast %18 : vector<1x128xf32> to vector<32x128xf32>
    %20 = arith.addf %16, %19 : vector<32x128xf32>
    %21 = math.tanh %20 : vector<32x128xf32>
    %22 = vector.shape_cast %21 : vector<32x128xf32> to vector<1x1x32x128xf32>
    %c0_16 = arith.constant 0 : index
    %c0_17 = arith.constant 0 : index
    %c0_18 = arith.constant 0 : index
    %c0_19 = arith.constant 0 : index
    %23 = vector.load %arg8[%c0_16, %c0_17, %c0_18, %c0_19] : memref<1x1x32x128xf32, #tpu.memory_space<vmem>>, vector<1x1x32x128xf32>
    tpu.vector_store %arg8[%c0_16, %c0_17, %c0_18, %c0_19], %22 {strides = array<i32>} : memref<1x1x32x128xf32, #tpu.memory_space<vmem>>, vector<1x1x32x128xf32>,
    return
  }
  func.func @transform_0(%arg0: i32, %arg1: i32, %arg2: i32) -> (i32, i32, i32, i32) {
    %c0_i32 = arith.constant 0 : i32
    %c0_i32_0 = arith.constant 0 : i32
    return %arg0, %arg1, %arg2, %c0_i32 : i32, i32, i32, i32
  }
  func.func @transform_1(%arg0: i32, %arg1: i32, %arg2: i32) -> (i32, i32, i32) {
    %c0_i32 = arith.constant 0 : i32
    %c0_i32_0 = arith.constant 0 : i32
    %c0_i32_1 = arith.constant 0 : i32
    return %arg0, %c0_i32, %c0_i32_0 : i32, i32, i32
  }
  func.func @transform_2(%arg0: i32, %arg1: i32, %arg2: i32) -> (i32, i32, i32) {
    %c0_i32 = arith.constant 0 : i32
    %c0_i32_0 = arith.constant 0 : i32
    %c0_i32_1 = arith.constant 0 : i32
    return %arg0, %c0_i32, %c0_i32_0 : i32, i32, i32
  }
  func.func @transform_3(%arg0: i32, %arg1: i32, %arg2: i32) -> (i32, i32, i32) {
    %c0_i32 = arith.constant 0 : i32
    %c0_i32_0 = arith.constant 0 : i32
    %c0_i32_1 = arith.constant 0 : i32
    return %arg0, %c0_i32, %c0_i32_0 : i32, i32, i32
  }
  func.func @transform_4(%arg0: i32, %arg1: i32, %arg2: i32) -> (i32, i32, i32) {
    %c0_i32 = arith.constant 0 : i32
    %c0_i32_0 = arith.constant 0 : i32
    %c0_i32_1 = arith.constant 0 : i32
    return %arg0, %c0_i32, %c0_i32_0 : i32, i32, i32
  }
  func.func @transform_5(%arg0: i32, %arg1: i32, %arg2: i32) -> (i32, i32, i32, i32) {
    %c0_i32 = arith.constant 0 : i32
    %c0_i32_0 = arith.constant 0 : i32
    return %arg0, %arg1, %arg2, %c0_i32 : i32, i32, i32, i32
  }
}

</mosaic_0001>

<bundles_post_ra>
// kernel: point_trans_mlp_adj_forward.9
= control target key start
LH: loop header
LB: loop body
LE: loop exit
PB: predicated region body
PF: predicated region fallthrough
CT: control target
= control target key end

     0   :  { %s859_s24 = smov 0   ;;  %s861_s25 = smov 0   ;;  %s930_s0 = inlined_call_operand.vmem [shape: f32[2,64,8], index: 0, kind: input, shape index: {}]   ;;  %s931_s1 = inlined_call_operand.vmem [shape: f32[1,8], index: 1, kind: input, shape index: {}]   ;;  %s932_s2 = inlined_call_operand.vmem [shape: f32[1,8], index: 2, kind: input, shape index: {}]   ;;  %s933_s3 = inlined_call_operand.vmem [shape: bf16[8,128], index: 3, kind: input, shape index: {}]   ;;  %s934_s4 = inlined_call_operand.vmem [shape: f32[1,128], index: 4, kind: input, shape index: {}]   ;;  %s935_s5 = inlined_call_operand.vmem [shape: bf16[2,64,128], index: 5, kind: output, shape index: {0}]   ;;  %s936_s6 = inlined_call_operand.vmem [shape: f32[2,1,128], index: 6, kind: output, shape index: {1}]   ;;  %s937_s7 = inlined_call_operand.vmem [shape: f32[2,1,128], index: 7, kind: output, shape index: {2}]  }
   0x1   :  { %s863_s26 = smov 0  }
   0x2 LB: > { %s30_s27 = sadd.s32 1, %s812_s25  ;;  %p695_p0 = scmp.ge.s32.totalorder %s816_s26, 1  ;;  %s816_s26 = sphi %s863_s26, %s18_s26   ;;  %s812_s25 = sphi %s861_s25, %s939_s25   ;;  %s808_s24 = sphi %s859_s24, %s938_s24  }
   0x3   : > { %p32_p1 = scmp.ge.s32.totalorder %s30_s27, 2  ;;  %p263_p2 = scmp.lt.s32.totalorder %s816_s26, 3 }
   0x5   : > { %s941_s27 = smov (%p32_p1, %s30_s27), 0  ;;  %p264_p3 = pnand %p695_p0, %p263_p2 }
   0x6   : > { %p310_p4 = scmp.lt.s32.totalorder (!%p264_p3), %s808_s24, 1 }
   0x7   : > { %267 = sbr.rel (%p264_p3) target bundleno = 255 (0xff), region = 40 }
   0xc   : > { %v378_v0 = vld [vmem:[%s933_s3] sm:$0xf]  ;;  %vm399_vm0 = vcmask 1043456   ;;  %s943_s24 = smov (!%p310_p4, %s808_s24), 1  ;;  %vm386_vm1 = vcmask 64512   ;;  %v818_v32 = vmov 0.0  }
   0xd   : > { %767 = vmatprep.subr.msk.bf16.mxu0 %vm399_vm0, %v378_v0  ;;  %v401_v1 = vsel %vm399_vm0, %v378_v0, 0  ;;  %768 = vmatprep.subr.msk.bf16.mxu1 %vm399_vm0, %v378_v0  ;;  %s717_s30 = sshll.u32 %s943_s24, 6  ;;  %v700_v2 = vld [vmem:[%s931_s1] ss:$0 sm:$0xff]  ;;  %s900_s17 = scalar_lea.vmem %s936_s6, %s943_s24 }
   0xe   : > { %756 = vmatpush3.bf16.msra.mxu0 %v401_v1  ;;  %766 = vmatpush3.bf16.msra.mxu1 %v401_v1  ;;  %s317_s12 = scalar_lea.vmem %s930_s0, %s717_s30  ;;  %v701_v3 = vld [vmem:[%s932_s2] ss:$0 sm:$0xff]  ;;  %s906_s20 = scalar_lea.vmem %s937_s7, %s943_s24  ;;  %512 = vst [vmem:[%s900_s17] sm:$0x1] %v818_v32 }
   0xf   : > { %v336_v4 = vld [vmem:[%s317_s12] sm:$0xff]  ;;  %v337_v5 = vld [vmem:[%s317_s12 + $0x8] sm:$0xff]  ;;  %v338_v6 = vld [vmem:[%s317_s12 + $0x10] sm:$0xff]  ;;  %513 = vst [vmem:[%s906_s20] sm:$0x1] %v818_v32  ;;  %s718_s23 = sshll.u32 %s943_s24, 5 }
  0x10   : > { %v351_v7 = vsub.f32 %v336_v4, %v700_v2  ;;  %v352_v8 = vsub.f32 %v337_v5, %v700_v2  ;;  %v339_v9 = vld [vmem:[%s317_s12 + $0x18] sm:$0xff]  ;;  %v353_v10 = vsub.f32 %v338_v6, %v700_v2  ;;  %v340_v11 = vld [vmem:[%s317_s12 + $0x20] sm:$0xff]  ;;  %v341_v12 = vld [vmem:[%s317_s12 + $0x28] sm:$0xff]  ;;  %s327_s30 = scalar_lea.vmem %s935_s5, %s718_s23 }
  0x11   : > { %v354_v13 = vsub.f32 %v339_v9, %v700_v2  ;;  %v355_v14 = vsub.f32 %v340_v11, %v700_v2  ;;  %v356_v15 = vsub.f32 %v341_v12, %v700_v2  ;;  %v342_v16 = vld [vmem:[%s317_s12 + $0x30] sm:$0xff]  ;;  %v343_v17 = vld [vmem:[%s317_s12 + $0x38] sm:$0xff]  ;;  %v702_v34 = vld [vmem:[%s934_s4] ss:$0 sm:$0xff] }
  0x12   : > { %v366_v18 = vmul.f32 %v701_v3, %v351_v7  ;;  %v367_v19 = vmul.f32 %v701_v3, %v352_v8  ;;  %v368_v20 = vmul.f32 %v701_v3, %v353_v10  ;;  %v357_v21 = vsub.f32 %v342_v16, %v700_v2 }
  0x13   : > { %v369_v22 = vmul.f32 %v701_v3, %v354_v13  ;;  %v370_v23 = vmul.f32 %v701_v3, %v355_v14  ;;  %v371_v24 = vmul.f32 %v701_v3, %v356_v15  ;;  %v358_v25 = vsub.f32 %v343_v17, %v700_v2 }
  0x14   : > { %v374_v26 = vpack.c.bf16 %v367_v19, %v366_v18  ;;  %v372_v27 = vmul.f32 %v701_v3, %v357_v21 }
  0x15   : > { %v375_v28 = vpack.c.bf16 %v369_v22, %v368_v20  ;;  %v376_v29 = vpack.c.bf16 %v371_v24, %v370_v23  ;;  %v373_v30 = vmul.f32 %v701_v3, %v358_v25  ;;  %v514_v21 = vld [vmem:[%s900_s17] sm:$0x1] }
  0x16   : > { %757 = vmatprep.mubr.msk.bf16.mxu0 %vm386_vm1, %v374_v26  ;;  %v530_v24 = vld [vmem:[%s906_s20] sm:$0x1] }
  0x17   : > { %758 = vmatmul.mubr.msk.bf16.vlgmr.msra.gmra.mxu0 %vm386_vm1, %v375_v28  ;;  %761 = vmatprep.mubr.msk.bf16.mxu1 %vm386_vm1, %v376_v29  ;;  %v377_v31 = vpack.c.bf16 %v373_v30, %v372_v27 }
  0x19   : > { %762 = vmatmul.mubr.msk.bf16.vlgmr.msra.gmra.mxu1 %vm386_vm1, %v377_v31 }
  0xd7   : > { %v759_v33 = vpop.f32.mrf.mxu0 }
  0xd8   : > { %v446_v40 = vadd.f32 %v759_v33, %v702_v34 }
  0xd9   : > { %v437_v35 = vpop.f32.mrf.mxu0  ;;  %v763_v36 = vpop.f32.mrf.mxu1 }
  0xda   : > { %v438_v37 = vadd.f32 %v702_v34, %v437_v35  ;;  %v462_v42 = vadd.f32 %v763_v36, %v702_v34  ;;  %v533_v56 = vmul.f32 %v446_v40, %v446_v40 }
  0xdb   : > { %v760_v38 = vpop.f32.mrf.mxu0  ;;  %v453_v39 = vpop.f32.mrf.mxu1 }
  0xdc   : > { %v449_v41 = vadd.f32 %v760_v38, %v702_v34  ;;  %v454_v46 = vadd.f32 %v702_v34, %v453_v39  ;;  %v531_v48 = vmul.f32 %v438_v37, %v438_v37  ;;  %v537_v5 = vmul.f32 %v462_v42, %v462_v42 }
  0xdd   : > { %v440_v43 = vpop.f32.mrf.mxu0  ;;  %v764_v44 = vpop.f32.mrf.mxu1 }
  0xde   : > { %v735_v45 = vpack.c.bf16 %v449_v41, %v446_v40  ;;  %v441_v47 = vadd.f32 %v702_v34, %v440_v43  ;;  %v465_v49 = vadd.f32 %v764_v44, %v702_v34  ;;  %v534_v60 = vmul.f32 %v449_v41, %v449_v41 }
  0xdf   : > { %v456_v50 = vpop.f32.mrf.mxu1  ;;  %v535_v63 = vmul.f32 %v454_v46, %v454_v46 }
  0xe0   : > { %747 = vst [vmem:[%s327_s30 + $0x8] sm:$0xff] %v735_v45   ;;  %v730_v51 = vpack.c.bf16 %v441_v47, %v438_v37  ;;  %v515_v52 = vadd.f32 %v441_v47, %v438_v37  ;;  %v532_v53 = vmul.f32 %v441_v47, %v441_v47  ;;  %v457_v54 = vadd.f32 %v702_v34, %v456_v50 }
  0xe1   : > { %v745_v55 = vpack.c.bf16 %v465_v49, %v462_v42  ;;  %v538_v8 = vmul.f32 %v465_v49, %v465_v49 }
  0xe2   : > { %731 = vst [vmem:[%s327_s30] sm:$0xff] %v730_v51   ;;  %v516_v57 = vadd.f32 %v515_v52, %v446_v40  ;;  %v539_v58 = vadd.f32 %v532_v53, %v531_v48  ;;  %v740_v59 = vpack.c.bf16 %v457_v54, %v454_v46  ;;  %v536_v3 = vmul.f32 %v457_v54, %v457_v54 }
  0xe3   : > { %749 = vst [vmem:[%s327_s30 + $0x18] sm:$0xff] %v745_v55  }
  0xe4   : > { %v540_v61 = vadd.f32 %v539_v58, %v533_v56  ;;  %748 = vst [vmem:[%s327_s30 + $0x10] sm:$0xff] %v740_v59   ;;  %v517_v62 = vadd.f32 %v516_v57, %v449_v41 }
  0xe6   : > { %v518_v0 = vadd.f32 %v517_v62, %v454_v46  ;;  %v541_v1 = vadd.f32 %v540_v61, %v534_v60 }
  0xe8   : > { %v519_v2 = vadd.f32 %v518_v0, %v457_v54  ;;  %v542_v4 = vadd.f32 %v541_v1, %v535_v63 }
  0xea   : > { %v520_v6 = vadd.f32 %v519_v2, %v462_v42  ;;  %v543_v7 = vadd.f32 %v542_v4, %v536_v3 }
  0xec   : > { %v521_v9 = vadd.f32 %v520_v6, %v465_v49  ;;  %v544_v10 = vadd.f32 %v543_v7, %v537_v5 }
  0xee   : > { %v522_v11 = vrot.slane %v521_v9, 4  ;;  %v545_v12 = vadd.f32 %v544_v10, %v538_v8 }
  0xf0   : > { %v523_v13 = vadd.f32 %v522_v11, %v521_v9  ;;  %v546_v14 = vrot.slane %v545_v12, 4 }
  0xf2   : > { %v524_v15 = vrot.slane %v523_v13, 2  ;;  %v547_v16 = vadd.f32 %v546_v14, %v545_v12 }
  0xf4   : > { %v525_v17 = vadd.f32 %v524_v15, %v523_v13  ;;  %v548_v18 = vrot.slane %v547_v16, 2 }
  0xf6   : > { %v526_v19 = vrot.slane %v525_v17, 1  ;;  %v549_v20 = vadd.f32 %v548_v18, %v547_v16 }
  0xf8   : > { %v527_v22 = vadd.f32 %v526_v19, %v525_v17  ;;  %v550_v23 = vrot.slane %v549_v20, 1 }
  0xfa   : > { %v528_v25 = vadd.f32 %v527_v22, %v514_v21  ;;  %v551_v26 = vadd.f32 %v550_v23, %v549_v20 }
  0xfc   : > { %529 = vst [vmem:[%s900_s17] sm:$0x1] %v528_v25  ;;  %v552_v27 = vadd.f32 %v551_v26, %v530_v24 }
  0xfe   : > { %553 = vst [vmem:[%s906_s20] sm:$0x1] %v552_v27 }
  0xff PF: > { %s18_s26 = sadd.s32 1, %s816_s26   ;;  %s938_s24 = smov %s812_s25 }
 0x100   : > { %p15_p5 = scmp.ge.s32.totalorder %s18_s26, 4   ;;  %s939_s25 = smov %s941_s27 }
 0x102   :  { %17 = sbr.rel (!%p15_p5) target bundleno = 2 (0x2), region = 98 }

// kernel: point_trans_mlp_adj_forward.10
= control target key start
LH: loop header
LB: loop body
LE: loop exit
PB: predicated region body
PF: predicated region fallthrough
CT: control target
= control target key end

     0   :  { %s985_s24 = smov 0   ;;  %s987_s25 = smov 0   ;;  %s1076_s0 = inlined_call_operand.vmem [shape: bf16[2,64,128], index: 0, kind: input, shape index: {}]   ;;  %s1077_s1 = inlined_call_operand.vmem [shape: f32[1,128], index: 1, kind: input, shape index: {}]   ;;  %s1078_s2 = inlined_call_operand.vmem [shape: f32[1,128], index: 2, kind: input, shape index: {}]   ;;  %s1079_s3 = inlined_call_operand.vmem [shape: bf16[128,128], index: 3, kind: input, shape index: {}]   ;;  %s1080_s4 = inlined_call_operand.vmem [shape: f32[1,128], index: 4, kind: input, shape index: {}]   ;;  %s1081_s5 = inlined_call_operand.vmem [shape: bf16[2,64,128], index: 5, kind: output, shape index: {0}]   ;;  %s1082_s6 = inlined_call_operand.vmem [shape: f32[2,1,128], index: 6, kind: output, shape index: {1}]   ;;  %s1083_s7 = inlined_call_operand.vmem [shape: f32[2,1,128], index: 7, kind: output, shape index: {2}]  }
   0x1   :  { %s989_s26 = smov 0  }
   0x2 LB: > { %s30_s27 = sadd.s32 1, %s938_s25  ;;  %p757_p0 = scmp.ge.s32.totalorder %s942_s26, 1  ;;  %s942_s26 = sphi %s989_s26, %s18_s26   ;;  %s938_s25 = sphi %s987_s25, %s1085_s25   ;;  %s934_s24 = sphi %s985_s24, %s1084_s24  }
   0x3   : > { %p32_p1 = scmp.ge.s32.totalorder %s30_s27, 2  ;;  %p263_p2 = scmp.lt.s32.totalorder %s942_s26, 3 }
   0x5   : > { %s1087_s27 = smov (%p32_p1, %s30_s27), 0  ;;  %p264_p3 = pnand %p757_p0, %p263_p2 }
   0x6   : > { %p310_p4 = scmp.lt.s32.totalorder (!%p264_p3), %s934_s24, 1 }
   0x7   : > { %267 = sbr.rel (%p264_p3) target bundleno = 277 (0x115), region = 40 }
   0xc   : > { %v912_v0 = vld [vmem:[%s1079_s3 + $0x38] sm:$0xff]   ;;  %v913_v1 = vld [vmem:[%s1079_s3 + $0x30] sm:$0xff]   ;;  %s1089_s24 = smov (!%p310_p4, %s934_s24), 1  ;;  %v914_v2 = vld [vmem:[%s1079_s3 + $0x28] sm:$0xff]   ;;  %v944_v50 = vmov 0.0  }
   0xd   : > { %847 = vmatprep.subr.bf16.mxu0 %v912_v0  ;;  %871 = vmatprep.subr.bf16.mxu1 %v912_v0  ;;  %s783_s11 = sshll.u32 %s1089_s24, 5  ;;  %v915_v3 = vld [vmem:[%s1079_s3 + $0x20] sm:$0xff]   ;;  %v916_v16 = vld [vmem:[%s1079_s3 + $0x18] sm:$0xff]   ;;  %v917_v29 = vld [vmem:[%s1079_s3 + $0x10] sm:$0xff]   ;;  %s1045_s13 = scalar_lea.vmem %s1083_s7, %s1089_s24 }
   0xe   : > { %848 = vmatpush3.bf16.msra.mxu0 %v912_v0  ;;  %879 = vmatpush3.bf16.msra.mxu1 %v912_v0  ;;  %s317_s14 = scalar_lea.vmem %s1076_s0, %s783_s11  ;;  %v762_v5 = vld [vmem:[%s1077_s1] ss:$0 sm:$0xff]  ;;  %v918_v38 = vld [vmem:[%s1079_s3 + $0x8] sm:$0xff]   ;;  %s1051_s16 = scalar_lea.vmem %s1082_s6, %s1089_s24  ;;  %575 = vst [vmem:[%s1045_s13] sm:$0x1] %v944_v50 }
   0xf   : > { %849 = vmatprep.subr.bf16.mxu0 %v913_v1  ;;  %872 = vmatprep.subr.bf16.mxu1 %v913_v1  ;;  %v794_v4 = vld [vmem:[%s317_s14] sm:$0xff]   ;;  %v830_v8 = vld [vmem:[%s317_s14 + $0x10] sm:$0xff]   ;;  %v829_v10 = vld [vmem:[%s317_s14 + $0x8] sm:$0xff]   ;;  %574 = vst [vmem:[%s1051_s16] sm:$0x1] %v944_v50  ;;  %s327_s21 = scalar_lea.vmem %s1081_s5, %s783_s11 }
  0x10   : > { %v795_v6 = vunpack.c.l.bf16 %v794_v4  ;;  %v796_v7 = vunpack.c.h.bf16 %v794_v4  ;;  %v763_v9 = vld [vmem:[%s1078_s2] ss:$0 sm:$0xff]  ;;  %v803_v11 = vunpack.c.l.bf16 %v830_v8  ;;  %v804_v12 = vunpack.c.h.bf16 %v830_v8  ;;  %v831_v15 = vld [vmem:[%s317_s14 + $0x18] sm:$0xff]  }
  0x11   : > { %v799_v20 = vunpack.c.l.bf16 %v829_v10  ;;  %v800_v22 = vunpack.c.h.bf16 %v829_v10  ;;  %v807_v24 = vunpack.c.l.bf16 %v831_v15  ;;  %v808_v25 = vunpack.c.h.bf16 %v831_v15  ;;  %v919_v43 = vld [vmem:[%s1079_s3] sm:$0xff]  }
  0x12   : > { %850 = vmatpush3.bf16.msra.mxu0 %v913_v1  ;;  %880 = vmatpush3.bf16.msra.mxu1 %v913_v1  ;;  %v359_v13 = vsub.f32 %v795_v6, %v762_v5  ;;  %v360_v14 = vsub.f32 %v796_v7, %v762_v5  ;;  %v363_v17 = vsub.f32 %v803_v11, %v762_v5  ;;  %v764_v53 = vld [vmem:[%s1080_s4] ss:$0 sm:$0xff] }
  0x13   : > { %851 = vmatprep.subr.bf16.mxu0 %v914_v2  ;;  %873 = vmatprep.subr.bf16.mxu1 %v914_v2  ;;  %v364_v21 = vsub.f32 %v804_v12, %v762_v5  ;;  %v361_v33 = vsub.f32 %v799_v20, %v762_v5  ;;  %v362_v34 = vsub.f32 %v800_v22, %v762_v5 }
  0x14   : > { %v374_v18 = vmul.f32 %v763_v9, %v359_v13  ;;  %v375_v19 = vmul.f32 %v763_v9, %v360_v14  ;;  %v378_v23 = vmul.f32 %v763_v9, %v363_v17  ;;  %v365_v35 = vsub.f32 %v807_v24, %v762_v5 }
  0x15   : > { %v379_v28 = vmul.f32 %v763_v9, %v364_v21  ;;  %v366_v36 = vsub.f32 %v808_v25, %v762_v5  ;;  %v376_v39 = vmul.f32 %v763_v9, %v361_v33  ;;  %v377_v40 = vmul.f32 %v763_v9, %v362_v34 }
  0x16   : > { %852 = vmatpush3.bf16.msra.mxu0 %v914_v2  ;;  %881 = vmatpush3.bf16.msra.mxu1 %v914_v2  ;;  %v382_v26 = vmax.f32 %v374_v18, 0.0  ;;  %v383_v27 = vmax.f32 %v375_v19, 0.0  ;;  %v386_v30 = vmax.f32 %v378_v23, 0.0  ;;  %v380_v41 = vmul.f32 %v763_v9, %v365_v35 }
  0x17   : > { %853 = vmatprep.subr.bf16.mxu0 %v915_v3  ;;  %874 = vmatprep.subr.bf16.mxu1 %v915_v3  ;;  %v387_v32 = vmax.f32 %v379_v28, 0.0  ;;  %v381_v42 = vmul.f32 %v763_v9, %v366_v36  ;;  %v384_v44 = vmax.f32 %v376_v39, 0.0  ;;  %v385_v45 = vmax.f32 %v377_v40, 0.0  ;;  %v576_v39 = vld [vmem:[%s1051_s16] sm:$0x1] }
  0x18   : > { %v390_v31 = vpack.c.bf16 %v383_v27, %v382_v26  ;;  %v388_v46 = vmax.f32 %v380_v41, 0.0 }
  0x19   : > { %v392_v37 = vpack.c.bf16 %v387_v32, %v386_v30  ;;  %v389_v47 = vmax.f32 %v381_v42, 0.0  ;;  %v391_v48 = vpack.c.bf16 %v385_v45, %v384_v44  ;;  %v592_v42 = vld [vmem:[%s1045_s13] sm:$0x1] }
  0x1a   : > { %854 = vmatpush3.bf16.msra.mxu0 %v915_v3  ;;  %882 = vmatpush3.bf16.msra.mxu1 %v915_v3 }
  0x1b   : > { %855 = vmatprep.subr.bf16.mxu0 %v916_v16  ;;  %875 = vmatprep.subr.bf16.mxu1 %v916_v16  ;;  %v393_v49 = vpack.c.bf16 %v389_v47, %v388_v46 }
  0x1c   : > { %863 = vmatprep.mubr.bf16.mxu0 %v390_v31  ;;  %867 = vmatprep.mubr.bf16.mxu1 %v392_v37 }
  0x1e   : > { %856 = vmatpush3.bf16.msra.mxu0 %v916_v16  ;;  %883 = vmatpush3.bf16.msra.mxu1 %v916_v16 }
  0x1f   : > { %857 = vmatprep.subr.bf16.mxu0 %v917_v29  ;;  %876 = vmatprep.subr.bf16.mxu1 %v917_v29 }
  0x22   : > { %858 = vmatpush3.bf16.msra.mxu0 %v917_v29  ;;  %884 = vmatpush3.bf16.msra.mxu1 %v917_v29 }
  0x23   : > { %859 = vmatprep.subr.bf16.mxu0 %v918_v38  ;;  %877 = vmatprep.subr.bf16.mxu1 %v918_v38 }
  0x26   : > { %860 = vmatpush3.bf16.msra.mxu0 %v918_v38  ;;  %885 = vmatpush3.bf16.msra.mxu1 %v918_v38 }
  0x27   : > { %861 = vmatprep.subr.bf16.mxu0 %v919_v43  ;;  %878 = vmatprep.subr.bf16.mxu1 %v919_v43 }
  0x2a   : > { %862 = vmatpush3.bf16.msra.mxu0 %v919_v43  ;;  %886 = vmatpush3.bf16.msra.mxu1 %v919_v43 }
  0x2d   : > { %864 = vmatmul.mubr.bf16.vlgmr.msra.gmra.mxu0 %v391_v48  ;;  %868 = vmatmul.mubr.bf16.vlgmr.msra.gmra.mxu1 %v393_v49 }
  0xed   : > { %v865_v51 = vpop.f32.mrf.mxu0  ;;  %v869_v52 = vpop.f32.mrf.mxu1 }
  0xee   : > { %v524_v56 = vadd.f32 %v869_v52, %v764_v53  ;;  %v508_v59 = vadd.f32 %v865_v51, %v764_v53 }
  0xef   : > { %v499_v54 = vpop.f32.mrf.mxu0  ;;  %v515_v55 = vpop.f32.mrf.mxu1 }
  0xf0   : > { %v500_v60 = vadd.f32 %v764_v53, %v499_v54  ;;  %v516_v63 = vadd.f32 %v764_v53, %v515_v55  ;;  %v595_v11 = vmul.f32 %v508_v59, %v508_v59  ;;  %v599_v23 = vmul.f32 %v524_v56, %v524_v56 }
  0xf1   : > { %v866_v57 = vpop.f32.mrf.mxu0  ;;  %v870_v58 = vpop.f32.mrf.mxu1 }
  0xf2   : > { %v511_v61 = vadd.f32 %v866_v57, %v764_v53  ;;  %v527_v62 = vadd.f32 %v870_v58, %v764_v53  ;;  %v593_v6 = vmul.f32 %v500_v60, %v500_v60  ;;  %v597_v17 = vmul.f32 %v516_v63, %v516_v63 }
  0xf3   : > { %v502_v0 = vpop.f32.mrf.mxu0  ;;  %v518_v1 = vpop.f32.mrf.mxu1 }
  0xf4   : > { %v817_v2 = vpack.c.bf16 %v511_v61, %v508_v59  ;;  %v503_v3 = vadd.f32 %v764_v53, %v502_v0  ;;  %v827_v4 = vpack.c.bf16 %v527_v62, %v524_v56  ;;  %v519_v5 = vadd.f32 %v764_v53, %v518_v1 }
  0xf5   : > { %v596_v14 = vmul.f32 %v511_v61, %v511_v61  ;;  %v600_v26 = vmul.f32 %v527_v62, %v527_v62 }
  0xf6   : > { %832 = vst [vmem:[%s327_s21 + $0x8] sm:$0xff] %v817_v2   ;;  %v812_v7 = vpack.c.bf16 %v503_v3, %v500_v60  ;;  %v577_v8 = vadd.f32 %v503_v3, %v500_v60  ;;  %v594_v9 = vmul.f32 %v503_v3, %v503_v3  ;;  %834 = vst [vmem:[%s327_s21 + $0x18] sm:$0xff] %v827_v4  }
  0xf7   : > { %v822_v10 = vpack.c.bf16 %v519_v5, %v516_v63  ;;  %v598_v21 = vmul.f32 %v519_v5, %v519_v5 }
  0xf8   : > { %813 = vst [vmem:[%s327_s21] sm:$0xff] %v812_v7   ;;  %v578_v12 = vadd.f32 %v577_v8, %v508_v59  ;;  %v601_v13 = vadd.f32 %v594_v9, %v593_v6 }
  0xf9   : > { %833 = vst [vmem:[%s327_s21 + $0x10] sm:$0xff] %v822_v10  }
  0xfa   : > { %v602_v15 = vadd.f32 %v601_v13, %v595_v11  ;;  %v579_v16 = vadd.f32 %v578_v12, %v511_v61 }
  0xfc   : > { %v580_v18 = vadd.f32 %v579_v16, %v516_v63  ;;  %v603_v19 = vadd.f32 %v602_v15, %v596_v14 }
  0xfe   : > { %v581_v20 = vadd.f32 %v580_v18, %v519_v5  ;;  %v604_v22 = vadd.f32 %v603_v19, %v597_v17 }
 0x100   : > { %v582_v24 = vadd.f32 %v581_v20, %v524_v56  ;;  %v605_v25 = vadd.f32 %v604_v22, %v598_v21 }
 0x102   : > { %v583_v27 = vadd.f32 %v582_v24, %v527_v62  ;;  %v606_v28 = vadd.f32 %v605_v25, %v599_v23 }
 0x104   : > { %v584_v29 = vrot.slane %v583_v27, 4  ;;  %v607_v30 = vadd.f32 %v606_v28, %v600_v26 }
 0x106   : > { %v585_v31 = vadd.f32 %v584_v29, %v583_v27  ;;  %v608_v32 = vrot.slane %v607_v30, 4 }
 0x108   : > { %v586_v33 = vrot.slane %v585_v31, 2  ;;  %v609_v34 = vadd.f32 %v608_v32, %v607_v30 }
 0x10a   : > { %v587_v35 = vadd.f32 %v586_v33, %v585_v31  ;;  %v610_v36 = vrot.slane %v609_v34, 2 }
 0x10c   : > { %v588_v37 = vrot.slane %v587_v35, 1  ;;  %v611_v38 = vadd.f32 %v610_v36, %v609_v34 }
 0x10e   : > { %v589_v40 = vadd.f32 %v588_v37, %v587_v35  ;;  %v612_v41 = vrot.slane %v611_v38, 1 }
 0x110   : > { %v590_v43 = vadd.f32 %v589_v40, %v576_v39  ;;  %v613_v44 = vadd.f32 %v612_v41, %v611_v38 }
 0x112   : > { %591 = vst [vmem:[%s1051_s16] sm:$0x1] %v590_v43  ;;  %v614_v45 = vadd.f32 %v613_v44, %v592_v42 }
 0x114   : > { %615 = vst [vmem:[%s1045_s13] sm:$0x1] %v614_v45 }
 0x115 PF: > { %s18_s26 = sadd.s32 1, %s942_s26   ;;  %s1084_s24 = smov %s938_s25 }
 0x116   : > { %p15_p5 = scmp.ge.s32.totalorder %s18_s26, 4   ;;  %s1085_s25 = smov %s1087_s27 }
 0x118   :  { %17 = sbr.rel (!%p15_p5) target bundleno = 2 (0x2), region = 98 }

// kernel: point_trans_mlp_adj_forward.11
= control target key start
LH: loop header
LB: loop body
LE: loop exit
PB: predicated region body
PF: predicated region fallthrough
CT: control target
= control target key end

     0   :  { %s1118_s24 = smov 0   ;;  %s1120_s25 = smov 0   ;;  %s1272_s0 = inlined_call_operand.vmem [shape: bf16[2,64,128], index: 0, kind: input, shape index: {}]   ;;  %s1273_s1 = inlined_call_operand.vmem [shape: f32[1,128], index: 1, kind: input, shape index: {}]   ;;  %s1274_s2 = inlined_call_operand.vmem [shape: f32[1,128], index: 2, kind: input, shape index: {}]   ;;  %s1275_s3 = inlined_call_operand.vmem [shape: bf16[128,256], index: 3, kind: input, shape index: {}]   ;;  %s1276_s4 = inlined_call_operand.vmem [shape: f32[1,256], index: 4, kind: input, shape index: {}]   ;;  %s1277_s5 = inlined_call_operand.vmem [shape: bf16[2,64,256], index: 5, kind: output, shape index: {0}]   ;;  %s1278_s6 = inlined_call_operand.vmem [shape: f32[2,1,256], index: 6, kind: output, shape index: {1}]   ;;  %s1279_s7 = inlined_call_operand.vmem [shape: f32[2,1,256], index: 7, kind: output, shape index: {2}]  }
   0x1   :  { %s1122_s26 = smov 0  }
   0x2 LB: > { %s30_s27 = sadd.s32 1, %s1069_s25  ;;  %p920_p0 = scmp.ge.s32.totalorder %s1073_s26, 1  ;;  %s1073_s26 = sphi %s1122_s26, %s18_s26   ;;  %s1069_s25 = sphi %s1120_s25, %s1283_s25   ;;  %s1065_s24 = sphi %s1118_s24, %s1282_s24  }
   0x3   : > { %p32_p1 = scmp.ge.s32.totalorder %s30_s27, 2  ;;  %p263_p2 = scmp.lt.s32.totalorder %s1073_s26, 3 }
   0x5   : > { %s1285_s27 = smov (%p32_p1, %s30_s27), 0  ;;  %p264_p3 = pnand %p920_p0, %p263_p2 }
   0x6   : > { %p313_p4 = scmp.lt.s32.totalorder (!%p264_p3), %s1065_s24, 1 }
   0x7   : > { %267 = sbr.rel (%p264_p3) target bundleno = 289 (0x121), region = 40 }
   0xc   : > { %v1027_v0 = vld [vmem:[%s1275_s3 + $0x74] ss:$8 sps:$4 sm:$0xff]   ;;  %v1029_v1 = vld [vmem:[%s1275_s3 + $0x70] ss:$8 sps:$4 sm:$0xff]   ;;  %v1075_v2 = vmov 0   ;;  %s1287_s24 = smov (!%p313_p4, %s1065_s24), 1  ;;  %v418_v59 = vlaneseq }
   0xd   : > { %540 = vmatprep.mubr.bf16.mxu0 %v1075_v2  ;;  %560 = vmatprep.mubr.bf16.mxu1 %v1075_v2  ;;  %v1030_v3 = vld [vmem:[%s1275_s3 + $0x64] ss:$8 sps:$4 sm:$0xff]   ;;  %v1032_v4 = vld [vmem:[%s1275_s3 + $0x60] ss:$8 sps:$4 sm:$0xff]   ;;  %v1033_v5 = vld [vmem:[%s1275_s3 + $0x54] ss:$8 sps:$4 sm:$0xff]  }
   0xe   : > { %508 = vmatprep.subr.bf16.mxu0 %v1027_v0  ;;  %984 = vmatprep.subr.bf16.mxu1 %v1027_v0  ;;  %s955_s15 = sshll.u32 %s1287_s24, 5  ;;  %v1035_v6 = vld [vmem:[%s1275_s3 + $0x50] ss:$8 sps:$4 sm:$0xff]   ;;  %v1036_v7 = vld [vmem:[%s1275_s3 + $0x44] ss:$8 sps:$4 sm:$0xff]   ;;  %s925_s30 = sshll.u32 %s1287_s24, 1 }
   0xf   : > { %509 = vmatpush1.bf16.msra.mxu0 %v1029_v1  ;;  %992 = vmatpush1.bf16.msra.mxu1 %v1029_v1  ;;  %s1162_s20 = scalar_lea.vmem %s1272_s0, %s955_s15  ;;  %v1038_v9 = vld [vmem:[%s1275_s3 + $0x40] ss:$8 sps:$4 sm:$0xff]   ;;  %v1039_v11 = vld [vmem:[%s1275_s3 + $0x34] ss:$8 sps:$4 sm:$0xff]   ;;  %v1041_v17 = vld [vmem:[%s1275_s3 + $0x30] ss:$8 sps:$4 sm:$0xff]   ;;  %s1210_s10 = scalar_lea.vmem %s1278_s6, %s925_s30 }
  0x10   : > { %510 = vmatprep.subr.bf16.mxu0 %v1030_v3  ;;  %985 = vmatprep.subr.bf16.mxu1 %v1030_v3  ;;  %v966_v8 = vld [vmem:[%s1162_s20] sm:$0xff]   ;;  %v982_v10 = vld [vmem:[%s1162_s20 + $0x10] sm:$0xff]   ;;  %v981_v24 = vld [vmem:[%s1162_s20 + $0x8] sm:$0xff]   ;;  %s1215_s13 = scalar_lea.vmem %s1279_s7, %s925_s30  ;;  %vm1217_vm0 = vcmp.lt.s32.totalorder %v418_v59, 256  ;;  %v1076_v61 = vmov 0.0   ;;  %v1227_v62 = vshrl.u32 %v418_v59, 7 }
  0x11   : > { %v967_v12 = vunpack.c.l.bf16 %v966_v8  ;;  %v968_v13 = vunpack.c.h.bf16 %v966_v8  ;;  %v927_v14 = vld [vmem:[%s1273_s1] ss:$0 sm:$0xff]  ;;  %v975_v15 = vunpack.c.l.bf16 %v982_v10  ;;  %v976_v16 = vunpack.c.h.bf16 %v982_v10  ;;  %v1042_v18 = vld [vmem:[%s1275_s3 + $0x24] ss:$8 sps:$4 sm:$0xff]   ;;  %v983_v26 = vld [vmem:[%s1162_s20 + $0x18] sm:$0xff]   ;;  %s956_s16 = sshll.u32 %s1287_s24, 6 }
  0x12   : > { %v928_v21 = vld [vmem:[%s1274_s2] ss:$0 sm:$0xff]  ;;  %v1045_v27 = vld [vmem:[%s1275_s3 + $0x14] ss:$8 sps:$4 sm:$0xff]   ;;  %v971_v30 = vunpack.c.l.bf16 %v981_v24  ;;  %v972_v31 = vunpack.c.h.bf16 %v981_v24  ;;  %v979_v34 = vunpack.c.l.bf16 %v983_v26  ;;  %v980_v35 = vunpack.c.h.bf16 %v983_v26  ;;  %v1047_v36 = vld [vmem:[%s1275_s3 + $0x10] ss:$8 sps:$4 sm:$0xff]   ;;  %s1240_s19 = scalar_lea.vmem %s1277_s5, %s956_s16 }
  0x13   : > { %511 = vmatpush1.bf16.msra.mxu0 %v1032_v4  ;;  %993 = vmatpush1.bf16.msra.mxu1 %v1032_v4  ;;  %v365_v19 = vsub.f32 %v967_v12, %v927_v14  ;;  %v366_v20 = vsub.f32 %v968_v13, %v927_v14  ;;  %v369_v22 = vsub.f32 %v975_v15, %v927_v14  ;;  %v1044_v25 = vld [vmem:[%s1275_s3 + $0x20] ss:$8 sps:$4 sm:$0xff]   ;;  %v1048_v37 = vld [vmem:[%s1275_s3 + $0x4] ss:$8 sps:$4 sm:$0xff]   ;;  %v420_v63 = vsub.s32 0, %v1227_v62 }
  0x14   : > { %512 = vmatprep.subr.bf16.mxu0 %v1033_v5  ;;  %986 = vmatprep.subr.bf16.mxu1 %v1033_v5  ;;  %v370_v23 = vsub.f32 %v976_v16, %v927_v14  ;;  %v367_v40 = vsub.f32 %v971_v30, %v927_v14  ;;  %v368_v41 = vsub.f32 %v972_v31, %v927_v14  ;;  %v1050_v46 = vld [vmem:[%s1275_s3] ss:$8 sps:$4 sm:$0xff]   ;;  %v424_v0 = vsub.s32 1, %v1227_v62 }
  0x15   : > { %v380_v28 = vmul.f32 %v928_v21, %v365_v19  ;;  %v381_v29 = vmul.f32 %v928_v21, %v366_v20  ;;  %v384_v32 = vmul.f32 %v928_v21, %v369_v22  ;;  %v371_v44 = vsub.f32 %v979_v34, %v927_v14  ;;  %645 = vst.msk [vmem:[%s1210_s10] sm:$0x3] %vm1217_vm0, %v1076_v61  ;;  %v416_v1 = vld [vmem:[%s1276_s4] sm:$0x3] }
  0x16   : > { %v385_v33 = vmul.f32 %v928_v21, %v370_v23  ;;  %v372_v45 = vsub.f32 %v980_v35, %v927_v14  ;;  %v382_v47 = vmul.f32 %v928_v21, %v367_v40  ;;  %v383_v48 = vmul.f32 %v928_v21, %v368_v41  ;;  %646 = vst.msk [vmem:[%s1215_s13] sm:$0x3] %vm1217_vm0, %v1076_v61 }
  0x17   : > { %513 = vmatpush1.bf16.msra.mxu0 %v1035_v6  ;;  %994 = vmatpush1.bf16.msra.mxu1 %v1035_v6  ;;  %v388_v38 = vmax.f32 %v380_v28, 0.0  ;;  %v389_v39 = vmax.f32 %v381_v29, 0.0  ;;  %v392_v42 = vmax.f32 %v384_v32, 0.0  ;;  %v386_v51 = vmul.f32 %v928_v21, %v371_v44 }
  0x18   : > { %514 = vmatprep.subr.bf16.mxu0 %v1036_v7  ;;  %987 = vmatprep.subr.bf16.mxu1 %v1036_v7  ;;  %v393_v43 = vmax.f32 %v385_v33, 0.0  ;;  %v387_v52 = vmul.f32 %v928_v21, %v372_v45  ;;  %v390_v53 = vmax.f32 %v382_v47, 0.0  ;;  %v391_v54 = vmax.f32 %v383_v48, 0.0 }
  0x19   : > { %v396_v49 = vpack.c.bf16 %v389_v39, %v388_v38  ;;  %v394_v55 = vmax.f32 %v386_v51, 0.0  ;;  %v425_v3 = vrot.slane %v416_v1, %v424_v0 }
  0x1a   : > { %v398_v50 = vpack.c.bf16 %v393_v43, %v392_v42  ;;  %v395_v56 = vmax.f32 %v387_v52, 0.0  ;;  %v397_v57 = vpack.c.bf16 %v391_v54, %v390_v53 }
  0x1b   : > { %515 = vmatpush1.bf16.msra.mxu0 %v1038_v9  ;;  %995 = vmatpush1.bf16.msra.mxu1 %v1038_v9 }
  0x1c   : > { %516 = vmatprep.subr.bf16.mxu0 %v1039_v11  ;;  %988 = vmatprep.subr.bf16.mxu1 %v1039_v11  ;;  %v399_v58 = vpack.c.bf16 %v395_v56, %v394_v55 }
  0x1f   : > { %517 = vmatpush1.bf16.msra.mxu0 %v1041_v17  ;;  %996 = vmatpush1.bf16.msra.mxu1 %v1041_v17 }
  0x20   : > { %518 = vmatprep.subr.bf16.mxu0 %v1042_v18  ;;  %989 = vmatprep.subr.bf16.mxu1 %v1042_v18 }
  0x23   : > { %519 = vmatpush1.bf16.msra.mxu0 %v1044_v25  ;;  %997 = vmatpush1.bf16.msra.mxu1 %v1044_v25 }
  0x24   : > { %520 = vmatprep.subr.bf16.mxu0 %v1045_v27  ;;  %990 = vmatprep.subr.bf16.mxu1 %v1045_v27 }
  0x27   : > { %521 = vmatpush1.bf16.msra.mxu0 %v1047_v36  ;;  %998 = vmatpush1.bf16.msra.mxu1 %v1047_v36 }
  0x28   : > { %522 = vmatprep.subr.bf16.mxu0 %v1048_v37  ;;  %991 = vmatprep.subr.bf16.mxu1 %v1048_v37 }
  0x2b   : > { %523 = vmatpush1.bf16.msra.mxu0 %v1050_v46  ;;  %999 = vmatpush1.bf16.msra.mxu1 %v1050_v46 }
  0x2e   : > { %541 = vmatmul.mubr.bf16.vlgmr.msra.gmra.mxu0 %v396_v49  ;;  %561 = vmatmul.mubr.bf16.vlgmr.msra.gmra.mxu1 %v398_v50 }
  0x2f   : > { %550 = vmatprep.mubr.bf16.mxu0 %v1075_v2  ;;  %570 = vmatprep.mubr.bf16.mxu1 %v1075_v2  ;;  %v421_v2 = vrot.slane %v416_v1, %v420_v63 }
  0x36   : > { %551 = vmatmul.mubr.bf16.gmra.mxu0 %v397_v57  ;;  %571 = vmatmul.mubr.bf16.gmra.mxu1 %v399_v58 }
  0xee   : > { %v542_v4 = vpop.f32.mrf.mxu0  ;;  %v562_v5 = vpop.f32.mrf.mxu1 }
  0xef   : > { %v563_v6 = vadd.f32 %v562_v5, %v421_v2  ;;  %v543_v9 = vadd.f32 %v542_v4, %v421_v2 }
  0xf0   : > { %v544_v7 = vpop.f32.mrf.mxu0  ;;  %v564_v8 = vpop.f32.mrf.mxu1 }
  0xf1   : > { %v545_v10 = vadd.f32 %v544_v7, %v425_v3  ;;  %v1235_v11 = vadd.f32 %v564_v8, %v425_v3  ;;  %v699_v31 = vmul.f32 %v543_v9, %v543_v9  ;;  %v707_v55 = vmul.f32 %v563_v6, %v563_v6 }
  0xf2   : > { %v546_v12 = vpop.f32.mrf.mxu0  ;;  %v566_v13 = vpop.f32.mrf.mxu1 }
  0xf3   : > { %v957_v14 = vpack.c.bf16 %v545_v10, %v543_v9  ;;  %v547_v15 = vadd.f32 %v546_v12, %v421_v2  ;;  %v961_v16 = vpack.c.bf16 %v1235_v11, %v563_v6  ;;  %v567_v18 = vadd.f32 %v566_v13, %v421_v2 }
  0xf4   : > { %v548_v17 = vpop.f32.mrf.mxu0  ;;  %v568_v19 = vpop.f32.mrf.mxu1  ;;  %v700_v35 = vmul.f32 %v545_v10, %v545_v10 }
  0xf5   : > { %629 = vst [vmem:[%s1240_s19] sm:$0xff] %v957_v14  ;;  %633 = vst [vmem:[%s1240_s19 + $0x20] sm:$0xff] %v961_v16  ;;  %v549_v20 = vadd.f32 %v548_v17, %v425_v3  ;;  %v569_v21 = vadd.f32 %v568_v19, %v425_v3  ;;  %v701_v24 = vmul.f32 %v547_v15, %v547_v15 }
  0xf6   : > { %v552_v22 = vpop.f32.mrf.mxu0  ;;  %v572_v23 = vpop.f32.mrf.mxu1  ;;  %v648_v32 = vadd.f32 %v547_v15, %v543_v9  ;;  %v708_v9 = vmul.f32 %v1235_v11, %v1235_v11 }
  0xf7   : > { %v958_v25 = vpack.c.bf16 %v549_v20, %v547_v15  ;;  %v553_v26 = vadd.f32 %v552_v22, %v421_v2  ;;  %v962_v27 = vpack.c.bf16 %v569_v21, %v567_v18  ;;  %v573_v29 = vadd.f32 %v572_v23, %v421_v2 }
  0xf8   : > { %v554_v28 = vpop.f32.mrf.mxu0  ;;  %v574_v30 = vpop.f32.mrf.mxu1  ;;  %v661_v36 = vadd.f32 %v549_v20, %v545_v10  ;;  %v702_v37 = vmul.f32 %v549_v20, %v549_v20  ;;  %v715_v41 = vadd.f32 %v701_v24, %v699_v31  ;;  %v710_v14 = vmul.f32 %v569_v21, %v569_v21 }
  0xf9   : > { %630 = vst [vmem:[%s1240_s19 + $0x8] sm:$0xff] %v958_v25  ;;  %v555_v33 = vadd.f32 %v554_v28, %v425_v3  ;;  %v575_v34 = vadd.f32 %v574_v30, %v425_v3  ;;  %v703_v38 = vmul.f32 %v553_v26, %v553_v26  ;;  %634 = vst [vmem:[%s1240_s19 + $0x28] sm:$0xff] %v962_v27 }
  0xfa   : > { %v556_v39 = vpop.f32.mrf.mxu0  ;;  %v576_v40 = vpop.f32.mrf.mxu1  ;;  %v649_v42 = vadd.f32 %v648_v32, %v553_v26  ;;  %v728_v56 = vadd.f32 %v702_v37, %v700_v35  ;;  %v711_v12 = vmul.f32 %v573_v29, %v573_v29 }
  0xfb   : > { %v959_v43 = vpack.c.bf16 %v555_v33, %v553_v26  ;;  %v557_v44 = vadd.f32 %v556_v39, %v421_v2  ;;  %v662_v45 = vadd.f32 %v661_v36, %v555_v33  ;;  %v704_v46 = vmul.f32 %v555_v33, %v555_v33 }
  0xfc   : > { %v963_v47 = vpack.c.bf16 %v575_v34, %v573_v29  ;;  %v558_v48 = vpop.f32.mrf.mxu0  ;;  %v577_v49 = vadd.f32 %v576_v40, %v421_v2  ;;  %v578_v50 = vpop.f32.mrf.mxu1  ;;  %v716_v51 = vadd.f32 %v715_v41, %v703_v38  ;;  %v709_v2 = vmul.f32 %v567_v18, %v567_v18 }
  0xfd   : > { %631 = vst [vmem:[%s1240_s19 + $0x10] sm:$0xff] %v959_v43  ;;  %v650_v52 = vadd.f32 %v649_v42, %v557_v44  ;;  %v705_v53 = vmul.f32 %v557_v44, %v557_v44  ;;  %v559_v54 = vadd.f32 %v558_v48, %v425_v3  ;;  %v579_v57 = vadd.f32 %v578_v50, %v425_v3 }
  0xfe   : > { %635 = vst [vmem:[%s1240_s19 + $0x30] sm:$0xff] %v963_v47  ;;  %v729_v0 = vadd.f32 %v728_v56, %v704_v46  ;;  %v713_v17 = vmul.f32 %v577_v49, %v577_v49  ;;  %v712_v22 = vmul.f32 %v575_v34, %v575_v34  ;;  %v647_v56 = vld [vmem:[%s1210_s10] sm:$0x3] }
  0xff   : > { %v651_v58 = vadd.f32 %v650_v52, %v563_v6  ;;  %v717_v59 = vadd.f32 %v716_v51, %v705_v53  ;;  %v960_v61 = vpack.c.bf16 %v559_v54, %v557_v44  ;;  %v663_v63 = vadd.f32 %v662_v45, %v559_v54 }
 0x100   : > { %v706_v1 = vmul.f32 %v559_v54, %v559_v54  ;;  %v964_v4 = vpack.c.bf16 %v579_v57, %v577_v49  ;;  %v714_v26 = vmul.f32 %v579_v57, %v579_v57 }
 0x101   : > { %v718_v5 = vadd.f32 %v717_v59, %v707_v55  ;;  %632 = vst [vmem:[%s1240_s19 + $0x18] sm:$0xff] %v960_v61  ;;  %v664_v7 = vadd.f32 %v663_v63, %v1235_v11  ;;  %v652_v8 = vadd.f32 %v651_v58, %v567_v18  ;;  %v698_v63 = vld [vmem:[%s1215_s13] sm:$0x3] }
 0x102   : > { %v730_v10 = vadd.f32 %v729_v0, %v706_v1  ;;  %636 = vst [vmem:[%s1240_s19 + $0x38] sm:$0xff] %v964_v4 }
 0x103   : > { %v653_v3 = vadd.f32 %v652_v8, %v573_v29  ;;  %v719_v6 = vadd.f32 %v718_v5, %v709_v2  ;;  %v665_v13 = vadd.f32 %v664_v7, %v569_v21  ;;  %v1077_v21 = vmov 1966171168  }
 0x104   : > { %v731_v15 = vadd.f32 %v730_v10, %v708_v9  ;;  %v678_v35 = vunpack.c.l.s4 %v1077_v21 }
 0x105   : > { %v654_v16 = vadd.f32 %v653_v3, %v577_v49  ;;  %v720_v19 = vadd.f32 %v719_v6, %v711_v12  ;;  %v666_v20 = vadd.f32 %v665_v13, %v575_v34 }
 0x106   : > { %v732_v23 = vadd.f32 %v731_v15, %v710_v14  ;;  %v679_v43 = vunpack.c.0.s8 %v678_v35 }
 0x107   : > { %v655_v24 = vrot.slane %v654_v16, 4  ;;  %v721_v25 = vadd.f32 %v720_v19, %v713_v17  ;;  %v667_v18 = vadd.f32 %v666_v20, %v579_v57 }
 0x108   : > { %v733_v27 = vadd.f32 %v732_v23, %v712_v22  ;;  %v682_v50 = vsub.s32 %v679_v43, %v1227_v62 }
 0x109   : > { %v656_v11 = vadd.f32 %v655_v24, %v654_v16  ;;  %v722_v28 = vrot.slane %v721_v25, 4  ;;  %v668_v30 = vrot.slane %v667_v18, 4 }
 0x10a   : > { %v734_v31 = vadd.f32 %v733_v27, %v714_v26 }
 0x10b   : > { %v657_v29 = vrot.slane %v656_v11, 2  ;;  %v723_v32 = vadd.f32 %v722_v28, %v721_v25  ;;  %v669_v33 = vadd.f32 %v668_v30, %v667_v18 }
 0x10c   : > { %v735_v36 = vrot.slane %v734_v31, 4 }
 0x10d   : > { %v658_v37 = vadd.f32 %v657_v29, %v656_v11  ;;  %v724_v38 = vrot.slane %v723_v32, 2  ;;  %v670_v39 = vrot.slane %v669_v33, 2 }
 0x10e   : > { %v736_v34 = vadd.f32 %v735_v36, %v734_v31 }
 0x10f   : > { %v659_v40 = vrot.slane %v658_v37, 1  ;;  %v725_v41 = vadd.f32 %v724_v38, %v723_v32  ;;  %v671_v42 = vadd.f32 %v670_v39, %v669_v33 }
 0x110   : > { %v737_v44 = vrot.slane %v736_v34, 2 }
 0x111   : > { %v672_v45 = vrot.slane %v671_v42, 1  ;;  %v726_v46 = vrot.slane %v725_v41, 1  ;;  %v660_v48 = vadd.f32 %v659_v40, %v658_v37 }
 0x112   : > { %v738_v47 = vadd.f32 %v737_v44, %v736_v34 }
 0x113   : > { %v673_v49 = vadd.f32 %v672_v45, %v671_v42  ;;  %v727_v53 = vadd.f32 %v726_v46, %v725_v41 }
 0x114   : > { %v739_v51 = vrot.slane %v738_v47, 1 }
 0x115   : > { %v676_v52 = vcombine.low %v660_v48, %v673_v49 }
 0x116   : > { %v740_v54 = vadd.f32 %v739_v51, %v738_v47 }
 0x117   : > { %v683_v55 = vrot.slane %v676_v52, %v682_v50 }
 0x118   : > { %v743_v57 = vcombine.low %v727_v53, %v740_v54 }
 0x119   : > { %v690_v58 = vrot.slane %v683_v55, %v682_v50 }
 0x11a   : > { %v750_v59 = vrot.slane %v743_v57, %v682_v50 }
 0x11b   : > { %v692_v61 = vadd.f32 %v690_v58, %v647_v56 }
 0x11c   : > { %v757_v0 = vrot.slane %v750_v59, %v682_v50 }
 0x11d   : > { %697 = vst.msk [vmem:[%s1210_s10] sm:$0x3] %vm1217_vm0, %v692_v61 }
 0x11e   : > { %v759_v1 = vadd.f32 %v757_v0, %v698_v63 }
 0x120   : > { %760 = vst.msk [vmem:[%s1215_s13] sm:$0x3] %vm1217_vm0, %v759_v1 }
 0x121 PF: > { %s18_s26 = sadd.s32 1, %s1073_s26   ;;  %s1282_s24 = smov %s1069_s25 }
 0x122   : > { %p15_p5 = scmp.ge.s32.totalorder %s18_s26, 4   ;;  %s1283_s25 = smov %s1285_s27 }
 0x124   :  { %17 = sbr.rel (!%p15_p5) target bundleno = 2 (0x2), region = 98 }

// kernel: point_trans_mlp_adj_forward.12
= control target key start
LH: loop header
LB: loop body
LE: loop exit
PB: predicated region body
PF: predicated region fallthrough
CT: control target
= control target key end

     0   :  { %s1683_s24 = smov 0   ;;  %s1685_s25 = smov 0   ;;  %s2104_s0 = inlined_call_operand.vmem [shape: bf16[2,64,256], index: 0, kind: input, shape index: {}]   ;;  %s2105_s1 = inlined_call_operand.vmem [shape: f32[1,256], index: 1, kind: input, shape index: {}]   ;;  %s2106_s2 = inlined_call_operand.vmem [shape: f32[1,256], index: 2, kind: input, shape index: {}]   ;;  %s2107_s3 = inlined_call_operand.vmem [shape: bf16[256,512], index: 3, kind: input, shape index: {}]   ;;  %s2108_s4 = inlined_call_operand.vmem [shape: f32[1,512], index: 4, kind: input, shape index: {}]   ;;  %s2109_s5 = inlined_call_operand.vmem [shape: f32[2,1,512], index: 5, kind: output, shape index: {0}]   ;;  %s2110_s6 = inlined_call_operand.vmem [shape: f32[2,1,512], index: 6, kind: output, shape index: {1}]   ;;  %s2111_s7 = inlined_call_operand.vmem [shape: f32[2,1,512], index: 7, kind: output, shape index: {2}]  }
   0x1   :  { %s1687_s26 = smov 0  }
   0x2 LB: > { %s30_s27 = sadd.s32 1, %s1634_s25  ;;  %p1420_p0 = scmp.ge.s32.totalorder %s1638_s26, 1  ;;  %s1638_s26 = sphi %s1687_s26, %s18_s26   ;;  %s1634_s25 = sphi %s1685_s25, %s2115_s25   ;;  %s1630_s24 = sphi %s1683_s24, %s2114_s24  }
   0x3   : > { %p32_p1 = scmp.ge.s32.totalorder %s30_s27, 2  ;;  %p262_p2 = scmp.lt.s32.totalorder %s1638_s26, 3 }
   0x5   : > { %s2117_s27 = smov (%p32_p1, %s30_s27), 0  ;;  %p263_p3 = pnand %p1420_p0, %p262_p2 }
   0x6   : > { %p307_p4 = scmp.lt.s32.totalorder (!%p263_p3), %s1630_s24, 1 }
   0x7   : > { %266 = sbr.rel (%p263_p3) target bundleno = 343 (0x157), region = 40 }
   0xc   : > { %v1520_v0 = vld [vmem:[%s2107_s3 + $0xe4] ss:$16 sps:$4 sm:$0xff]   ;;  %v1522_v1 = vld [vmem:[%s2107_s3 + $0xec] ss:$16 sps:$4 sm:$0xff]   ;;  %v1524_v2 = vld [vmem:[%s2107_s3 + $0xe0] ss:$16 sps:$4 sm:$0xff]   ;;  %v355_v36 = vlaneseq }
   0xd   : > { %839 = vmatprep.subr.bf16.mxu0 %v1520_v0  ;;  %v1525_v3 = vld [vmem:[%s2107_s3 + $0xe8] ss:$16 sps:$4 sm:$0xff]   ;;  %912 = vmatprep.subr.bf16.mxu1 %v1522_v1  ;;  %v1526_v4 = vld [vmem:[%s2107_s3 + $0xc4] ss:$16 sps:$4 sm:$0xff]   ;;  %v1528_v5 = vld [vmem:[%s2107_s3 + $0xcc] ss:$16 sps:$4 sm:$0xff]  }
   0xe   : > { %840 = vmatpush1.bf16.msra.mxu0 %v1524_v2  ;;  %913 = vmatpush1.bf16.msra.mxu1 %v1525_v3  ;;  %v1530_v6 = vld [vmem:[%s2107_s3 + $0xc0] ss:$16 sps:$4 sm:$0xff]   ;;  %v1531_v7 = vld [vmem:[%s2107_s3 + $0xc8] ss:$16 sps:$4 sm:$0xff]   ;;  %v1532_v8 = vld [vmem:[%s2107_s3 + $0xa4] ss:$16 sps:$4 sm:$0xff]  }
   0xf   : > { %841 = vmatprep.subr.bf16.mxu0 %v1526_v4  ;;  %914 = vmatprep.subr.bf16.mxu1 %v1528_v5  ;;  %v1534_v9 = vld [vmem:[%s2107_s3 + $0xac] ss:$16 sps:$4 sm:$0xff]   ;;  %v1536_v10 = vld [vmem:[%s2107_s3 + $0xa0] ss:$16 sps:$4 sm:$0xff]   ;;  %v1537_v11 = vld [vmem:[%s2107_s3 + $0xa8] ss:$16 sps:$4 sm:$0xff]  }
  0x10   : > { %v1538_v12 = vld [vmem:[%s2107_s3 + $0x84] ss:$16 sps:$4 sm:$0xff]   ;;  %v1540_v13 = vld [vmem:[%s2107_s3 + $0x8c] ss:$16 sps:$4 sm:$0xff]   ;;  %v1542_v14 = vld [vmem:[%s2107_s3 + $0x80] ss:$16 sps:$4 sm:$0xff]  }
  0x11   : > { %v1543_v15 = vld [vmem:[%s2107_s3 + $0x88] ss:$16 sps:$4 sm:$0xff]   ;;  %v1544_v16 = vld [vmem:[%s2107_s3 + $0x64] ss:$16 sps:$4 sm:$0xff]   ;;  %v1546_v17 = vld [vmem:[%s2107_s3 + $0x6c] ss:$16 sps:$4 sm:$0xff]  }
  0x12   : > { %842 = vmatpush1.bf16.msra.mxu0 %v1530_v6  ;;  %915 = vmatpush1.bf16.msra.mxu1 %v1531_v7  ;;  %v1548_v18 = vld [vmem:[%s2107_s3 + $0x60] ss:$16 sps:$4 sm:$0xff]   ;;  %v1549_v19 = vld [vmem:[%s2107_s3 + $0x68] ss:$16 sps:$4 sm:$0xff]   ;;  %v1550_v20 = vld [vmem:[%s2107_s3 + $0x44] ss:$16 sps:$4 sm:$0xff]  }
  0x13   : > { %843 = vmatprep.subr.bf16.mxu0 %v1532_v8  ;;  %916 = vmatprep.subr.bf16.mxu1 %v1534_v9  ;;  %v1552_v21 = vld [vmem:[%s2107_s3 + $0x4c] ss:$16 sps:$4 sm:$0xff]   ;;  %v1554_v22 = vld [vmem:[%s2107_s3 + $0x40] ss:$16 sps:$4 sm:$0xff]   ;;  %v1555_v23 = vld [vmem:[%s2107_s3 + $0x48] ss:$16 sps:$4 sm:$0xff]  }
  0x14   : > { %v1556_v24 = vld [vmem:[%s2107_s3 + $0x24] ss:$16 sps:$4 sm:$0xff]   ;;  %v1558_v25 = vld [vmem:[%s2107_s3 + $0x2c] ss:$16 sps:$4 sm:$0xff]   ;;  %v1560_v26 = vld [vmem:[%s2107_s3 + $0x20] ss:$16 sps:$4 sm:$0xff]  }
  0x15   : > { %v1561_v27 = vld [vmem:[%s2107_s3 + $0x28] ss:$16 sps:$4 sm:$0xff]   ;;  %v1562_v28 = vld [vmem:[%s2107_s3 + $0x4] ss:$16 sps:$4 sm:$0xff]   ;;  %v1564_v29 = vld [vmem:[%s2107_s3 + $0xc] ss:$16 sps:$4 sm:$0xff]  }
  0x16   : > { %844 = vmatpush1.bf16.msra.mxu0 %v1536_v10  ;;  %917 = vmatpush1.bf16.msra.mxu1 %v1537_v11  ;;  %v1566_v30 = vld [vmem:[%s2107_s3] ss:$16 sps:$4 sm:$0xff]   ;;  %v1567_v31 = vld [vmem:[%s2107_s3 + $0x8] ss:$16 sps:$4 sm:$0xff]   ;;  %v1568_v32 = vld [vmem:[%s2107_s3 + $0x1e4] ss:$16 sps:$4 sm:$0xff]  }
  0x17   : > { %845 = vmatprep.subr.bf16.mxu0 %v1538_v12  ;;  %918 = vmatprep.subr.bf16.mxu1 %v1540_v13  ;;  %v1570_v33 = vld [vmem:[%s2107_s3 + $0x1ec] ss:$16 sps:$4 sm:$0xff]   ;;  %v1572_v34 = vld [vmem:[%s2107_s3 + $0x1e0] ss:$16 sps:$4 sm:$0xff]   ;;  %v1573_v35 = vld [vmem:[%s2107_s3 + $0x1e8] ss:$16 sps:$4 sm:$0xff]  }
  0x18   : > { %v1574_v37 = vld [vmem:[%s2107_s3 + $0x1c4] ss:$16 sps:$4 sm:$0xff]   ;;  %s2119_s24 = smov (!%p307_p4, %s1630_s24), 1  ;;  %v1576_v38 = vld [vmem:[%s2107_s3 + $0x1cc] ss:$16 sps:$4 sm:$0xff]   ;;  %v1825_v40 = vshrl.u32 %v355_v36, 7 }
  0x19   : > { %v1578_v39 = vld [vmem:[%s2107_s3 + $0x1c0] ss:$16 sps:$4 sm:$0xff]   ;;  %v1579_v41 = vld [vmem:[%s2107_s3 + $0x1c8] ss:$16 sps:$4 sm:$0xff]   ;;  %v1580_v42 = vld [vmem:[%s2107_s3 + $0x1a4] ss:$16 sps:$4 sm:$0xff]  }
  0x1a   : > { %846 = vmatpush1.bf16.msra.mxu0 %v1542_v14  ;;  %919 = vmatpush1.bf16.msra.mxu1 %v1543_v15  ;;  %s1492_s11 = sshll.u32 %s2119_s24, 6  ;;  %v1582_v43 = vld [vmem:[%s2107_s3 + $0x1ac] ss:$16 sps:$4 sm:$0xff]   ;;  %v1584_v44 = vld [vmem:[%s2107_s3 + $0x1a0] ss:$16 sps:$4 sm:$0xff]   ;;  %v1852_v47 = vsub.s32 1, %v1825_v40 }
  0x1b   : > { %847 = vmatprep.subr.bf16.mxu0 %v1544_v16  ;;  %920 = vmatprep.subr.bf16.mxu1 %v1546_v17  ;;  %v1585_v45 = vld [vmem:[%s2107_s3 + $0x1a8] ss:$16 sps:$4 sm:$0xff]   ;;  %s1846_s20 = scalar_lea.vmem %s2104_s0, %s1492_s11  ;;  %v1586_v46 = vld [vmem:[%s2107_s3 + $0x184] ss:$16 sps:$4 sm:$0xff]   ;;  %v1588_v48 = vld [vmem:[%s2107_s3 + $0x18c] ss:$16 sps:$4 sm:$0xff]  }
  0x1c   : > { %v1590_v49 = vld [vmem:[%s2107_s3 + $0x180] ss:$16 sps:$4 sm:$0xff]   ;;  %v1862_v51 = vsub.s32 0, %v1825_v40  ;;  %v330_v52 = vld [vmem:[%s1846_s20 + $0x8] sm:$0xff]  ;;  %v1879_v60 = vld [vmem:[%s1846_s20 + $0x18] sm:$0xff]  ;;  %vm1988_vm0 = vcmp.lt.s32.totalorder %v355_v36, 512 }
  0x1d   : > { %v329_v50 = vld [vmem:[%s1846_s20] sm:$0xff]  ;;  %v1591_v56 = vld [vmem:[%s2107_s3 + $0x188] ss:$16 sps:$4 sm:$0xff]   ;;  %v340_v57 = vunpack.c.h.bf16 %v330_v52  ;;  %v331_v59 = vld [vmem:[%s1846_s20 + $0x10] sm:$0xff]  ;;  %v339_v4 = vunpack.c.l.bf16 %v330_v52  ;;  %v344_v6 = vunpack.c.h.bf16 %v1879_v60 }
  0x1e   : > { %848 = vmatpush1.bf16.msra.mxu0 %v1548_v18  ;;  %921 = vmatpush1.bf16.msra.mxu1 %v1549_v19  ;;  %v338_v53 = vunpack.c.h.bf16 %v329_v50  ;;  %v353_v54 = vld [vmem:[%s2105_s1] sm:$0x3]  ;;  %v1592_v61 = vld [vmem:[%s2107_s3 + $0x164] ss:$16 sps:$4 sm:$0xff]   ;;  %v1594_v62 = vld [vmem:[%s2107_s3 + $0x16c] ss:$16 sps:$4 sm:$0xff]   ;;  %v337_v0 = vunpack.c.l.bf16 %v329_v50  ;;  %v342_v5 = vunpack.c.h.bf16 %v331_v59 }
  0x1f   : > { %849 = vmatprep.subr.bf16.mxu0 %v1550_v20  ;;  %922 = vmatprep.subr.bf16.mxu1 %v1552_v21  ;;  %v381_v55 = vld [vmem:[%s2106_s2] sm:$0x3]  ;;  %v1875_v58 = vrot.slane %v353_v54, %v1852_v47  ;;  %v1891_v1 = vrot.slane %v353_v54, %v1862_v51  ;;  %v1597_v8 = vld [vmem:[%s2107_s3 + $0x168] ss:$16 sps:$4 sm:$0xff]   ;;  %v1598_v11 = vld [vmem:[%s2107_s3 + $0x144] ss:$16 sps:$4 sm:$0xff]  }
  0x20   : > { %v1888_v63 = vrot.slane %v381_v55, %v1852_v47  ;;  %v1596_v7 = vld [vmem:[%s2107_s3 + $0x160] ss:$16 sps:$4 sm:$0xff]   ;;  %v1600_v12 = vld [vmem:[%s2107_s3 + $0x14c] ss:$16 sps:$4 sm:$0xff]   ;;  %v1911_v13 = vrot.slane %v381_v55, %v1862_v51  ;;  %v1603_v21 = vld [vmem:[%s2107_s3 + $0x148] ss:$16 sps:$4 sm:$0xff]  }
  0x21   : > { %v366_v2 = vsub.f32 %v338_v53, %v1875_v58  ;;  %v368_v3 = vsub.f32 %v340_v57, %v1875_v58  ;;  %v365_v16 = vsub.f32 %v337_v0, %v1891_v1  ;;  %v367_v17 = vsub.f32 %v339_v4, %v1891_v1  ;;  %v1602_v20 = vld [vmem:[%s2107_s3 + $0x140] ss:$16 sps:$4 sm:$0xff]   ;;  %v336_v54 = vld [vmem:[%s1846_s20 + $0x38] sm:$0xff] }
  0x22   : > { %850 = vmatpush1.bf16.msra.mxu0 %v1554_v22  ;;  %923 = vmatpush1.bf16.msra.mxu1 %v1555_v23  ;;  %v370_v18 = vsub.f32 %v342_v5, %v1875_v58  ;;  %v372_v19 = vsub.f32 %v344_v6, %v1875_v58  ;;  %v1604_v22 = vld [vmem:[%s2107_s3 + $0x124] ss:$16 sps:$4 sm:$0xff]  }
  0x23   : > { %851 = vmatprep.subr.bf16.mxu0 %v1556_v24  ;;  %924 = vmatprep.subr.bf16.mxu1 %v1558_v25  ;;  %v394_v9 = vmul.f32 %v1888_v63, %v366_v2  ;;  %v396_v10 = vmul.f32 %v1888_v63, %v368_v3  ;;  %v1606_v24 = vld [vmem:[%s2107_s3 + $0x12c] ss:$16 sps:$4 sm:$0xff]   ;;  %v333_v25 = vld [vmem:[%s1846_s20 + $0x20] sm:$0xff]  ;;  %v335_v53 = vld [vmem:[%s1846_s20 + $0x30] sm:$0xff]  ;;  %v352_v3 = vunpack.c.h.bf16 %v336_v54 }
  0x24   : > { %v350_v2 = vunpack.c.h.bf16 %v335_v53 }
  0x25   : > { %v410_v14 = vmax.f32 %v394_v9, 0.0  ;;  %v412_v15 = vmax.f32 %v396_v10, 0.0 }
  0x26   : > { %852 = vmatpush1.bf16.msra.mxu0 %v1560_v26  ;;  %925 = vmatpush1.bf16.msra.mxu1 %v1561_v27  ;;  %v334_v26 = vld [vmem:[%s1846_s20 + $0x28] sm:$0xff]  ;;  %v393_v27 = vmul.f32 %v1911_v13, %v365_v16  ;;  %v378_v10 = vsub.f32 %v350_v2, %v1875_v58  ;;  %v349_v16 = vunpack.c.l.bf16 %v335_v53  ;;  %s1423_s20 = sshll.u32 %s2119_s24, 2 }
  0x27   : > { %853 = vmatprep.subr.bf16.mxu0 %v1562_v28  ;;  %926 = vmatprep.subr.bf16.mxu1 %v1564_v29  ;;  %v426_v23 = vpack.c.bf16 %v412_v15, %v410_v14  ;;  %v341_v28 = vunpack.c.l.bf16 %v331_v59  ;;  %v395_v29 = vmul.f32 %v1911_v13, %v367_v17  ;;  %v351_v17 = vunpack.c.l.bf16 %v336_v54  ;;  %s1980_s12 = scalar_lea.vmem %s2109_s5, %s1423_s20  ;;  %s1985_s15 = scalar_lea.vmem %s2111_s7, %s1423_s20 }
  0x28   : > { %s2001_s17 = scalar_lea.vmem %s2110_s6, %s1423_s20 }
  0x29   : > { %871 = vmatprep.mubr.bf16.mxu0 %v426_v23  ;;  %944 = vmatprep.mubr.bf16.mxu1 %v426_v23  ;;  %v377_v23 = vsub.f32 %v349_v16, %v1891_v1 }
  0x2a   : > { %854 = vmatpush1.bf16.msra.mxu0 %v1566_v30  ;;  %927 = vmatpush1.bf16.msra.mxu1 %v1567_v31  ;;  %v398_v30 = vmul.f32 %v1888_v63, %v370_v18  ;;  %v400_v31 = vmul.f32 %v1888_v63, %v372_v19  ;;  %v406_v19 = vmul.f32 %v1888_v63, %v378_v10 }
  0x2b   : > { %855 = vmatprep.subr.bf16.mxu0 %v1568_v32  ;;  %928 = vmatprep.subr.bf16.mxu1 %v1570_v33  ;;  %v343_v32 = vunpack.c.l.bf16 %v1879_v60  ;;  %v1608_v33 = vld [vmem:[%s2107_s3 + $0x120] ss:$16 sps:$4 sm:$0xff]  }
  0x2e   : > { %856 = vmatpush2.bf16.msra.mxu0 %v1572_v34  ;;  %929 = vmatpush2.bf16.msra.mxu1 %v1573_v35  ;;  %v1609_v34 = vld [vmem:[%s2107_s3 + $0x128] ss:$16 sps:$4 sm:$0xff]   ;;  %v346_v35 = vunpack.c.h.bf16 %v333_v25 }
  0x2f   : > { %857 = vmatprep.subr.bf16.mxu0 %v1574_v37  ;;  %930 = vmatprep.subr.bf16.mxu1 %v1576_v38  ;;  %v348_v37 = vunpack.c.h.bf16 %v334_v26  ;;  %v1610_v38 = vld [vmem:[%s2107_s3 + $0x104] ss:$16 sps:$4 sm:$0xff]  }
  0x30   : > { %v374_v50 = vsub.f32 %v346_v35, %v1875_v58  ;;  %v497_v35 = vld [vmem:[%s2108_s4] sm:$0xf] }
  0x31   : > { %v376_v52 = vsub.f32 %v348_v37, %v1875_v58  ;;  %v513_v37 = vsub.s32 3, %v1825_v40 }
  0x32   : > { %858 = vmatpush2.bf16.msra.mxu0 %v1578_v39  ;;  %931 = vmatpush2.bf16.msra.mxu1 %v1579_v41  ;;  %v1612_v39 = vld [vmem:[%s2107_s3 + $0x10c] ss:$16 sps:$4 sm:$0xff]   ;;  %v409_v41 = vmax.f32 %v393_v27, 0.0  ;;  %v405_v27 = vmul.f32 %v1911_v13, %v377_v23 }
  0x33   : > { %859 = vmatprep.subr.bf16.mxu0 %v1580_v42  ;;  %932 = vmatprep.subr.bf16.mxu1 %v1582_v43  ;;  %v369_v42 = vsub.f32 %v341_v28, %v1891_v1  ;;  %v411_v43 = vmax.f32 %v395_v29, 0.0  ;;  %v404_v0 = vmul.f32 %v1888_v63, %v376_v52 }
  0x35   : > { %v397_v55 = vmul.f32 %v1911_v13, %v369_v42  ;;  %v425_v57 = vpack.c.bf16 %v411_v43, %v409_v41  ;;  %v420_v9 = vmax.f32 %v404_v0, 0.0  ;;  %v1642_v41 = vmov 1966171168  }
  0x36   : > { %860 = vmatpush2.bf16.msra.mxu0 %v1584_v44  ;;  %933 = vmatpush2.bf16.msra.mxu1 %v1585_v45  ;;  %v414_v44 = vmax.f32 %v398_v30, 0.0  ;;  %v416_v45 = vmax.f32 %v400_v31, 0.0  ;;  %v1056_v42 = vunpack.c.l.s4 %v1642_v41  ;;  %v2012_v43 = vrot.slane %v497_v35, %v1862_v51 }
  0x37   : > { %861 = vmatprep.subr.bf16.mxu0 %v1586_v46  ;;  %934 = vmatprep.subr.bf16.mxu1 %v1588_v48  ;;  %v371_v46 = vsub.f32 %v343_v32, %v1891_v1  ;;  %v1614_v48 = vld [vmem:[%s2107_s3 + $0x100] ss:$16 sps:$4 sm:$0xff]   ;;  %v413_v5 = vmax.f32 %v397_v55, 0.0  ;;  %v1641_v32 = vmov -inf  }
  0x38   : > { %v428_v59 = vpack.c.bf16 %v416_v45, %v414_v44  ;;  %995 = vst.msk [vmem:[%s1985_s15] sm:$0xf] %vm1988_vm0, %v1641_v32  ;;  %v2017_v45 = vrot.slane %v497_v35, %v1852_v47  ;;  %v1057_v55 = vunpack.c.0.s8 %v1056_v42 }
  0x39   : > { %v399_v60 = vmul.f32 %v1911_v13, %v371_v46 }
  0x3a   : > { %862 = vmatpush2.bf16.msra.mxu0 %v1590_v49  ;;  %935 = vmatpush2.bf16.msra.mxu1 %v1591_v56  ;;  %v1615_v49 = vld [vmem:[%s2107_s3 + $0x108] ss:$16 sps:$4 sm:$0xff]   ;;  %v345_v56 = vunpack.c.l.bf16 %v333_v25 }
  0x3b   : > { %863 = vmatprep.subr.bf16.mxu0 %v1592_v61  ;;  %936 = vmatprep.subr.bf16.mxu1 %v1594_v62  ;;  %v347_v61 = vunpack.c.l.bf16 %v334_v26  ;;  %v402_v62 = vmul.f32 %v1888_v63, %v374_v50  ;;  %v415_v6 = vmax.f32 %v399_v60, 0.0 }
  0x3c   : > { %v373_v4 = vsub.f32 %v345_v56, %v1891_v1 }
  0x3d   : > { %v427_v14 = vpack.c.bf16 %v415_v6, %v413_v5  ;;  %v2031_v6 = vsub.s32 %v1057_v55, %v1825_v40 }
  0x3e   : > { %864 = vmatpush2.bf16.msra.mxu0 %v1596_v7  ;;  %937 = vmatpush2.bf16.msra.mxu1 %v1597_v8  ;;  %v375_v7 = vsub.f32 %v347_v61, %v1891_v1  ;;  %v418_v8 = vmax.f32 %v402_v62, 0.0 }
  0x3f   : > { %865 = vmatprep.subr.bf16.mxu0 %v1598_v11  ;;  %938 = vmatprep.subr.bf16.mxu1 %v1600_v12  ;;  %v380_v11 = vsub.f32 %v352_v3, %v1875_v58  ;;  %v401_v12 = vmul.f32 %v1911_v13, %v373_v4  ;;  %v379_v58 = vsub.f32 %v351_v17, %v1891_v1 }
  0x40   : > { %v403_v15 = vmul.f32 %v1911_v13, %v375_v7  ;;  %v430_v18 = vpack.c.bf16 %v420_v9, %v418_v8 }
  0x41   : > { %v407_v28 = vmul.f32 %v1911_v13, %v379_v58  ;;  %v1640_v13 = vmov 0.0  }
  0x42   : > { %866 = vmatpush2.bf16.msra.mxu0 %v1602_v20  ;;  %939 = vmatpush2.bf16.msra.mxu1 %v1603_v21  ;;  %v408_v20 = vmul.f32 %v1888_v63, %v380_v11  ;;  %v417_v21 = vmax.f32 %v401_v12, 0.0  ;;  %v421_v63 = vmax.f32 %v405_v27, 0.0  ;;  %993 = vst.msk [vmem:[%s1980_s12] sm:$0xf] %vm1988_vm0, %v1640_v13  ;;  %994 = vst.msk [vmem:[%s2001_s17] sm:$0xf] %vm1988_vm0, %v1640_v13 }
  0x43   : > { %867 = vmatprep.subr.bf16.mxu0 %v1604_v22  ;;  %940 = vmatprep.subr.bf16.mxu1 %v1606_v24  ;;  %v419_v22 = vmax.f32 %v403_v15, 0.0  ;;  %v422_v24 = vmax.f32 %v406_v19, 0.0  ;;  %v423_v30 = vmax.f32 %v407_v28, 0.0 }
  0x44   : > { %v424_v25 = vmax.f32 %v408_v20, 0.0 }
  0x45   : > { %v429_v26 = vpack.c.bf16 %v419_v22, %v417_v21  ;;  %v431_v31 = vpack.c.bf16 %v423_v30, %v421_v63 }
  0x46   : > { %868 = vmatpush2.bf16.msra.mxu0 %v1608_v33  ;;  %941 = vmatpush2.bf16.msra.mxu1 %v1609_v34  ;;  %v432_v29 = vpack.c.bf16 %v424_v25, %v422_v24  ;;  %v509_v33 = vsub.s32 2, %v1825_v40 }
  0x47   : > { %869 = vmatprep.subr.bf16.mxu0 %v1610_v38  ;;  %942 = vmatprep.subr.bf16.mxu1 %v1612_v39 }
  0x48   : > { %v2014_v44 = vrot.slane %v497_v35, %v509_v33 }
  0x4a   : > { %870 = vmatpush2.bf16.msra.mxu0 %v1614_v48  ;;  %943 = vmatpush2.bf16.msra.mxu1 %v1615_v49  ;;  %v2019_v49 = vrot.slane %v497_v35, %v513_v37 }
  0x4d   : > { %872 = vmatmul.mubr.bf16.vlgmr.msra.gmra.mxu0 %v425_v57  ;;  %945 = vmatmul.mubr.bf16.vlgmr.msra.gmra.mxu1 %v425_v57 }
  0x4e   : > { %881 = vmatprep.mubr.bf16.mxu0 %v428_v59  ;;  %954 = vmatprep.mubr.bf16.mxu1 %v428_v59 }
  0x55   : > { %882 = vmatmul.mubr.bf16.gmra.mxu0 %v427_v14  ;;  %955 = vmatmul.mubr.bf16.gmra.mxu1 %v427_v14 }
  0x56   : > { %891 = vmatprep.mubr.bf16.mxu0 %v430_v18  ;;  %964 = vmatprep.mubr.bf16.mxu1 %v430_v18 }
  0x5d   : > { %892 = vmatmul.mubr.bf16.gmra.mxu0 %v429_v26  ;;  %965 = vmatmul.mubr.bf16.gmra.mxu1 %v429_v26 }
  0x5e   : > { %901 = vmatprep.mubr.bf16.mxu0 %v432_v29  ;;  %974 = vmatprep.mubr.bf16.mxu1 %v432_v29 }
  0x65   : > { %902 = vmatmul.mubr.bf16.gmra.mxu0 %v431_v31  ;;  %975 = vmatmul.mubr.bf16.gmra.mxu1 %v431_v31 }
 0x10d   : > { %v873_v36 = vpop.f32.mrf.mxu0  ;;  %v946_v34 = vpop.f32.mrf.mxu1 }
 0x10e   : > { %v874_v56 = vadd.f32 %v873_v36, %v2012_v43  ;;  %v947_v51 = vadd.f32 %v946_v34, %v2014_v44 }
 0x10f   : > { %v875_v38 = vpop.f32.mrf.mxu0  ;;  %v948_v39 = vpop.f32.mrf.mxu1 }
 0x110   : > { %v876_v57 = vadd.f32 %v875_v38, %v2017_v45  ;;  %v949_v60 = vadd.f32 %v948_v39, %v2019_v49  ;;  %v1085_v7 = vmul.f32 %v874_v56, %v874_v56  ;;  %v1087_v8 = vmul.f32 %v947_v51, %v947_v51 }
 0x111   : > { %v877_v46 = vpop.f32.mrf.mxu0  ;;  %v950_v48 = vpop.f32.mrf.mxu1 }
 0x112   : > { %v878_v50 = vadd.f32 %v877_v46, %v2012_v43  ;;  %v951_v54 = vadd.f32 %v950_v48, %v2014_v44  ;;  %v1086_v9 = vmul.f32 %v876_v57, %v876_v57  ;;  %v1088_v14 = vmul.f32 %v949_v60, %v949_v60 }
 0x113   : > { %v879_v52 = vpop.f32.mrf.mxu0  ;;  %v952_v53 = vpop.f32.mrf.mxu1 }
 0x114   : > { %v1089_v61 = vmul.f32 %v878_v50, %v878_v50  ;;  %v880_v62 = vadd.f32 %v879_v52, %v2017_v45  ;;  %v953_v0 = vadd.f32 %v952_v53, %v2019_v49  ;;  %v1091_v4 = vmul.f32 %v951_v54, %v951_v54 }
 0x115   : > { %v883_v59 = vpop.f32.mrf.mxu0  ;;  %v956_v47 = vpop.f32.mrf.mxu1  ;;  %v997_v15 = vadd.f32 %v878_v50, %v874_v56  ;;  %v1201_v16 = vmax.f32 %v874_v56, %v878_v50  ;;  %v1023_v17 = vadd.f32 %v951_v54, %v947_v51  ;;  %v1227_v19 = vmax.f32 %v947_v51, %v951_v54 }
 0x116   : > { %v884_v5 = vadd.f32 %v883_v59, %v2012_v43  ;;  %v957_v10 = vadd.f32 %v956_v47, %v2014_v44  ;;  %v1117_v18 = vadd.f32 %v1089_v61, %v1085_v7  ;;  %v1090_v20 = vmul.f32 %v880_v62, %v880_v62 }
 0x117   : > { %v885_v2 = vpop.f32.mrf.mxu0  ;;  %v958_v3 = vpop.f32.mrf.mxu1  ;;  %v1092_v21 = vmul.f32 %v953_v0, %v953_v0  ;;  %v1143_v58 = vadd.f32 %v1091_v4, %v1087_v8  ;;  %v1010_v26 = vadd.f32 %v880_v62, %v876_v57  ;;  %v1214_v27 = vmax.f32 %v876_v57, %v880_v62 }
 0x118   : > { %v1093_v40 = vmul.f32 %v884_v5, %v884_v5  ;;  %v886_v24 = vadd.f32 %v885_v2, %v2017_v45  ;;  %v959_v25 = vadd.f32 %v958_v3, %v2019_v49  ;;  %v1095_v28 = vmul.f32 %v957_v10, %v957_v10 }
 0x119   : > { %v887_v11 = vpop.f32.mrf.mxu0  ;;  %v960_v12 = vpop.f32.mrf.mxu1  ;;  %v1036_v31 = vadd.f32 %v953_v0, %v949_v60  ;;  %v1240_v13 = vmax.f32 %v949_v60, %v953_v0  ;;  %v998_v32 = vadd.f32 %v997_v15, %v884_v5  ;;  %v1130_v33 = vadd.f32 %v1090_v20, %v1086_v9 }
 0x11a   : > { %v888_v29 = vadd.f32 %v887_v11, %v2012_v43  ;;  %v961_v36 = vadd.f32 %v960_v12, %v2014_v44  ;;  %v1156_v34 = vadd.f32 %v1092_v21, %v1088_v14  ;;  %v1202_v35 = vmax.f32 %v1201_v16, %v884_v5 }
 0x11b   : > { %v889_v22 = vpop.f32.mrf.mxu0  ;;  %v962_v23 = vpop.f32.mrf.mxu1  ;;  %v1024_v37 = vadd.f32 %v1023_v17, %v957_v10  ;;  %v1118_v41 = vadd.f32 %v1117_v18, %v1093_v40  ;;  %v1228_v42 = vmax.f32 %v1227_v19, %v957_v10  ;;  %v1094_v46 = vmul.f32 %v886_v24, %v886_v24 }
 0x11c   : > { %v1096_v48 = vmul.f32 %v959_v25, %v959_v25  ;;  %v1144_v50 = vadd.f32 %v1143_v58, %v1095_v28  ;;  %v1011_v52 = vadd.f32 %v1010_v26, %v886_v24  ;;  %v1097_v53 = vmul.f32 %v888_v29, %v888_v29 }
 0x11d   : > { %v893_v63 = vpop.f32.mrf.mxu0  ;;  %v966_v30 = vpop.f32.mrf.mxu1  ;;  %v890_v54 = vadd.f32 %v889_v22, %v2017_v45  ;;  %v1215_v51 = vmax.f32 %v1214_v27, %v886_v24  ;;  %v1037_v57 = vadd.f32 %v1036_v31, %v959_v25  ;;  %v1099_v59 = vmul.f32 %v961_v36, %v961_v36 }
 0x11e   : > { %v2040_v47 = vadd.f32 %v962_v23, %v2019_v49  ;;  %v2042_v60 = vmax.f32 %v1240_v13, %v959_v25  ;;  %v999_v61 = vadd.f32 %v998_v32, %v888_v29  ;;  %v894_v62 = vadd.f32 %v893_v63, %v2012_v43 }
 0x11f   : > { %v895_v38 = vpop.f32.mrf.mxu0  ;;  %v968_v39 = vpop.f32.mrf.mxu1  ;;  %v967_v0 = vadd.f32 %v966_v30, %v2014_v44  ;;  %v1131_v4 = vadd.f32 %v1130_v33, %v1094_v46  ;;  %v1157_v5 = vadd.f32 %v1156_v34, %v1096_v48  ;;  %v1203_v7 = vmax.f32 %v1202_v35, %v888_v29 }
 0x120   : > { %v1025_v8 = vadd.f32 %v1024_v37, %v961_v36  ;;  %v1119_v9 = vadd.f32 %v1118_v41, %v1097_v53  ;;  %v1229_v10 = vmax.f32 %v1228_v42, %v961_v36  ;;  %v1098_v11 = vmul.f32 %v890_v54, %v890_v54 }
 0x121   : > { %v897_v55 = vpop.f32.mrf.mxu0  ;;  %v970_v56 = vpop.f32.mrf.mxu1  ;;  %v896_v12 = vadd.f32 %v895_v38, %v2017_v45  ;;  %v1145_v16 = vadd.f32 %v1144_v50, %v1099_v59  ;;  %v1012_v17 = vadd.f32 %v1011_v52, %v890_v54  ;;  %v1216_v18 = vmax.f32 %v1215_v51, %v890_v54 }
 0x122   : > { %v1100_v19 = vmul.f32 %v2040_v47, %v2040_v47  ;;  %v1038_v20 = vadd.f32 %v1037_v57, %v2040_v47  ;;  %v1101_v21 = vmul.f32 %v894_v62, %v894_v62  ;;  %v1103_v22 = vmul.f32 %v967_v0, %v967_v0 }
 0x123   : > { %v899_v2 = vpop.f32.mrf.mxu0  ;;  %v972_v3 = vpop.f32.mrf.mxu1  ;;  %v898_v23 = vadd.f32 %v897_v55, %v2012_v43  ;;  %v1242_v58 = vmax.f32 %v2042_v60, %v2040_v47  ;;  %v1000_v40 = vadd.f32 %v999_v61, %v894_v62  ;;  %v969_v24 = vadd.f32 %v968_v39, %v2019_v49 }
 0x124   : > { %v971_v25 = vadd.f32 %v970_v56, %v2014_v44  ;;  %v1132_v28 = vadd.f32 %v1131_v4, %v1098_v11  ;;  %v1204_v29 = vmax.f32 %v1203_v7, %v894_v62  ;;  %v1026_v63 = vadd.f32 %v1025_v8, %v967_v0 }
 0x125   : > { %v903_v14 = vpop.f32.mrf.mxu0  ;;  %v976_v15 = vpop.f32.mrf.mxu1  ;;  %v1102_v30 = vmul.f32 %v896_v12, %v896_v12  ;;  %v1158_v31 = vadd.f32 %v1157_v5, %v1100_v19  ;;  %v1230_v13 = vmax.f32 %v1229_v10, %v967_v0  ;;  %v1120_v33 = vadd.f32 %v1119_v9, %v1101_v21 }
 0x126   : > { %v904_v32 = vadd.f32 %v903_v14, %v2012_v43  ;;  %v977_v36 = vadd.f32 %v976_v15, %v2014_v44  ;;  %v1146_v34 = vadd.f32 %v1145_v16, %v1103_v22  ;;  %v1013_v35 = vadd.f32 %v1012_v17, %v896_v12 }
 0x127   : > { %v905_v26 = vpop.f32.mrf.mxu0  ;;  %v978_v27 = vpop.f32.mrf.mxu1  ;;  %v1105_v37 = vmul.f32 %v898_v23, %v898_v23  ;;  %v2057_v38 = vmax.f32 %v1216_v18, %v896_v12  ;;  %v1104_v39 = vmul.f32 %v969_v24, %v969_v24  ;;  %v1107_v41 = vmul.f32 %v971_v25, %v971_v25 }
 0x128   : > { %v2060_v42 = vadd.f32 %v899_v2, %v2017_v45  ;;  %v1133_v50 = vadd.f32 %v1132_v28, %v1102_v30  ;;  %v1001_v52 = vadd.f32 %v1000_v40, %v898_v23  ;;  %v1205_v53 = vmax.f32 %v1204_v29, %v898_v23 }
 0x129   : > { %v907_v46 = vpop.f32.mrf.mxu0  ;;  %v980_v48 = vpop.f32.mrf.mxu1  ;;  %v1027_v54 = vadd.f32 %v1026_v63, %v971_v25  ;;  %v1231_v55 = vmax.f32 %v1230_v13, %v971_v25  ;;  %v1109_v56 = vmul.f32 %v904_v32, %v904_v32  ;;  %v1111_v51 = vmul.f32 %v977_v36, %v977_v36 }
 0x12a   : > { %v906_v57 = vadd.f32 %v905_v26, %v2017_v45  ;;  %v1121_v59 = vadd.f32 %v1120_v33, %v1105_v37  ;;  %v1002_v47 = vadd.f32 %v1001_v52, %v904_v32  ;;  %v908_v60 = vadd.f32 %v907_v46, %v2012_v43 }
 0x12b   : > { %v981_v61 = vadd.f32 %v980_v48, %v2014_v44  ;;  %v1147_v62 = vadd.f32 %v1146_v34, %v1107_v41  ;;  %v1014_v0 = vadd.f32 %v1013_v35, %v2060_v42  ;;  %v1106_v2 = vmul.f32 %v2060_v42, %v2060_v42  ;;  %v909_v10 = vpop.f32.mrf.mxu0  ;;  %v982_v41 = vpop.f32.mrf.mxu1 }
 0x12c   : > { %v973_v4 = vadd.f32 %v972_v3, %v2019_v49  ;;  %v1206_v5 = vmax.f32 %v1205_v53, %v904_v32  ;;  %v1028_v7 = vadd.f32 %v1027_v54, %v977_v36  ;;  %v1232_v8 = vmax.f32 %v1231_v55, %v977_v36 }
 0x12d   : > { %v1003_v9 = vadd.f32 %v1002_v47, %v908_v60  ;;  %v1122_v11 = vadd.f32 %v1121_v59, %v1109_v56  ;;  %v1148_v12 = vadd.f32 %v1147_v62, %v1111_v51  ;;  %v1015_v14 = vadd.f32 %v1014_v0, %v906_v57 }
 0x12e   : > { %v1113_v15 = vmul.f32 %v908_v60, %v908_v60  ;;  %v1110_v43 = vmul.f32 %v906_v57, %v906_v57  ;;  %v1207_v16 = vmax.f32 %v1206_v5, %v908_v60  ;;  %v1029_v44 = vadd.f32 %v1028_v7, %v981_v61 }
 0x12f   : > { %v1115_v17 = vmul.f32 %v981_v61, %v981_v61  ;;  %v1004_v18 = vrot.slane %v1003_v9, 4  ;;  %v1233_v21 = vmax.f32 %v1232_v8, %v981_v61  ;;  %v910_v22 = vadd.f32 %v909_v10, %v2017_v45 }
 0x130   : > { %v1123_v19 = vadd.f32 %v1122_v11, %v1113_v15  ;;  %v1039_v23 = vadd.f32 %v1038_v20, %v969_v24  ;;  %v1243_v3 = vmax.f32 %v1242_v58, %v969_v24  ;;  %v1134_v40 = vadd.f32 %v1133_v50, %v1106_v2 }
 0x131   : > { %v1149_v25 = vadd.f32 %v1148_v12, %v1115_v17  ;;  %v1108_v26 = vmul.f32 %v973_v4, %v973_v4  ;;  %v979_v28 = vadd.f32 %v978_v27, %v2019_v49  ;;  %v1016_v63 = vadd.f32 %v1015_v14, %v910_v22 }
 0x132   : > { %v1124_v29 = vrot.slane %v1123_v19, 4  ;;  %v1135_v30 = vadd.f32 %v1134_v40, %v1110_v43  ;;  %v1208_v13 = vrot.slane %v1207_v16, 4  ;;  %v1030_v32 = vrot.slane %v1029_v44, 4 }
 0x133   : > { %v1114_v36 = vmul.f32 %v910_v22, %v910_v22  ;;  %v1159_v33 = vadd.f32 %v1158_v31, %v1104_v39  ;;  %v1005_v34 = vadd.f32 %v1004_v18, %v1003_v9  ;;  %v1234_v35 = vrot.slane %v1233_v21, 4 }
 0x134   : > { %v1017_v37 = vrot.slane %v1016_v63, 4  ;;  %v1218_v45 = vmax.f32 %v2057_v38, %v2060_v42  ;;  %v1040_v20 = vadd.f32 %v1039_v23, %v973_v4  ;;  %v1150_v58 = vrot.slane %v1149_v25, 4 }
 0x135   : > { %v1136_v24 = vadd.f32 %v1135_v30, %v1114_v36  ;;  %v1244_v46 = vmax.f32 %v1243_v3, %v973_v4  ;;  %v1112_v48 = vmul.f32 %v979_v28, %v979_v28  ;;  %v1125_v27 = vadd.f32 %v1124_v29, %v1123_v19 }
 0x136   : > { %v1018_v50 = vadd.f32 %v1017_v37, %v1016_v63  ;;  %v1160_v52 = vadd.f32 %v1159_v33, %v1108_v26  ;;  %v1209_v53 = vmax.f32 %v1207_v16, %v1208_v13  ;;  %v1031_v54 = vadd.f32 %v1030_v32, %v1029_v44 }
 0x137   : > { %v1137_v55 = vrot.slane %v1136_v24, 4  ;;  %v1006_v56 = vrot.slane %v1005_v34, 2  ;;  %v1235_v31 = vmax.f32 %v1233_v21, %v1234_v35  ;;  %v983_v51 = vadd.f32 %v982_v41, %v2019_v49 }
 0x138   : > { %v1019_v39 = vrot.slane %v1018_v50, 2  ;;  %v1219_v59 = vmax.f32 %v1218_v45, %v906_v57  ;;  %v1041_v47 = vadd.f32 %v1040_v20, %v979_v28  ;;  %v1151_v38 = vadd.f32 %v1150_v58, %v1149_v25 }
 0x139   : > { %v1138_v42 = vadd.f32 %v1137_v55, %v1136_v24  ;;  %v1161_v60 = vadd.f32 %v1160_v52, %v1112_v48  ;;  %v1245_v61 = vmax.f32 %v1244_v46, %v979_v28  ;;  %v1126_v62 = vrot.slane %v1125_v27, 2 }
 0x13a   : > { %v1020_v0 = vadd.f32 %v1019_v39, %v1018_v50  ;;  %v1210_v2 = vrot.slane %v1209_v53, 2  ;;  %v1032_v4 = vrot.slane %v1031_v54, 2  ;;  %v1220_v7 = vmax.f32 %v1219_v59, %v910_v22 }
 0x13b   : > { %v1139_v5 = vrot.slane %v1138_v42, 2  ;;  %v1007_v8 = vadd.f32 %v1006_v56, %v1005_v34  ;;  %v1236_v9 = vrot.slane %v1235_v31, 2  ;;  %v1042_v10 = vadd.f32 %v1041_v47, %v983_v51 }
 0x13c   : > { %v1116_v11 = vmul.f32 %v983_v51, %v983_v51  ;;  %v1152_v12 = vrot.slane %v1151_v38, 2  ;;  %v1221_v15 = vrot.slane %v1220_v7, 4  ;;  %v1246_v49 = vmax.f32 %v1245_v61, %v983_v51 }
 0x13d   : > { %v1140_v14 = vadd.f32 %v1139_v5, %v1138_v42  ;;  %v1127_v57 = vadd.f32 %v1126_v62, %v1125_v27  ;;  %v1021_v43 = vrot.slane %v1020_v0, 1  ;;  %v1043_v16 = vrot.slane %v1042_v10, 4 }
 0x13e   : > { %v1162_v44 = vadd.f32 %v1161_v60, %v1116_v11  ;;  %v1211_v17 = vmax.f32 %v1209_v53, %v1210_v2  ;;  %v1033_v18 = vadd.f32 %v1032_v4, %v1031_v54  ;;  %v1222_v19 = vmax.f32 %v1220_v7, %v1221_v15 }
 0x13f   : > { %v1247_v21 = vrot.slane %v1246_v49, 4  ;;  %v1008_v23 = vrot.slane %v1007_v8, 1  ;;  %v1141_v3 = vrot.slane %v1140_v14, 1  ;;  %v1044_v40 = vadd.f32 %v1043_v16, %v1042_v10 }
 0x140   : > { %v1163_v22 = vrot.slane %v1162_v44, 4  ;;  %v1153_v25 = vadd.f32 %v1152_v12, %v1151_v38  ;;  %v1237_v26 = vmax.f32 %v1235_v31, %v1236_v9  ;;  %v1223_v28 = vrot.slane %v1222_v19, 2  ;;  %v996_v12 = vld [vmem:[%s1980_s12] sm:$0xf] }
 0x141   : > { %v1248_v29 = vmax.f32 %v1246_v49, %v1247_v21  ;;  %v1128_v63 = vrot.slane %v1127_v57, 1  ;;  %v1022_v30 = vadd.f32 %v1021_v43, %v1020_v0  ;;  %v1045_v13 = vrot.slane %v1044_v40, 2  ;;  %v1084_v43 = vld [vmem:[%s2001_s17] sm:$0xf] }
 0x142   : > { %v1164_v32 = vadd.f32 %v1163_v22, %v1162_v44  ;;  %v1212_v36 = vrot.slane %v1211_v17, 1  ;;  %v1034_v33 = vrot.slane %v1033_v18, 1  ;;  %v1224_v34 = vmax.f32 %v1222_v19, %v1223_v28 }
 0x143   : > { %v1249_v35 = vrot.slane %v1248_v29, 2  ;;  %v1009_v37 = vadd.f32 %v1008_v23, %v1007_v8  ;;  %v1142_v45 = vadd.f32 %v1141_v3, %v1140_v14  ;;  %v1046_v20 = vadd.f32 %v1045_v13, %v1044_v40 }
 0x144   : > { %v1165_v58 = vrot.slane %v1164_v32, 2  ;;  %v1154_v24 = vrot.slane %v1153_v25, 1  ;;  %v1238_v41 = vrot.slane %v1237_v26, 1  ;;  %v1225_v46 = vrot.slane %v1224_v34, 1 }
 0x145   : > { %v1250_v48 = vmax.f32 %v1248_v29, %v1249_v35  ;;  %v1129_v27 = vadd.f32 %v1128_v63, %v1127_v57  ;;  %v1053_v50 = vcombine.low %v1009_v37, %v1022_v30  ;;  %v1047_v52 = vrot.slane %v1046_v20, 1  ;;  %v1200_v57 = vld [vmem:[%s1985_s15] sm:$0xf] }
 0x146   : > { %v1166_v53 = vadd.f32 %v1165_v58, %v1164_v32  ;;  %v1213_v54 = vmax.f32 %v1211_v17, %v1212_v36  ;;  %v1226_v55 = vmax.f32 %v1224_v34, %v1225_v46  ;;  %v1035_v31 = vadd.f32 %v1034_v33, %v1033_v18 }
 0x147   : > { %v1251_v56 = vrot.slane %v1250_v48, 1  ;;  %v1173_v39 = vcombine.low %v1129_v27, %v1142_v45  ;;  %v1048_v51 = vadd.f32 %v1047_v52, %v1046_v20  ;;  %v1239_v47 = vmax.f32 %v1237_v26, %v1238_v41 }
 0x148   : > { %v1167_v59 = vrot.slane %v1166_v53, 1  ;;  %v1257_v38 = vcombine.low %v1213_v54, %v1226_v55  ;;  %v1155_v60 = vadd.f32 %v1154_v24, %v1153_v25  ;;  %v1061_v61 = vrot.slane %v1053_v50, %v2031_v6 }
 0x149   : > { %v1252_v42 = vmax.f32 %v1250_v48, %v1251_v56  ;;  %v1054_v62 = vcombine.low %v1035_v31, %v1048_v51  ;;  %v1181_v5 = vrot.slane %v1173_v39, %v2031_v6 }
 0x14a   : > { %v1168_v0 = vadd.f32 %v1167_v59, %v1166_v53  ;;  %v1265_v2 = vrot.slane %v1257_v38, %v2031_v6 }
 0x14b   : > { %v1258_v4 = vcombine.low %v1239_v47, %v1252_v42  ;;  %v1068_v7 = vrot.slane %v1054_v62, %v2031_v6 }
 0x14c   : > { %v1174_v8 = vcombine.low %v1155_v60, %v1168_v0 }
 0x14d   : > { %v1272_v9 = vrot.slane %v1258_v4, %v2031_v6  ;;  %v1069_v10 = vcombine.low %v1061_v61, %v1068_v7 }
 0x14e   : > { %v1188_v11 = vrot.slane %v1174_v8, %v2031_v6 }
 0x14f   : > { %v1273_v14 = vcombine.low %v1265_v2, %v1272_v9  ;;  %v1076_v15 = vrot.slane %v1069_v10, %v2031_v6 }
 0x150   : > { %v1189_v49 = vcombine.low %v1181_v5, %v1188_v11 }
 0x151   : > { %v1280_v16 = vrot.slane %v1273_v14, %v2031_v6  ;;  %v1078_v44 = vadd.f32 %v1076_v15, %v996_v12 }
 0x152   : > { %v1196_v17 = vrot.slane %v1189_v49, %v2031_v6 }
 0x153   : > { %v1282_v18 = vmax.f32 %v1200_v57, %v1280_v16  ;;  %1083 = vst.msk [vmem:[%s1980_s12] sm:$0xf] %vm1988_vm0, %v1078_v44 }
 0x154   : > { %v1198_v19 = vadd.f32 %v1196_v17, %v1084_v43 }
 0x155   : > { %1283 = vst.msk [vmem:[%s1985_s15] sm:$0xf] %vm1988_vm0, %v1282_v18 }
 0x156   : > { %1199 = vst.msk [vmem:[%s2001_s17] sm:$0xf] %vm1988_vm0, %v1198_v19 }
 0x157 PF: > { %s18_s26 = sadd.s32 1, %s1638_s26   ;;  %s2114_s24 = smov %s1634_s25 }
 0x158   : > { %p15_p5 = scmp.ge.s32.totalorder %s18_s26, 4   ;;  %s2115_s25 = smov %s2117_s27 }
 0x15a   :  { %17 = sbr.rel (!%p15_p5) target bundleno = 2 (0x2), region = 98 }

// kernel: point_trans_mlp_adj_forward.14
= control target key start
LH: loop header
LB: loop body
LE: loop exit
PB: predicated region body
PF: predicated region fallthrough
CT: control target
= control target key end

     0   :  { %s1085_s24 = smov 0   ;;  %s1087_s25 = smov 0   ;;  %s1188_s0 = inlined_call_operand.vmem [shape: f32[2,32,8], index: 0, kind: input, shape index: {}]   ;;  %s1189_s1 = inlined_call_operand.vmem [shape: bf16[2,1,64], index: 1, kind: input, shape index: {}]   ;;  %s1190_s2 = inlined_call_operand.vmem [shape: bf16[2,8,128], index: 2, kind: input, shape index: {}]   ;;  %s1191_s3 = inlined_call_operand.vmem [shape: bf16[2,64,128], index: 3, kind: input, shape index: {}]   ;;  %s1192_s4 = inlined_call_operand.vmem [shape: f32[2,1,128], index: 4, kind: input, shape index: {}]   ;;  %s1193_s5 = inlined_call_operand.vmem [shape: bf16[2,2,32,128], index: 5, kind: output, shape index: {0}]   ;;  %s1194_s6 = inlined_call_operand.vmem [shape: f32[2,2,1,128], index: 6, kind: output, shape index: {1}]   ;;  %s1195_s7 = inlined_call_operand.vmem [shape: f32[2,2,1,128], index: 7, kind: output, shape index: {2}]  }
   0x1   :  { %s1089_s26 = smov 0   ;;  %s1091_s27 = smov 0  }
   0x2   :  { %s1093_s28 = smov 0  }
   0x3 LB: > { %s33_s29 = sadd.s32 1, %s1033_s26  ;;  %s37_s30 = sadd.s32 1, %s1037_s27  ;;  %s1041_s28 = sphi %s1093_s28, %s18_s28   ;;  %s1037_s27 = sphi %s1091_s27, %s1199_s27   ;;  %s1033_s26 = sphi %s1089_s26, %s1198_s26   ;;  %s1029_s25 = sphi %s1087_s25, %s1197_s25   ;;  %s1025_s24 = sphi %s1085_s24, %s1196_s24  }
   0x4   : > { %p35_p0 = scmp.ge.s32.totalorder %s33_s29, 2  ;;  %p888_p1 = scmp.ge.s32.totalorder %s1041_s28, 1 }
   0x5   : > { %p311_p2 = scmp.lt.s32.totalorder %s1041_s28, 5 }
   0x6   : > { %s1201_s29 = smov (%p35_p0, %s33_s29), 0  ;;  %s1203_s30 = smov (!%p35_p0, %s37_s30), %s1037_s27 }
   0x7   : > { %p312_p3 = pnand %p888_p1, %p311_p2  ;;  %p39_p4 = scmp.ge.s32.totalorder %s1203_s30, 2 }
   0x8   : > { %p385_p5 = scmp.lt.s32.totalorder (!%p312_p3), %s1029_s25, 1  ;;  %p394_p6 = scmp.lt.s32.totalorder (!%p312_p3), %s1025_s24, 1 }
   0x9   : > { %s1205_s30 = smov (%p39_p4, %s1203_s30), 0  ;;  %315 = sbr.rel (%p312_p3) target bundleno = 256 (0x100), region = 40 }
   0xe   : > { %v1043_v0 = vmov 0.0   ;;  %vm1044_vm0 = vmmov 0   ;;  %s1207_s25 = smov (!%p385_p5, %s1029_s25), 1  ;;  %vm533_vm1 = vcmask 1043456   ;;  %vm526_vm2 = vcmask 64512   ;;  %s1209_s24 = smov (!%p394_p6, %s1025_s24), 1 }
   0xf   : > { %938 = vmatprep.subr.bf16.mxu0 %v1043_v0  ;;  %946 = vmatprep.mubr.msk.bf16.mxu0 %vm1044_vm0, %v1043_v0  ;;  %s913_s8 = sshll.u32 %s1207_s25, 5  ;;  %s891_s9 = sshll.u32 %s1207_s25, 2  ;;  %vm478_vm3 = vcmask 523264   ;;  %v522_v14 = vlaneseq }
  0x10   : > { %s1125_s12 = scalar_lea.vmem %s1191_s3, %s913_s8  ;;  %s400_s15 = scalar_lea.vmem %s1190_s2, %s891_s9 }
  0x11   : > { %v999_v1 = vld [vmem:[%s1125_s12 + $0x18] sm:$0xff]   ;;  %s392_s18 = scalar_lea.vmem %s1188_s0, %s913_s8  ;;  %v444_v2 = vld [vmem:[%s400_s15] sm:$0xf]  ;;  %v1000_v4 = vld [vmem:[%s1125_s12 + $0x10] sm:$0xff]   ;;  %s897_s19 = sshll.u32 %s1207_s25, 1  ;;  %v523_v16 = vshrl.u32 %v522_v14, 7 }
  0x12   : > { %939 = vmatpush3.bf16.msra.mxu0 %v999_v1  ;;  %956 = vmatprep.subr.msk.bf16.mxu1 %vm533_vm1, %v444_v2  ;;  %v535_v3 = vsel %vm533_vm1, %v444_v2, 0  ;;  %v438_v5 = vld [vmem:[%s392_s18] sm:$0xff]  ;;  %v439_v6 = vld [vmem:[%s392_s18 + $0x8] sm:$0xff]  ;;  %v440_v8 = vld [vmem:[%s392_s18 + $0x10] sm:$0xff]  ;;  %s428_s20 = sadd.s32 %s897_s19, %s1209_s24  ;;  %s396_s14 = scalar_lea.vmem %s1189_s1, %s1209_s24 }
  0x13   : > { %951 = vmatpush3.bf16.msra.mxu1 %v535_v3  ;;  %940 = vmatprep.subr.bf16.mxu0 %v1043_v0  ;;  %v442_v7 = vpack.c.bf16 %v439_v6, %v438_v5  ;;  %v441_v9 = vld [vmem:[%s392_s18 + $0x18] sm:$0xff]  ;;  %s1145_s23 = scalar_lea.vmem %s1194_s6, %s428_s20  ;;  %v1001_v11 = vld [vmem:[%s1125_s12 + $0x8] sm:$0xff]   ;;  %s1151_s10 = scalar_lea.vmem %s1195_s7, %s428_s20  ;;  %v1002_v12 = vld [vmem:[%s1125_s12] sm:$0xff]   ;;  %v524_v18 = vsub.s32 0, %v523_v16 }
  0x14   : > { %v443_v10 = vpack.c.bf16 %v441_v9, %v440_v8  ;;  %621 = vst [vmem:[%s1145_s23] sm:$0x1] %v1043_v0  ;;  %622 = vst [vmem:[%s1151_s10] sm:$0x1] %v1043_v0  ;;  %v445_v13 = vld [vmem:[%s396_s14] sm:$0x1]  ;;  %s894_s15 = sshll.u32 %s1209_s24, 2  ;;  %s895_s16 = sshll.u32 %s1207_s25, 3 }
  0x15   : > { %952 = vmatprep.mubr.msk.bf16.mxu1 %vm526_vm2, %v442_v7  ;;  %s408_s12 = scalar_lea.vmem %s1192_s4, %s1207_s25  ;;  %s419_s19 = sadd.s32 %s895_s16, %s894_s15 }
  0x16   : > { %941 = vmatpush3.bf16.msra.mxu0 %v1000_v4  ;;  %953 = vmatmul.mubr.msk.bf16.vlgmr.msra.gmra.mxu1 %vm526_vm2, %v443_v10  ;;  %v906_v23 = vld [vmem:[%s408_s12] ss:$0 sm:$0xff]  ;;  %s896_s20 = sshll.u32 %s419_s19, 2 }
  0x17   : > { %942 = vmatprep.subr.bf16.mxu0 %v1043_v0  ;;  %s421_s25 = scalar_lea.vmem %s1193_s5, %s896_s20 }
  0x1a   : > { %943 = vmatpush3.bf16.msra.mxu0 %v1001_v11 }
  0x1b   : > { %944 = vmatprep.subr.bf16.mxu0 %v1043_v0  ;;  %v623_v55 = vld [vmem:[%s1145_s23] sm:$0x1] }
  0x1c   : > { %v635_v59 = vld [vmem:[%s1151_s10] sm:$0x1] }
  0x1e   : > { %945 = vmatpush3.bf16.msra.mxu0 %v1002_v12 }
  0x21   : > { %947 = vmatmul.mubr.msk.bf16.vlgmr.msra.gmra.mxu0 %vm478_vm3, %v445_v13 }
  0xd6   : > { %v954_v15 = vpop.f32.mrf.mxu1 }
  0xd8   : > { %v571_v17 = vpop.f32.mrf.mxu1 }
  0xda   : > { %v955_v19 = vpop.f32.mrf.mxu1 }
  0xdc   : > { %v574_v22 = vpop.f32.mrf.mxu1 }
  0xe1   : > { %v516_v20 = vpop.f32.mrf.mxu0 }
  0xe2   : > { %v525_v21 = vrot.slane %v516_v20, %v524_v18 }
  0xe3   : > { %v948_v24 = vpop.f32.mrf.mxu0 }
  0xe4   : > { %v572_v25 = vadd.f32 %v571_v17, %v525_v21  ;;  %v580_v26 = vadd.f32 %v954_v15, %v525_v21  ;;  %v575_v27 = vadd.f32 %v574_v22, %v525_v21  ;;  %v583_v28 = vadd.f32 %v955_v19, %v525_v21 }
  0xe5   : > { %v519_v29 = vpop.f32.mrf.mxu0 }
  0xe6   : > { %v593_v30 = vadd.f32 %v906_v23, %v572_v25  ;;  %v594_v31 = vadd.f32 %v906_v23, %v575_v27  ;;  %v595_v32 = vadd.f32 %v906_v23, %v580_v26  ;;  %v596_v33 = vadd.f32 %v906_v23, %v583_v28 }
  0xe7   : > { %v949_v34 = vpop.f32.mrf.mxu0 }
  0xe8   : > { %v922_v35 = vpack.c.bf16 %v594_v31, %v593_v30  ;;  %v927_v36 = vpack.c.bf16 %v596_v33, %v595_v32  ;;  %v624_v37 = vadd.f32 %v594_v31, %v593_v30  ;;  %v636_v38 = vmul.f32 %v593_v30, %v593_v30 }
  0xe9   : > { %v637_v39 = vmul.f32 %v594_v31, %v594_v31  ;;  %v638_v41 = vmul.f32 %v595_v32, %v595_v32  ;;  %v639_v44 = vmul.f32 %v596_v33, %v596_v33 }
  0xea   : > { %923 = vst [vmem:[%s421_s25] sm:$0xff] %v922_v35   ;;  %929 = vst [vmem:[%s421_s25 + $0x8] sm:$0xff] %v927_v36   ;;  %v625_v40 = vadd.f32 %v624_v37, %v595_v32 }
  0xeb   : > { %v640_v42 = vadd.f32 %v637_v39, %v636_v38 }
  0xec   : > { %v626_v43 = vadd.f32 %v625_v40, %v596_v33 }
  0xed   : > { %v641_v45 = vadd.f32 %v640_v42, %v638_v41 }
  0xee   : > { %v627_v46 = vrot.slane %v626_v43, 4 }
  0xef   : > { %v642_v47 = vadd.f32 %v641_v45, %v639_v44 }
  0xf0   : > { %v628_v48 = vadd.f32 %v627_v46, %v626_v43 }
  0xf1   : > { %v643_v49 = vrot.slane %v642_v47, 4 }
  0xf2   : > { %v629_v50 = vrot.slane %v628_v48, 2 }
  0xf3   : > { %v644_v51 = vadd.f32 %v643_v49, %v642_v47 }
  0xf4   : > { %v630_v52 = vadd.f32 %v629_v50, %v628_v48 }
  0xf5   : > { %v645_v53 = vrot.slane %v644_v51, 2 }
  0xf6   : > { %v631_v54 = vrot.slane %v630_v52, 1 }
  0xf7   : > { %v646_v56 = vadd.f32 %v645_v53, %v644_v51 }
  0xf8   : > { %v632_v57 = vadd.f32 %v631_v54, %v630_v52 }
  0xf9   : > { %v647_v58 = vrot.slane %v646_v56, 1 }
  0xfa   : > { %v633_v60 = vadd.f32 %v632_v57, %v623_v55 }
  0xfb   : > { %v648_v61 = vadd.f32 %v647_v58, %v646_v56 }
  0xfc   : > { %634 = vst [vmem:[%s1145_s23] sm:$0x1] %v633_v60 }
  0xfd   : > { %v649_v62 = vadd.f32 %v648_v61, %v635_v59 }
  0xff   : > { %650 = vst [vmem:[%s1151_s10] sm:$0x1] %v649_v62 }
 0x100 PF: > { %s18_s28 = sadd.s32 1, %s1041_s28   ;;  %s1196_s24 = smov %s1033_s26 }
 0x101   : > { %p15_p7 = scmp.ge.s32.totalorder %s18_s28, 6   ;;  %s1197_s25 = smov %s1037_s27 }
 0x102   : > { %s1198_s26 = smov %s1201_s29  ;;  %s1199_s27 = smov %s1205_s30 }
 0x103   :  { %17 = sbr.rel (!%p15_p7) target bundleno = 3 (0x3), region = 110 }

// kernel: point_trans_mlp_adj_forward.13
= control target key start
LH: loop header
LB: loop body
LE: loop exit
PB: predicated region body
PF: predicated region fallthrough
CT: control target
= control target key end

     0   :  { %v36_v36 = vlaneseq  ;;  %v1245_v41 = vmov 1983009808   ;;  %vm612_vm0 = vcmask 1041408   ;;  %vm1247_vm1 = vmmov 0   ;;  %s1599_s3 = inlined_call_operand.vmem [shape: bf16[512,256], index: 3, kind: input, shape index: {}]   ;;  %s1600_s1 = inlined_call_operand.vmem [shape: f32[1,512], index: 1, kind: input, shape index: {}]   ;;  %s1601_s2 = inlined_call_operand.vmem [shape: f32[1,512], index: 2, kind: input, shape index: {}]   ;;  %s1602_s0 = inlined_call_operand.vmem [shape: f32[2,512], index: 0, kind: input, shape index: {}]   ;;  %s1603_s5 = inlined_call_operand.vmem [shape: bf16[256,128], index: 5, kind: input, shape index: {}]   ;;  %s1604_s4 = inlined_call_operand.vmem [shape: f32[1,256], index: 4, kind: input, shape index: {}]   ;;  %s1605_s7 = inlined_call_operand.vmem [shape: bf16[128,64], index: 7, kind: input, shape index: {}]   ;;  %s1606_s6 = inlined_call_operand.vmem [shape: f32[1,128], index: 6, kind: input, shape index: {}]   ;;  %s1607_s8 = inlined_call_operand.vmem [shape: f32[1,64], index: 8, kind: input, shape index: {}]   ;;  %s1608_s9 = inlined_call_operand.vmem [shape: f32[2,64], index: 9, kind: output, shape index: {}]  }
   0x1   :  { %v1119_v0 = vld [vmem:[%s1599_s3 + $0x74] ss:$8 sps:$4 sm:$0xff]   ;;  %v1123_v2 = vld [vmem:[%s1599_s3 + $0x70] ss:$8 sps:$4 sm:$0xff]   ;;  %v1125_v4 = vld [vmem:[%s1599_s3 + $0x64] ss:$8 sps:$4 sm:$0xff]   ;;  %v55_v42 = vunpack.c.l.s4 %v1245_v41 }
   0x2   :  { %v1121_v1 = vld [vmem:[%s1599_s3 + $0x174] ss:$8 sps:$4 sm:$0xff]   ;;  %530 = vmatprep.subr.bf16.mxu0 %v1119_v0  ;;  %v1124_v3 = vld [vmem:[%s1599_s3 + $0x170] ss:$8 sps:$4 sm:$0xff]   ;;  %v1127_v5 = vld [vmem:[%s1599_s3 + $0x164] ss:$8 sps:$4 sm:$0xff]  }
   0x3   :  { %571 = vmatprep.subr.bf16.mxu1 %v1121_v1  ;;  %531 = vmatpush1.bf16.msra.mxu0 %v1123_v2  ;;  %v1129_v6 = vld [vmem:[%s1599_s3 + $0x60] ss:$8 sps:$4 sm:$0xff]   ;;  %v1131_v8 = vld [vmem:[%s1599_s3 + $0x54] ss:$8 sps:$4 sm:$0xff]   ;;  %v1135_v10 = vld [vmem:[%s1599_s3 + $0x50] ss:$8 sps:$4 sm:$0xff]   ;;  %v56_v49 = vunpack.c.0.s8 %v55_v42 }
   0x4   :  { %572 = vmatpush1.bf16.msra.mxu1 %v1124_v3  ;;  %532 = vmatprep.subr.bf16.mxu0 %v1125_v4  ;;  %v1130_v7 = vld [vmem:[%s1599_s3 + $0x160] ss:$8 sps:$4 sm:$0xff]   ;;  %v1133_v9 = vld [vmem:[%s1599_s3 + $0x154] ss:$8 sps:$4 sm:$0xff]   ;;  %v1136_v11 = vld [vmem:[%s1599_s3 + $0x150] ss:$8 sps:$4 sm:$0xff]  }
   0x5   :  { %573 = vmatprep.subr.bf16.mxu1 %v1127_v5  ;;  %v1137_v12 = vld [vmem:[%s1599_s3 + $0x44] ss:$8 sps:$4 sm:$0xff]   ;;  %v1141_v14 = vld [vmem:[%s1599_s3 + $0x40] ss:$8 sps:$4 sm:$0xff]   ;;  %v1143_v16 = vld [vmem:[%s1599_s3 + $0x34] ss:$8 sps:$4 sm:$0xff]  }
   0x6   :  { %v1139_v13 = vld [vmem:[%s1599_s3 + $0x144] ss:$8 sps:$4 sm:$0xff]   ;;  %v1142_v15 = vld [vmem:[%s1599_s3 + $0x140] ss:$8 sps:$4 sm:$0xff]   ;;  %v1145_v17 = vld [vmem:[%s1599_s3 + $0x134] ss:$8 sps:$4 sm:$0xff]  }
   0x7   :  { %533 = vmatpush1.bf16.msra.mxu0 %v1129_v6  ;;  %v1147_v18 = vld [vmem:[%s1599_s3 + $0x30] ss:$8 sps:$4 sm:$0xff]   ;;  %v1149_v20 = vld [vmem:[%s1599_s3 + $0x24] ss:$8 sps:$4 sm:$0xff]   ;;  %v1153_v22 = vld [vmem:[%s1599_s3 + $0x20] ss:$8 sps:$4 sm:$0xff]  }
   0x8   :  { %574 = vmatpush1.bf16.msra.mxu1 %v1130_v7  ;;  %534 = vmatprep.subr.bf16.mxu0 %v1131_v8  ;;  %v1148_v19 = vld [vmem:[%s1599_s3 + $0x130] ss:$8 sps:$4 sm:$0xff]   ;;  %v1151_v21 = vld [vmem:[%s1599_s3 + $0x124] ss:$8 sps:$4 sm:$0xff]   ;;  %v1154_v23 = vld [vmem:[%s1599_s3 + $0x120] ss:$8 sps:$4 sm:$0xff]  }
   0x9   :  { %575 = vmatprep.subr.bf16.mxu1 %v1133_v9  ;;  %v1155_v24 = vld [vmem:[%s1599_s3 + $0x14] ss:$8 sps:$4 sm:$0xff]   ;;  %v1159_v26 = vld [vmem:[%s1599_s3 + $0x10] ss:$8 sps:$4 sm:$0xff]   ;;  %v1161_v28 = vld [vmem:[%s1599_s3 + $0x4] ss:$8 sps:$4 sm:$0xff]  }
   0xa   :  { %v1157_v25 = vld [vmem:[%s1599_s3 + $0x114] ss:$8 sps:$4 sm:$0xff]   ;;  %v1160_v27 = vld [vmem:[%s1599_s3 + $0x110] ss:$8 sps:$4 sm:$0xff]   ;;  %v1163_v29 = vld [vmem:[%s1599_s3 + $0x104] ss:$8 sps:$4 sm:$0xff]  }
   0xb   :  { %535 = vmatpush1.bf16.msra.mxu0 %v1135_v10  ;;  %v1165_v30 = vld [vmem:[%s1599_s3] ss:$8 sps:$4 sm:$0xff]   ;;  %v1167_v32 = vld [vmem:[%s1599_s3 + $0xf4] ss:$8 sps:$4 sm:$0xff]   ;;  %v1171_v34 = vld [vmem:[%s1599_s3 + $0xf0] ss:$8 sps:$4 sm:$0xff]  }
   0xc   :  { %576 = vmatpush1.bf16.msra.mxu1 %v1136_v11  ;;  %536 = vmatprep.subr.bf16.mxu0 %v1137_v12  ;;  %v1166_v31 = vld [vmem:[%s1599_s3 + $0x100] ss:$8 sps:$4 sm:$0xff]   ;;  %v1169_v33 = vld [vmem:[%s1599_s3 + $0x1f4] ss:$8 sps:$4 sm:$0xff]   ;;  %v1172_v35 = vld [vmem:[%s1599_s3 + $0x1f0] ss:$8 sps:$4 sm:$0xff]  }
   0xd   :  { %577 = vmatprep.subr.bf16.mxu1 %v1139_v13  ;;  %v1173_v37 = vld [vmem:[%s1599_s3 + $0xe4] ss:$8 sps:$4 sm:$0xff]   ;;  %v1177_v39 = vld [vmem:[%s1599_s3 + $0xe0] ss:$8 sps:$4 sm:$0xff]   ;;  %v37_v40 = vshrl.u32 %v36_v36, 7  ;;  %v1215_v42 = vld [vmem:[%s1603_s5 + $0x78] sm:$0xff]  }
   0xe   :  { %v1175_v38 = vld [vmem:[%s1599_s3 + $0x1e4] ss:$8 sps:$4 sm:$0xff]   ;;  %v1178_v43 = vld [vmem:[%s1599_s3 + $0x1e0] ss:$8 sps:$4 sm:$0xff]   ;;  %v1179_v44 = vld [vmem:[%s1599_s3 + $0xd4] ss:$8 sps:$4 sm:$0xff]  }
   0xf   :  { %537 = vmatpush1.bf16.msra.mxu0 %v1141_v14  ;;  %v1181_v45 = vld [vmem:[%s1599_s3 + $0x1d4] ss:$8 sps:$4 sm:$0xff]   ;;  %v1183_v46 = vld [vmem:[%s1599_s3 + $0xd0] ss:$8 sps:$4 sm:$0xff]   ;;  %v1430_v48 = vsub.s32 0, %v37_v40  ;;  %v1435_v51 = vsub.s32 1, %v37_v40  ;;  %v59_v56 = vsub.s32 %v56_v49, %v37_v40 }
  0x10   :  { %578 = vmatpush1.bf16.msra.mxu1 %v1142_v15  ;;  %538 = vmatprep.subr.bf16.mxu0 %v1143_v16  ;;  %v1184_v47 = vld [vmem:[%s1599_s3 + $0x1d0] ss:$8 sps:$4 sm:$0xff]   ;;  %v1185_v50 = vld [vmem:[%s1599_s3 + $0xc4] ss:$8 sps:$4 sm:$0xff]   ;;  %v46_v52 = vsub.s32 2, %v37_v40  ;;  %v50_v54 = vsub.s32 3, %v37_v40 }
  0x11   :  { %579 = vmatprep.subr.bf16.mxu1 %v1145_v17  ;;  %v1187_v53 = vld [vmem:[%s1599_s3 + $0x1c4] ss:$8 sps:$4 sm:$0xff]   ;;  %v34_v55 = vld [vmem:[%s1600_s1] sm:$0xf]  ;;  %v1191_v63 = vld [vmem:[%s1599_s3 + $0xb4] ss:$8 sps:$4 sm:$0xff]  }
  0x12   :  { %v71_v57 = vld [vmem:[%s1601_s2] sm:$0xf]  ;;  %v39_v60 = vrot.slane %v34_v55, %v1430_v48  ;;  %v43_v61 = vrot.slane %v34_v55, %v1435_v51  ;;  %v47_v62 = vrot.slane %v34_v55, %v46_v52  ;;  %v1193_v0 = vld [vmem:[%s1599_s3 + $0x1b4] ss:$8 sps:$4 sm:$0xff]   ;;  %v51_v1 = vrot.slane %v34_v55, %v50_v54  ;;  %v1195_v9 = vld [vmem:[%s1599_s3 + $0xb0] ss:$8 sps:$4 sm:$0xff]  }
  0x13   :  { %539 = vmatpush1.bf16.msra.mxu0 %v1147_v18  ;;  %v1189_v58 = vld [vmem:[%s1599_s3 + $0xc0] ss:$8 sps:$4 sm:$0xff]   ;;  %v76_v2 = vrot.slane %v71_v57, %v1430_v48  ;;  %v80_v3 = vrot.slane %v71_v57, %v1435_v51  ;;  %v84_v5 = vrot.slane %v71_v57, %v46_v52  ;;  %v88_v6 = vrot.slane %v71_v57, %v50_v54  ;;  %v1196_v10 = vld [vmem:[%s1599_s3 + $0x1b0] ss:$8 sps:$4 sm:$0xff]   ;;  %v1197_v13 = vld [vmem:[%s1599_s3 + $0xa4] ss:$8 sps:$4 sm:$0xff]  }
  0x14   :  { %580 = vmatpush1.bf16.msra.mxu1 %v1148_v19  ;;  %540 = vmatprep.subr.bf16.mxu0 %v1149_v20  ;;  %v1190_v59 = vld [vmem:[%s1599_s3 + $0x1c0] ss:$8 sps:$4 sm:$0xff]   ;;  %v52_v4 = vcombine.low %v39_v60, %v43_v61  ;;  %v53_v7 = vcombine.low %v47_v62, %v51_v1  ;;  %v1199_v14 = vld [vmem:[%s1599_s3 + $0x1a4] ss:$8 sps:$4 sm:$0xff]   ;;  %v1223_v52 = vld [vmem:[%s1603_s5 + $0x58] sm:$0xff]   ;;  %vm969_vm2 = vcmask 517120  }
  0x15   :  { %581 = vmatprep.subr.bf16.mxu1 %v1151_v21  ;;  %v89_v8 = vcombine.low %v76_v2, %v80_v3  ;;  %v90_v12 = vcombine.low %v84_v5, %v88_v6  ;;  %v33_v17 = vld [vmem:[%s1602_s0] sm:$0xff]  ;;  %v1225_v54 = vld [vmem:[%s1603_s5 + $0x50] sm:$0xff]   ;;  %v1228_v57 = vld [vmem:[%s1603_s5 + $0x8] sm:$0xff]  }
  0x16   :  { %v60_v11 = vrot.slane %v52_v4, %v59_v56  ;;  %v67_v15 = vrot.slane %v53_v7, %v59_v56  ;;  %v1201_v20 = vld [vmem:[%s1599_s3 + $0xa0] ss:$8 sps:$4 sm:$0xff]   ;;  %v1226_v55 = vld [vmem:[%s1603_s5 + $0x10] sm:$0xff]  }
  0x17   :  { %541 = vmatpush1.bf16.msra.mxu0 %v1153_v22  ;;  %v97_v16 = vrot.slane %v89_v8, %v59_v56  ;;  %v104_v18 = vrot.slane %v90_v12, %v59_v56  ;;  %v1202_v21 = vld [vmem:[%s1599_s3 + $0x1a0] ss:$8 sps:$4 sm:$0xff]  }
  0x18   :  { %582 = vmatpush1.bf16.msra.mxu1 %v1154_v23  ;;  %542 = vmatprep.subr.bf16.mxu0 %v1155_v24  ;;  %v68_v19 = vcombine.low %v60_v11, %v67_v15  ;;  %v1203_v23 = vld [vmem:[%s1599_s3 + $0x94] ss:$8 sps:$4 sm:$0xff]   ;;  %v1214_v36 = vld [vmem:[%s1599_s3 + $0x180] ss:$8 sps:$4 sm:$0xff]  }
  0x19   :  { %583 = vmatprep.subr.bf16.mxu1 %v1157_v25  ;;  %v105_v22 = vcombine.low %v97_v16, %v104_v18  ;;  %v1205_v24 = vld [vmem:[%s1599_s3 + $0x194] ss:$8 sps:$4 sm:$0xff]   ;;  %v1221_v49 = vld [vmem:[%s1603_s5 + $0x60] sm:$0xff]  }
  0x1a   :  { %v70_v25 = vsub.f32 %v33_v17, %v68_v19  ;;  %v198_v60 = vld [vmem:[%s1604_s4] sm:$0x3] }
  0x1b   :  { %543 = vmatpush1.bf16.msra.mxu0 %v1159_v26  ;;  %v203_v61 = vrot.slane %v198_v60, %v1430_v48  ;;  %v207_v62 = vrot.slane %v198_v60, %v1435_v51  ;;  %v1233_v60 = vld [vmem:[%s1605_s7 + $0x28] sm:$0xff]  }
  0x1c   :  { %584 = vmatpush1.bf16.msra.mxu1 %v1160_v27  ;;  %544 = vmatprep.subr.bf16.mxu0 %v1161_v28  ;;  %v107_v26 = vmul.f32 %v105_v22, %v70_v25  ;;  %v1207_v27 = vld [vmem:[%s1599_s3 + $0x90] ss:$8 sps:$4 sm:$0xff]  }
  0x1d   :  { %585 = vmatprep.subr.bf16.mxu1 %v1163_v29  ;;  %v1208_v28 = vld [vmem:[%s1599_s3 + $0x190] ss:$8 sps:$4 sm:$0xff]   ;;  %v1209_v29 = vld [vmem:[%s1599_s3 + $0x84] ss:$8 sps:$4 sm:$0xff]  }
  0x1f   :  { %545 = vmatpush1.bf16.msra.mxu0 %v1165_v30  ;;  %v1211_v30 = vld [vmem:[%s1599_s3 + $0x184] ss:$8 sps:$4 sm:$0xff]  }
  0x20   :  { %586 = vmatpush1.bf16.msra.mxu1 %v1166_v31  ;;  %546 = vmatprep.subr.bf16.mxu0 %v1167_v32  ;;  %v116_v31 = vrot.slane %v107_v26, %v59_v56  ;;  %v109_v32 = vcombine.high %v107_v26, %v107_v26 }
  0x21   :  { %587 = vmatprep.subr.bf16.mxu1 %v1169_v33 }
  0x22   :  { %v124_v33 = vcombine.high %v116_v31, %v116_v31  ;;  %v130_v40 = vpack.c.bf16 %v116_v31, %v116_v31 }
  0x23   :  { %547 = vmatpush2.bf16.msra.mxu0 %v1171_v34  ;;  %v123_v34 = vrot.slane %v109_v32, %v59_v56  ;;  %v1227_v56 = vld [vmem:[%s1603_s5 + $0x48] sm:$0xff]  }
  0x24   :  { %588 = vmatpush2.bf16.msra.mxu1 %v1172_v35  ;;  %548 = vmatprep.subr.bf16.mxu0 %v1173_v37  ;;  %v1213_v35 = vld [vmem:[%s1599_s3 + $0x80] ss:$8 sps:$4 sm:$0xff]   ;;  %v131_v37 = vpack.c.bf16 %v124_v33, %v124_v33 }
  0x25   :  { %589 = vmatprep.subr.bf16.mxu1 %v1175_v38  ;;  %v125_v38 = vcombine.high %v123_v34, %v123_v34  ;;  %v132_v41 = vpack.c.bf16 %v123_v34, %v123_v34 }
  0x26   :  { %562 = vmatprep.mubr.bf16.mxu0 %v131_v37 }
  0x27   :  { %549 = vmatpush2.bf16.msra.mxu0 %v1177_v39  ;;  %v133_v39 = vpack.c.bf16 %v125_v38, %v125_v38 }
  0x28   :  { %590 = vmatpush2.bf16.msra.mxu1 %v1178_v43  ;;  %550 = vmatprep.subr.bf16.mxu0 %v1179_v44  ;;  %v1216_v43 = vld [vmem:[%s1603_s5 + $0x38] sm:$0xff]   ;;  %v1217_v44 = vld [vmem:[%s1603_s5 + $0x70] sm:$0xff]  }
  0x29   :  { %591 = vmatprep.subr.bf16.mxu1 %v1181_v45  ;;  %603 = vmatprep.mubr.bf16.mxu1 %v133_v39  ;;  %v1218_v45 = vld [vmem:[%s1603_s5 + $0x30] sm:$0xff]  }
  0x2b   :  { %551 = vmatpush2.bf16.msra.mxu0 %v1183_v46  ;;  %v1219_v46 = vld [vmem:[%s1603_s5 + $0x68] sm:$0xff]  }
  0x2c   :  { %592 = vmatpush2.bf16.msra.mxu1 %v1184_v47  ;;  %552 = vmatprep.subr.bf16.mxu0 %v1185_v50  ;;  %v1220_v47 = vld [vmem:[%s1603_s5 + $0x28] sm:$0xff]   ;;  %v1222_v50 = vld [vmem:[%s1603_s5 + $0x20] sm:$0xff]  }
  0x2d   :  { %593 = vmatprep.subr.bf16.mxu1 %v1187_v53  ;;  %v1224_v53 = vld [vmem:[%s1603_s5 + $0x18] sm:$0xff]  }
  0x2f   :  { %553 = vmatpush2.bf16.msra.mxu0 %v1189_v58  ;;  %v1229_v58 = vld [vmem:[%s1603_s5 + $0x40] sm:$0xff]  }
  0x30   :  { %594 = vmatpush2.bf16.msra.mxu1 %v1190_v59  ;;  %554 = vmatprep.subr.bf16.mxu0 %v1191_v63  ;;  %v1230_v59 = vld [vmem:[%s1603_s5] sm:$0xff]  }
  0x31   :  { %595 = vmatprep.subr.bf16.mxu1 %v1193_v0 }
  0x33   :  { %555 = vmatpush2.bf16.msra.mxu0 %v1195_v9 }
  0x34   :  { %596 = vmatpush2.bf16.msra.mxu1 %v1196_v10  ;;  %556 = vmatprep.subr.bf16.mxu0 %v1197_v13 }
  0x35   :  { %597 = vmatprep.subr.bf16.mxu1 %v1199_v14 }
  0x37   :  { %557 = vmatpush2.bf16.msra.mxu0 %v1201_v20 }
  0x38   :  { %598 = vmatpush2.bf16.msra.mxu1 %v1202_v21  ;;  %558 = vmatprep.subr.bf16.mxu0 %v1203_v23 }
  0x39   :  { %599 = vmatprep.subr.bf16.mxu1 %v1205_v24 }
  0x3b   :  { %559 = vmatpush2.bf16.msra.mxu0 %v1207_v27 }
  0x3c   :  { %600 = vmatpush2.bf16.msra.mxu1 %v1208_v28  ;;  %560 = vmatprep.subr.bf16.mxu0 %v1209_v29 }
  0x3d   :  { %601 = vmatprep.subr.bf16.mxu1 %v1211_v30 }
  0x3f   :  { %561 = vmatpush2.bf16.msra.mxu0 %v1213_v35 }
  0x40   :  { %602 = vmatpush2.bf16.msra.mxu1 %v1214_v36  ;;  %1065 = vmatprep.subr.bf16.mxu0 %v1215_v42 }
  0x42   :  { %563 = vmatmul.mubr.bf16.vlgmr.msra.gmra.mxu0 %v130_v40 }
  0x43   :  { %604 = vmatmul.mubr.bf16.vlgmr.msra.gmra.mxu1 %v132_v41  ;;  %1066 = vmatpush3.bf16.msra.mxu0 %v1216_v43 }
  0x44   :  { %1067 = vmatprep.subr.bf16.mxu0 %v1217_v44 }
  0x47   :  { %1068 = vmatpush3.bf16.msra.mxu0 %v1218_v45 }
  0x48   :  { %1069 = vmatprep.subr.bf16.mxu0 %v1219_v46 }
  0x4b   :  { %1070 = vmatpush3.bf16.msra.mxu0 %v1220_v47 }
  0x4c   :  { %1071 = vmatprep.subr.bf16.mxu0 %v1221_v49 }
  0x4f   :  { %1072 = vmatpush3.bf16.msra.mxu0 %v1222_v50 }
  0x50   :  { %1073 = vmatprep.subr.bf16.mxu0 %v1223_v52 }
  0x53   :  { %1074 = vmatpush3.bf16.msra.mxu0 %v1224_v53 }
  0x54   :  { %1075 = vmatprep.subr.bf16.mxu0 %v1225_v54 }
  0x57   :  { %1076 = vmatpush3.bf16.msra.mxu0 %v1226_v55 }
  0x58   :  { %1077 = vmatprep.subr.bf16.mxu0 %v1227_v56 }
  0x5b   :  { %1078 = vmatpush3.bf16.msra.mxu0 %v1228_v57  ;;  %v1231_v57 = vld [vmem:[%s1605_s7 + $0x38] sm:$0xff]  }
  0x5c   :  { %1079 = vmatprep.subr.bf16.mxu0 %v1229_v58  ;;  %v1246_v58 = vmov 0.0  }
  0x5d   :  { %1096 = vmatprep.subr.bf16.mxu1 %v1246_v58  ;;  %1112 = vmatprep.mubr.msk.bf16.mxu1 %vm1247_vm1, %v1246_v58 }
  0x5e   :  { %1097 = vmatpush3.bf16.msra.mxu1 %v1231_v57 }
  0x5f   :  { %1080 = vmatpush3.bf16.msra.mxu0 %v1230_v59  ;;  %1098 = vmatprep.subr.bf16.mxu1 %v1246_v58  ;;  %v1232_v59 = vld [vmem:[%s1605_s7 + $0x30] sm:$0xff]  }
  0x62   :  { %1099 = vmatpush3.bf16.msra.mxu1 %v1232_v59 }
  0x63   :  { %1100 = vmatprep.subr.bf16.mxu1 %v1246_v58 }
  0x66   :  { %1101 = vmatpush3.bf16.msra.mxu1 %v1233_v60 }
  0x67   :  { %1102 = vmatprep.subr.bf16.mxu1 %v1246_v58 }
 0x102   :  { %v564_v63 = vpop.f32.mrf.mxu0 }
 0x103   :  { %v605_v0 = vpop.f32.mrf.mxu1  ;;  %v565_v1 = vadd.f32 %v564_v63, %v203_v61  ;;  %v1234_v61 = vld [vmem:[%s1605_s7 + $0x20] sm:$0xff]   ;;  %v1236_v63 = vld [vmem:[%s1605_s7 + $0x10] sm:$0xff]  }
 0x104   :  { %v566_v2 = vpop.f32.mrf.mxu0  ;;  %1103 = vmatpush3.bf16.msra.mxu1 %v1234_v61 }
 0x105   :  { %v607_v3 = vpop.f32.mrf.mxu1  ;;  %v606_v4 = vadd.f32 %v605_v0, %v565_v1  ;;  %v567_v5 = vadd.f32 %v566_v2, %v207_v62  ;;  %1104 = vmatprep.subr.bf16.mxu1 %v1246_v58  ;;  %v1235_v62 = vld [vmem:[%s1605_s7 + $0x18] sm:$0xff]   ;;  %v1237_v0 = vld [vmem:[%s1605_s7 + $0x8] sm:$0xff]   ;;  %v1238_v1 = vld [vmem:[%s1605_s7] sm:$0xff]  }
 0x106   :  { %v568_v6 = vpop.f32.mrf.mxu0 }
 0x107   :  { %v609_v7 = vpop.f32.mrf.mxu1  ;;  %v613_v8 = vsel %vm612_vm0, %v606_v4, 0.0  ;;  %v608_v9 = vadd.f32 %v607_v3, %v567_v5  ;;  %v1039_v3 = vld [vmem:[%s1606_s6] ss:$0 sm:$0xff] }
 0x108   :  { %v614_v10 = vrot.slane %v613_v8, 4  ;;  %v569_v11 = vpop.f32.mrf.mxu0  ;;  %1105 = vmatpush3.bf16.msra.mxu1 %v1235_v62 }
 0x109   :  { %v610_v12 = vpop.f32.mrf.mxu1  ;;  %v620_v48 = vsel %vm612_vm0, %v608_v9, 0.0  ;;  %1106 = vmatprep.subr.bf16.mxu1 %v1246_v58 }
 0x10a   :  { %v615_v13 = vadd.f32 %v614_v10, %v613_v8  ;;  %v621_v51 = vrot.slane %v620_v48, 4 }
 0x10c   :  { %v616_v14 = vrot.slane %v615_v13, 2  ;;  %v622_v15 = vadd.f32 %v621_v51, %v620_v48  ;;  %1107 = vmatpush3.bf16.msra.mxu1 %v1236_v63 }
 0x10d   :  { %1108 = vmatprep.subr.bf16.mxu1 %v1246_v58 }
 0x10e   :  { %v617_v16 = vadd.f32 %v616_v14, %v615_v13  ;;  %v623_v17 = vrot.slane %v622_v15, 2 }
 0x110   :  { %v618_v18 = vrot.slane %v617_v16, 1  ;;  %v624_v19 = vadd.f32 %v623_v17, %v622_v15  ;;  %1109 = vmatpush3.bf16.msra.mxu1 %v1237_v0 }
 0x111   :  { %1110 = vmatprep.subr.bf16.mxu1 %v1246_v58 }
 0x112   :  { %v619_v20 = vadd.f32 %v618_v18, %v617_v16  ;;  %v625_v21 = vrot.slane %v624_v19, 1 }
 0x114   :  { %v628_v22 = vmul.f32 0.5, %v619_v20  ;;  %v626_v23 = vadd.f32 %v625_v21, %v624_v19  ;;  %1111 = vmatpush3.bf16.msra.mxu1 %v1238_v1 }
 0x116   :  { %v630_v24 = vsub.f32 %v606_v4, %v628_v22  ;;  %v629_v25 = vmul.f32 0.5, %v626_v23 }
 0x118   :  { %v632_v26 = vmul.f32 %v630_v24, %v630_v24  ;;  %v631_v27 = vsub.f32 %v608_v9, %v629_v25 }
 0x11a   :  { %v634_v28 = vsel %vm612_vm0, %v632_v26, 0.0  ;;  %v633_v29 = vmul.f32 %v631_v27, %v631_v27 }
 0x11b   :  { %v635_v30 = vrot.slane %v634_v28, 4 }
 0x11c   :  { %v641_v31 = vsel %vm612_vm0, %v633_v29, 0.0 }
 0x11d   :  { %v636_v32 = vadd.f32 %v635_v30, %v634_v28  ;;  %v642_v33 = vrot.slane %v641_v31, 4  ;;  %v1056_v30 = vld [vmem:[%s1607_s8] ss:$0 sm:$0xff] }
 0x11f   :  { %v637_v34 = vrot.slane %v636_v32, 2  ;;  %v643_v35 = vadd.f32 %v642_v33, %v641_v31 }
 0x121   :  { %v638_v36 = vadd.f32 %v637_v34, %v636_v32  ;;  %v644_v37 = vrot.slane %v643_v35, 2 }
 0x123   :  { %v639_v38 = vrot.slane %v638_v36, 1  ;;  %v645_v39 = vadd.f32 %v644_v37, %v643_v35 }
 0x125   :  { %v640_v40 = vadd.f32 %v639_v38, %v638_v36  ;;  %v646_v41 = vrot.slane %v645_v39, 1 }
 0x127   :  { %v648_v42 = vmul.f32 0.5, %v640_v40  ;;  %v647_v43 = vadd.f32 %v646_v41, %v645_v39 }
 0x129   :  { %v650_v44 = vadd.f32 1e-05, %v648_v42  ;;  %v649_v45 = vmul.f32 0.5, %v647_v43 }
 0x12b   :  { %1239 = vrsqrt.f32 %v650_v44  ;;  %v651_v46 = vadd.f32 1e-05, %v649_v45 }
 0x12d   :  { %1241 = vrsqrt.f32 %v651_v46 }
 0x138   :  { %v1240_v47 = vpop.eup %1239 }
 0x139   :  { %v654_v49 = vmul.f32 %v1240_v47, %v630_v24 }
 0x13a   :  { %v1242_v50 = vpop.eup %1241 }
 0x13b   :  { %v655_v52 = vmul.f32 %v1242_v50, %v631_v27  ;;  %v656_v53 = vmax.f32 %v654_v49, 0.0 }
 0x13d   :  { %v657_v54 = vmax.f32 %v655_v52, 0.0  ;;  %v658_v56 = vpack.c.bf16 %v656_v53, %v656_v53 }
 0x13f   :  { %v659_v55 = vpack.c.bf16 %v657_v54, %v657_v54 }
 0x141   :  { %827 = vmatprep.mubr.bf16.mxu0 %v659_v55 }
 0x142   :  { %828 = vmatmul.mubr.bf16.vlgmr.msra.gmra.mxu0 %v658_v56 }
 0x202   :  { %v1081_v2 = vpop.f32.mrf.mxu0 }
 0x204   :  { %v1082_v4 = vpop.f32.mrf.mxu0 }
 0x205   :  { %v1083_v5 = vadd.f32 %v1082_v4, %v1081_v2 }
 0x206   :  { %v1084_v6 = vpop.f32.mrf.mxu0 }
 0x207   :  { %v830_v7 = vadd.f32 %v1083_v5, %v1039_v3 }
 0x208   :  { %v1085_v8 = vpop.f32.mrf.mxu0 }
 0x209   :  { %v835_v9 = vsel %vm612_vm0, %v830_v7, 0.0 }
 0x20a   :  { %v836_v10 = vrot.slane %v835_v9, 4 }
 0x20c   :  { %v837_v11 = vadd.f32 %v836_v10, %v835_v9 }
 0x20e   :  { %v838_v12 = vrot.slane %v837_v11, 2 }
 0x210   :  { %v839_v48 = vadd.f32 %v838_v12, %v837_v11 }
 0x212   :  { %v840_v13 = vrot.slane %v839_v48, 1 }
 0x214   :  { %v841_v51 = vadd.f32 %v840_v13, %v839_v48 }
 0x216   :  { %v842_v14 = vmul.f32 0.5, %v841_v51 }
 0x218   :  { %v843_v15 = vsub.f32 %v830_v7, %v842_v14 }
 0x21a   :  { %v844_v16 = vmul.f32 %v843_v15, %v843_v15 }
 0x21c   :  { %v845_v17 = vsel %vm612_vm0, %v844_v16, 0.0 }
 0x21d   :  { %v846_v18 = vrot.slane %v845_v17, 4 }
 0x21f   :  { %v847_v19 = vadd.f32 %v846_v18, %v845_v17 }
 0x221   :  { %v848_v20 = vrot.slane %v847_v19, 2 }
 0x223   :  { %v849_v21 = vadd.f32 %v848_v20, %v847_v19 }
 0x225   :  { %v850_v22 = vrot.slane %v849_v21, 1 }
 0x227   :  { %v851_v23 = vadd.f32 %v850_v22, %v849_v21 }
 0x229   :  { %v852_v24 = vmul.f32 0.5, %v851_v23 }
 0x22b   :  { %v853_v25 = vadd.f32 1e-05, %v852_v24 }
 0x22d   :  { %1243 = vrsqrt.f32 %v853_v25 }
 0x23a   :  { %v1244_v26 = vpop.eup %1243 }
 0x23b   :  { %v855_v27 = vmul.f32 %v1244_v26, %v843_v15 }
 0x23d   :  { %v856_v28 = vmax.f32 %v855_v27, 0.0 }
 0x23f   :  { %v857_v29 = vpack.c.bf16 %v856_v28, %v856_v28 }
 0x241   :  { %1113 = vmatmul.mubr.bf16.vlgmr.msra.gmra.mxu1 %v857_v29 }
 0x301   :  { %v963_v31 = vpop.f32.mrf.mxu1 }
 0x302   :  { %v964_v32 = vadd.f32 %v1056_v30, %v963_v31 }
 0x303   :  { %v1114_v33 = vpop.f32.mrf.mxu1 }
 0x304   :  { %970 = vst.msk [vmem:[%s1608_s9] sm:$0x3] %vm969_vm2, %v964_v32 }
 0x305   :  { %v966_v34 = vpop.f32.mrf.mxu1 }
 0x307   :  { %v1115_v35 = vpop.f32.mrf.mxu1 }

// kernel: point_trans_mlp_adj_forward.15
= control target key start
LH: loop header
LB: loop body
LE: loop exit
PB: predicated region body
PF: predicated region fallthrough
CT: control target
= control target key end

     0   :  { %s1112_s24 = smov 0   ;;  %s1114_s25 = smov 0   ;;  %s1216_s0 = inlined_call_operand.vmem [shape: bf16[2,2,32,128], index: 0, kind: input, shape index: {}]   ;;  %s1217_s1 = inlined_call_operand.vmem [shape: f32[2,1,128], index: 1, kind: input, shape index: {}]   ;;  %s1218_s2 = inlined_call_operand.vmem [shape: f32[2,1,128], index: 2, kind: input, shape index: {}]   ;;  %s1219_s3 = inlined_call_operand.vmem [shape: bf16[2,128,128], index: 3, kind: input, shape index: {}]   ;;  %s1220_s4 = inlined_call_operand.vmem [shape: f32[2,1,128], index: 4, kind: input, shape index: {}]   ;;  %s1221_s5 = inlined_call_operand.vmem [shape: bf16[2,2,32,128], index: 5, kind: output, shape index: {0}]   ;;  %s1222_s6 = inlined_call_operand.vmem [shape: f32[2,2,1,128], index: 6, kind: output, shape index: {1}]   ;;  %s1223_s7 = inlined_call_operand.vmem [shape: f32[2,2,1,128], index: 7, kind: output, shape index: {2}]  }
   0x1   :  { %s1116_s26 = smov 0   ;;  %s1118_s27 = smov 0  }
   0x2   :  { %s1120_s28 = smov 0  }
   0x3 LB: > { %s33_s29 = sadd.s32 1, %s1061_s26  ;;  %s37_s30 = sadd.s32 1, %s1065_s27  ;;  %s1069_s28 = sphi %s1120_s28, %s18_s28   ;;  %s1065_s27 = sphi %s1118_s27, %s1227_s27   ;;  %s1061_s26 = sphi %s1116_s26, %s1226_s26   ;;  %s1057_s25 = sphi %s1114_s25, %s1225_s25   ;;  %s1053_s24 = sphi %s1112_s24, %s1224_s24  }
   0x4   : > { %p35_p0 = scmp.ge.s32.totalorder %s33_s29, 2  ;;  %p899_p1 = scmp.ge.s32.totalorder %s1069_s28, 1 }
   0x5   : > { %p316_p2 = scmp.lt.s32.totalorder %s1069_s28, 5 }
   0x6   : > { %s1229_s29 = smov (%p35_p0, %s33_s29), 0  ;;  %s1231_s30 = smov (!%p35_p0, %s37_s30), %s1065_s27 }
   0x7   : > { %p317_p3 = pnand %p899_p1, %p316_p2  ;;  %p39_p4 = scmp.ge.s32.totalorder %s1231_s30, 2 }
   0x8   : > { %p393_p5 = scmp.lt.s32.totalorder (!%p317_p3), %s1057_s25, 1  ;;  %p395_p6 = scmp.lt.s32.totalorder (!%p317_p3), %s1053_s24, 1 }
   0x9   : > { %s1233_s30 = smov (%p39_p4, %s1231_s30), 0  ;;  %320 = sbr.rel (%p317_p3) target bundleno = 274 (0x112), region = 40 }
   0xe   : > { %s1235_s25 = smov (!%p393_p5, %s1057_s25), 1  ;;  %s1237_s24 = smov (!%p395_p6, %s1053_s24), 1  ;;  %v1071_v3 = vmov 0.0  }
   0xf   : > { %s927_s8 = sshll.u32 %s1235_s25, 6  ;;  %s901_s9 = sshll.u32 %s1235_s25, 3 }
  0x10   : > { %s1149_s12 = scalar_lea.vmem %s1219_s3, %s927_s8  ;;  %s900_s13 = sshll.u32 %s1237_s24, 2 }
  0x11   : > { %v1023_v0 = vld [vmem:[%s1149_s12 + $0x38] sm:$0xff]   ;;  %s1152_s14 = sadd.s32 %s901_s9, %s900_s13  ;;  %v1024_v1 = vld [vmem:[%s1149_s12 + $0x30] sm:$0xff]   ;;  %s908_s16 = sshll.u32 %s1235_s25, 1  ;;  %v1025_v2 = vld [vmem:[%s1149_s12 + $0x28] sm:$0xff]  }
  0x12   : > { %962 = vmatprep.subr.bf16.mxu0 %v1023_v0  ;;  %s902_s15 = sshll.u32 %s1152_s14, 2  ;;  %s439_s17 = sadd.s32 %s908_s16, %s1237_s24  ;;  %v1026_v4 = vld [vmem:[%s1149_s12 + $0x20] sm:$0xff]   ;;  %v1027_v13 = vld [vmem:[%s1149_s12 + $0x18] sm:$0xff]   ;;  %v1028_v20 = vld [vmem:[%s1149_s12 + $0x10] sm:$0xff]  }
  0x13   : > { %963 = vmatpush3.bf16.msra.mxu0 %v1023_v0  ;;  %s1161_s20 = scalar_lea.vmem %s1222_s6, %s439_s17  ;;  %s1166_s23 = scalar_lea.vmem %s1223_s7, %s439_s17  ;;  %v1029_v24 = vld [vmem:[%s1149_s12 + $0x8] sm:$0xff]   ;;  %v1030_v27 = vld [vmem:[%s1149_s12] sm:$0xff]  }
  0x14   : > { %964 = vmatprep.subr.bf16.mxu0 %v1024_v1  ;;  %s404_s10 = scalar_lea.vmem %s1216_s0, %s902_s15  ;;  %s408_s13 = scalar_lea.vmem %s1217_s1, %s1235_s25  ;;  %629 = vst [vmem:[%s1161_s20] sm:$0x1] %v1071_v3  ;;  %630 = vst [vmem:[%s1166_s23] sm:$0x1] %v1071_v3 }
  0x15   : > { %s411_s17 = scalar_lea.vmem %s1218_s2, %s1235_s25  ;;  %v933_v5 = vld [vmem:[%s404_s10] sm:$0xff]   ;;  %v950_v10 = vld [vmem:[%s404_s10 + $0x8] sm:$0xff]   ;;  %s419_s22 = scalar_lea.vmem %s1220_s4, %s1235_s25 }
  0x16   : > { %v910_v6 = vld [vmem:[%s408_s13] ss:$0 sm:$0xff]  ;;  %v934_v7 = vunpack.c.l.bf16 %v933_v5  ;;  %v935_v8 = vunpack.c.h.bf16 %v933_v5  ;;  %v938_v16 = vunpack.c.l.bf16 %v950_v10  ;;  %v939_v17 = vunpack.c.h.bf16 %v950_v10  ;;  %s432_s9 = scalar_lea.vmem %s1221_s5, %s902_s15 }
  0x17   : > { %965 = vmatpush3.bf16.msra.mxu0 %v1024_v1  ;;  %v911_v9 = vld [vmem:[%s411_s17] ss:$0 sm:$0xff] }
  0x18   : > { %966 = vmatprep.subr.bf16.mxu0 %v1025_v2  ;;  %v464_v11 = vsub.f32 %v934_v7, %v910_v6  ;;  %v465_v12 = vsub.f32 %v935_v8, %v910_v6  ;;  %v466_v22 = vsub.f32 %v938_v16, %v910_v6  ;;  %v467_v23 = vsub.f32 %v939_v17, %v910_v6  ;;  %v912_v32 = vld [vmem:[%s419_s22] ss:$0 sm:$0xff] }
  0x1a   : > { %v475_v14 = vmul.f32 %v911_v9, %v464_v11  ;;  %v476_v15 = vmul.f32 %v911_v9, %v465_v12  ;;  %v477_v25 = vmul.f32 %v911_v9, %v466_v22  ;;  %v478_v26 = vmul.f32 %v911_v9, %v467_v23 }
  0x1b   : > { %967 = vmatpush3.bf16.msra.mxu0 %v1025_v2  ;;  %v631_v61 = vld [vmem:[%s1161_s20] sm:$0x1] }
  0x1c   : > { %968 = vmatprep.subr.bf16.mxu0 %v1026_v4  ;;  %v479_v18 = vmax.f32 %v475_v14, 0.0  ;;  %v480_v19 = vmax.f32 %v476_v15, 0.0  ;;  %v481_v28 = vmax.f32 %v477_v25, 0.0  ;;  %v482_v29 = vmax.f32 %v478_v26, 0.0  ;;  %v643_v0 = vld [vmem:[%s1166_s23] sm:$0x1] }
  0x1e   : > { %v483_v21 = vpack.c.bf16 %v480_v19, %v479_v18  ;;  %v484_v30 = vpack.c.bf16 %v482_v29, %v481_v28 }
  0x1f   : > { %969 = vmatpush3.bf16.msra.mxu0 %v1026_v4 }
  0x20   : > { %970 = vmatprep.subr.bf16.mxu0 %v1027_v13  ;;  %978 = vmatprep.mubr.bf16.mxu0 %v483_v21 }
  0x23   : > { %971 = vmatpush3.bf16.msra.mxu0 %v1027_v13 }
  0x24   : > { %972 = vmatprep.subr.bf16.mxu0 %v1028_v20 }
  0x27   : > { %973 = vmatpush3.bf16.msra.mxu0 %v1028_v20 }
  0x28   : > { %974 = vmatprep.subr.bf16.mxu0 %v1029_v24 }
  0x2b   : > { %975 = vmatpush3.bf16.msra.mxu0 %v1029_v24 }
  0x2c   : > { %976 = vmatprep.subr.bf16.mxu0 %v1030_v27 }
  0x2f   : > { %977 = vmatpush3.bf16.msra.mxu0 %v1030_v27 }
  0x32   : > { %979 = vmatmul.mubr.bf16.vlgmr.msra.gmra.mxu0 %v484_v30 }
  0xf2   : > { %v980_v31 = vpop.f32.mrf.mxu0 }
  0xf3   : > { %v599_v35 = vadd.f32 %v980_v31, %v912_v32 }
  0xf4   : > { %v590_v33 = vpop.f32.mrf.mxu0 }
  0xf5   : > { %v591_v36 = vadd.f32 %v912_v32, %v590_v33  ;;  %v646_v45 = vmul.f32 %v599_v35, %v599_v35 }
  0xf6   : > { %v981_v34 = vpop.f32.mrf.mxu0 }
  0xf7   : > { %v602_v37 = vadd.f32 %v981_v34, %v912_v32  ;;  %v644_v41 = vmul.f32 %v591_v36, %v591_v36 }
  0xf8   : > { %v593_v38 = vpop.f32.mrf.mxu0 }
  0xf9   : > { %v948_v39 = vpack.c.bf16 %v602_v37, %v599_v35  ;;  %v594_v40 = vadd.f32 %v912_v32, %v593_v38  ;;  %v647_v48 = vmul.f32 %v602_v37, %v602_v37 }
  0xfb   : > { %951 = vst [vmem:[%s432_s9 + $0x8] sm:$0xff] %v948_v39   ;;  %v943_v42 = vpack.c.bf16 %v594_v40, %v591_v36  ;;  %v632_v43 = vadd.f32 %v594_v40, %v591_v36  ;;  %v645_v44 = vmul.f32 %v594_v40, %v594_v40 }
  0xfd   : > { %944 = vst [vmem:[%s432_s9] sm:$0xff] %v943_v42   ;;  %v633_v46 = vadd.f32 %v632_v43, %v599_v35  ;;  %v648_v47 = vadd.f32 %v645_v44, %v644_v41 }
  0xff   : > { %v634_v49 = vadd.f32 %v633_v46, %v602_v37  ;;  %v649_v50 = vadd.f32 %v648_v47, %v646_v45 }
 0x101   : > { %v635_v51 = vrot.slane %v634_v49, 4  ;;  %v650_v52 = vadd.f32 %v649_v50, %v647_v48 }
 0x103   : > { %v636_v53 = vadd.f32 %v635_v51, %v634_v49  ;;  %v651_v54 = vrot.slane %v650_v52, 4 }
 0x105   : > { %v637_v55 = vrot.slane %v636_v53, 2  ;;  %v652_v56 = vadd.f32 %v651_v54, %v650_v52 }
 0x107   : > { %v638_v57 = vadd.f32 %v637_v55, %v636_v53  ;;  %v653_v58 = vrot.slane %v652_v56, 2 }
 0x109   : > { %v639_v59 = vrot.slane %v638_v57, 1  ;;  %v654_v60 = vadd.f32 %v653_v58, %v652_v56 }
 0x10b   : > { %v640_v62 = vadd.f32 %v639_v59, %v638_v57  ;;  %v655_v63 = vrot.slane %v654_v60, 1 }
 0x10d   : > { %v641_v1 = vadd.f32 %v640_v62, %v631_v61  ;;  %v656_v2 = vadd.f32 %v655_v63, %v654_v60 }
 0x10f   : > { %642 = vst [vmem:[%s1161_s20] sm:$0x1] %v641_v1  ;;  %v657_v3 = vadd.f32 %v656_v2, %v643_v0 }
 0x111   : > { %658 = vst [vmem:[%s1166_s23] sm:$0x1] %v657_v3 }
 0x112 PF: > { %s18_s28 = sadd.s32 1, %s1069_s28   ;;  %s1224_s24 = smov %s1061_s26 }
 0x113   : > { %p15_p7 = scmp.ge.s32.totalorder %s18_s28, 6   ;;  %s1225_s25 = smov %s1065_s27 }
 0x114   : > { %s1226_s26 = smov %s1229_s29  ;;  %s1227_s27 = smov %s1233_s30 }
 0x115   :  { %17 = sbr.rel (!%p15_p7) target bundleno = 3 (0x3), region = 110 }

// kernel: point_trans_mlp_adj_forward.17
= control target key start
LH: loop header
LB: loop body
LE: loop exit
PB: predicated region body
PF: predicated region fallthrough
CT: control target
= control target key end

     0   :  { %s868_s18 = smov 0   ;;  %s870_s19 = smov 0   ;;  %s952_s0 = inlined_call_operand.vmem [shape: bf16[2,2,32,128], index: 0, kind: input, shape index: {}]   ;;  %s953_s1 = inlined_call_operand.vmem [shape: f32[2,1,128], index: 1, kind: input, shape index: {}]   ;;  %s954_s2 = inlined_call_operand.vmem [shape: f32[2,1,128], index: 2, kind: input, shape index: {}]   ;;  %s955_s3 = inlined_call_operand.vmem [shape: bf16[2,128,128], index: 3, kind: input, shape index: {}]   ;;  %s956_s4 = inlined_call_operand.vmem [shape: f32[2,1,128], index: 4, kind: input, shape index: {}]   ;;  %s957_s5 = inlined_call_operand.vmem [shape: f32[2,2,32,128], index: 5, kind: output, shape index: {}]  }
   0x1   :  { %s872_s20 = smov 0   ;;  %s874_s21 = smov 0  }
   0x2   :  { %s876_s22 = smov 0  }
   0x3 LB: > { %s30_s23 = sadd.s32 1, %s828_s20  ;;  %s34_s24 = sadd.s32 1, %s832_s21  ;;  %s836_s22 = sphi %s876_s22, %s15_s22   ;;  %s832_s21 = sphi %s874_s21, %s961_s21   ;;  %s828_s20 = sphi %s872_s20, %s960_s20   ;;  %s824_s19 = sphi %s870_s19, %s959_s19   ;;  %s820_s18 = sphi %s868_s18, %s958_s18  }
   0x4   : > { %p32_p0 = scmp.ge.s32.totalorder %s30_s23, 2  ;;  %p680_p1 = scmp.ge.s32.totalorder %s836_s22, 1 }
   0x5   : > { %p257_p2 = scmp.lt.s32.totalorder %s836_s22, 5 }
   0x6   : > { %s963_s23 = smov (%p32_p0, %s30_s23), 0  ;;  %s965_s24 = smov (!%p32_p0, %s34_s24), %s832_s21 }
   0x7   : > { %p258_p3 = pnand %p680_p1, %p257_p2  ;;  %p36_p4 = scmp.ge.s32.totalorder %s965_s24, 2 }
   0x8   : > { %p316_p5 = scmp.lt.s32.totalorder (!%p258_p3), %s824_s19, 1  ;;  %p318_p6 = scmp.lt.s32.totalorder (!%p258_p3), %s820_s18, 1 }
   0x9   : > { %s967_s24 = smov (%p36_p4, %s965_s24), 0  ;;  %261 = sbr.rel (%p258_p3) target bundleno = 266 (0x10a), region = 40 }
   0xe   : > { %s969_s19 = smov (!%p316_p5, %s824_s19), 1  ;;  %s971_s18 = smov (!%p318_p6, %s820_s18), 1 }
   0xf   : > { %s702_s25 = sshll.u32 %s969_s19, 6  ;;  %s682_s26 = sshll.u32 %s969_s19, 3 }
  0x10   : > { %s905_s29 = scalar_lea.vmem %s955_s3, %s702_s25  ;;  %s681_s30 = sshll.u32 %s971_s18, 2 }
  0x11   : > { %v782_v0 = vld [vmem:[%s905_s29 + $0x38] sm:$0xff]   ;;  %s908_s6 = sadd.s32 %s682_s26, %s681_s30  ;;  %v783_v1 = vld [vmem:[%s905_s29 + $0x30] sm:$0xff]   ;;  %v784_v2 = vld [vmem:[%s905_s29 + $0x28] sm:$0xff]   ;;  %s331_s13 = scalar_lea.vmem %s953_s1, %s969_s19 }
  0x12   : > { %722 = vmatprep.subr.bf16.mxu0 %v782_v0  ;;  %s683_s7 = sshll.u32 %s908_s6, 2  ;;  %s334_s16 = scalar_lea.vmem %s954_s2, %s969_s19  ;;  %v785_v3 = vld [vmem:[%s905_s29 + $0x20] sm:$0xff]   ;;  %v786_v12 = vld [vmem:[%s905_s29 + $0x18] sm:$0xff]   ;;  %v787_v19 = vld [vmem:[%s905_s29 + $0x10] sm:$0xff]  }
  0x13   : > { %723 = vmatpush3.bf16.msra.mxu0 %v782_v0  ;;  %s327_s10 = scalar_lea.vmem %s952_s0, %s683_s7  ;;  %v689_v5 = vld [vmem:[%s331_s13] ss:$0 sm:$0xff]  ;;  %v788_v23 = vld [vmem:[%s905_s29 + $0x8] sm:$0xff]   ;;  %s342_s25 = scalar_lea.vmem %s956_s4, %s969_s19 }
  0x14   : > { %724 = vmatprep.subr.bf16.mxu0 %v783_v1  ;;  %v704_v4 = vld [vmem:[%s327_s10] sm:$0xff]   ;;  %v711_v9 = vld [vmem:[%s327_s10 + $0x8] sm:$0xff]   ;;  %s688_s26 = sshll.u32 %s908_s6, 3 }
  0x15   : > { %v705_v6 = vunpack.c.l.bf16 %v704_v4  ;;  %v706_v7 = vunpack.c.h.bf16 %v704_v4  ;;  %v690_v8 = vld [vmem:[%s334_s16] ss:$0 sm:$0xff]  ;;  %v709_v15 = vunpack.c.l.bf16 %v711_v9  ;;  %v710_v16 = vunpack.c.h.bf16 %v711_v9 }
  0x16   : > { %v789_v26 = vld [vmem:[%s905_s29] sm:$0xff]   ;;  %s355_s29 = scalar_lea.vmem %s957_s5, %s688_s26 }
  0x17   : > { %725 = vmatpush3.bf16.msra.mxu0 %v783_v1  ;;  %v373_v10 = vsub.f32 %v705_v6, %v689_v5  ;;  %v374_v11 = vsub.f32 %v706_v7, %v689_v5  ;;  %v375_v21 = vsub.f32 %v709_v15, %v689_v5  ;;  %v376_v22 = vsub.f32 %v710_v16, %v689_v5  ;;  %v691_v30 = vld [vmem:[%s342_s25] ss:$0 sm:$0xff] }
  0x18   : > { %726 = vmatprep.subr.bf16.mxu0 %v784_v2 }
  0x19   : > { %v384_v13 = vmul.f32 %v690_v8, %v373_v10  ;;  %v385_v14 = vmul.f32 %v690_v8, %v374_v11  ;;  %v386_v24 = vmul.f32 %v690_v8, %v375_v21  ;;  %v387_v25 = vmul.f32 %v690_v8, %v376_v22 }
  0x1b   : > { %727 = vmatpush3.bf16.msra.mxu0 %v784_v2  ;;  %v388_v17 = vmax.f32 %v384_v13, 0.0  ;;  %v389_v18 = vmax.f32 %v385_v14, 0.0  ;;  %v390_v27 = vmax.f32 %v386_v24, 0.0  ;;  %v391_v28 = vmax.f32 %v387_v25, 0.0 }
  0x1c   : > { %728 = vmatprep.subr.bf16.mxu0 %v785_v3 }
  0x1d   : > { %v392_v20 = vpack.c.bf16 %v389_v18, %v388_v17  ;;  %v393_v29 = vpack.c.bf16 %v391_v28, %v390_v27 }
  0x1f   : > { %729 = vmatpush3.bf16.msra.mxu0 %v785_v3  ;;  %738 = vmatprep.mubr.bf16.mxu0 %v392_v20 }
  0x20   : > { %730 = vmatprep.subr.bf16.mxu0 %v786_v12 }
  0x23   : > { %731 = vmatpush3.bf16.msra.mxu0 %v786_v12 }
  0x24   : > { %732 = vmatprep.subr.bf16.mxu0 %v787_v19 }
  0x27   : > { %733 = vmatpush3.bf16.msra.mxu0 %v787_v19 }
  0x28   : > { %734 = vmatprep.subr.bf16.mxu0 %v788_v23 }
  0x2b   : > { %735 = vmatpush3.bf16.msra.mxu0 %v788_v23 }
  0x2c   : > { %736 = vmatprep.subr.bf16.mxu0 %v789_v26 }
  0x2f   : > { %737 = vmatpush3.bf16.msra.mxu0 %v789_v26 }
  0x32   : > { %739 = vmatmul.mubr.bf16.vlgmr.msra.gmra.mxu0 %v393_v29 }
  0xf2   : > { %v740_v31 = vpop.f32.mrf.mxu0 }
  0xf3   : > { %v508_v32 = vadd.f32 %v740_v31, %v691_v30 }
  0xf4   : > { %v499_v33 = vpop.f32.mrf.mxu0 }
  0xf5   : > { %790 = vtanh.f32 %v508_v32  ;;  %v500_v34 = vadd.f32 %v691_v30, %v499_v33 }
  0xf6   : > { %v741_v35 = vpop.f32.mrf.mxu0 }
  0xf7   : > { %792 = vtanh.f32 %v500_v34  ;;  %v511_v36 = vadd.f32 %v741_v35, %v691_v30 }
  0xf8   : > { %v502_v37 = vpop.f32.mrf.mxu0 }
  0xf9   : > { %794 = vtanh.f32 %v511_v36  ;;  %v503_v38 = vadd.f32 %v691_v30, %v502_v37 }
  0xfb   : > { %796 = vtanh.f32 %v503_v38 }
 0x102   : > { %v791_v39 = vpop.eup %790 }
 0x103   : > { %520 = vst [vmem:[%s355_s29 + $0x10] sm:$0xff] %v791_v39 }
 0x104   : > { %v793_v40 = vpop.eup %792 }
 0x105   : > { %518 = vst [vmem:[%s355_s29] sm:$0xff] %v793_v40 }
 0x106   : > { %v795_v41 = vpop.eup %794 }
 0x107   : > { %521 = vst [vmem:[%s355_s29 + $0x18] sm:$0xff] %v795_v41 }
 0x108   : > { %v797_v42 = vpop.eup %796 }
 0x109   : > { %519 = vst [vmem:[%s355_s29 + $0x8] sm:$0xff] %v797_v42 }
 0x10a PF: > { %s15_s22 = sadd.s32 1, %s836_s22   ;;  %s958_s18 = smov %s828_s20 }
 0x10b   : > { %p12_p7 = scmp.ge.s32.totalorder %s15_s22, 6   ;;  %s959_s19 = smov %s832_s21 }
 0x10c   : > { %s960_s20 = smov %s963_s23  ;;  %s961_s21 = smov %s967_s24 }
 0x10d   :  { %14 = sbr.rel (!%p12_p7) target bundleno = 3 (0x3), region = 82 }

</bundles_post_ra>
